<compile_context>
chip_gen: v6e
topology: v6e:2x2x1
jax: 0.10.0
libtpu: 0.0.40
codegen_flags: <defaults>
</compile_context>

<pallas_src>
import numpy as np
import jax
import jax.numpy as jnp
from jax import lax
from jax.experimental import pallas as pl
from jax.experimental.pallas import tpu as pltpu

INPUT_DIM = 16
HIDDEN_DIM = 32
N_HEADS = 4
HEAD_DIM = HIDDEN_DIM // N_HEADS
N_LAYERS = 2            # args.head_layer
BN_EPS = 1e-5           # nn.BatchNorm1d default
NEG_SLOPE = 0.2         # GATv2Conv default negative_slope
MASK_VALUE = -1e30


# ---------------------------------------------------------------------------
# Pallas kernels
# ---------------------------------------------------------------------------
def _full_spec(shape):
    """Full-array block for a grid=(1,) pallas_call."""
    return pl.BlockSpec(shape, lambda i: tuple(0 for _ in shape))


def _linear_kernel(x_ref, w_ref, b_ref, o_ref):
    o_ref[...] = (jnp.dot(x_ref[...], w_ref[...],
                          preferred_element_type=jnp.float32) + b_ref[...])


def linear_pallas(x, w, b):
    """y = x @ w + b   (x: [N, Din], w: [Din, Dout], b: [Dout])."""
    N, Din = x.shape
    Dout = w.shape[1]
    return pl.pallas_call(
        _linear_kernel,
        out_shape=jax.ShapeDtypeStruct((N, Dout), jnp.float32),
        grid=(1,),
        in_specs=[_full_spec((N, Din)), _full_spec((Din, Dout)),
                  _full_spec((1, Dout))],
        out_specs=_full_spec((N, Dout)),
    )(x, w, b.reshape(1, Dout))


def _make_mha_block_kernel(B, Ss, St, Ns, Nt):
    """Fused forward_mha: QKV proj + cross-MHA (+zero attn) + out proj +
    sigmoid gate + BatchNorm1d(s) + BatchNorm1d(t), in a single kernel."""
    D, H, hd = HIDDEN_DIM, N_HEADS, HEAD_DIM
    scale = float(hd) ** -0.5   # PyTorch scales q by 1/sqrt(head_dim)

    def kernel(hs_ref, ht_ref, sval_ref, tval_ref, tbias_ref,
               wq_ref, bq_ref, wk_ref, bk_ref, wv_ref, bv_ref,
               wo_ref, bo_ref, wg_ref, bg_ref,
               gs_ref, bs_ref, gt_ref, bt_ref,
               os_ref, ot_ref):
        xs_gated = []                          # gated dense x_s, per batch
        sum_s = jnp.zeros((1, D), jnp.float32)
        sum_t = jnp.zeros((1, D), jnp.float32)
        for b in range(B):                     # B is tiny & static -> unrolled
            hs_b = hs_ref[b]                   # [Ss, D] dense (padded rows = 0)
            ht_b = ht_ref[b]                   # [St, D]
            bias_b = tbias_ref[b]              # [1, St]  (0 valid / -1e30 pad)
            h_cross = jnp.zeros((Ss, D), jnp.float32)
            for h in range(H):                 # per-head weights via [h] index
                q = jnp.dot(hs_b, wq_ref[h],
                            preferred_element_type=jnp.float32) + bq_ref[h]
                k = jnp.dot(ht_b, wk_ref[h],
                            preferred_element_type=jnp.float32) + bk_ref[h]
                v = jnp.dot(ht_b, wv_ref[h],
                            preferred_element_type=jnp.float32) + bv_ref[h]
                s = lax.dot_general(q, k, (((1,), (1,)), ((), ())),
                                    preferred_element_type=jnp.float32)
                s = s * scale + bias_b                       # [Ss, St]
                # add_zero_attn=True: implicit extra key with logit 0, value 0
                m = jnp.maximum(jnp.max(s, axis=-1, keepdims=True), 0.0)
                p = jnp.exp(s - m)
                denom = jnp.sum(p, axis=-1, keepdims=True) + jnp.exp(-m)
                o = jnp.dot(p, v, preferred_element_type=jnp.float32) / denom
                # out_proj(concat_h o_h) == sum_h o_h @ wo[h]
                h_cross = h_cross + jnp.dot(o, wo_ref[h],
                                            preferred_element_type=jnp.float32)
            h_cross = h_cross + bo_ref[...]
            # Linear(hidden, 1) + Sigmoid gate
            logit = (jnp.sum(h_cross * wg_ref[...], axis=-1, keepdims=True)
                     + bg_ref[...])
            score = 1.0 / (1.0 + jnp.exp(-logit))
            x_b = hs_b * score                 # padded rows stay exactly 0
            xs_gated.append(x_b)
            sum_s = sum_s + jnp.sum(x_b * sval_ref[b], axis=0, keepdims=True)
            sum_t = sum_t + jnp.sum(ht_b * tval_ref[b], axis=0, keepdims=True)
        # BatchNorm1d (training mode): masked batch stats over the valid nodes.
        # TODO(synk): running-stat updates (training-mode side effect) are not
        # materialized; only the normalized forward output is reproduced.
        mean_s = sum_s / float(Ns)
        mean_t = sum_t / float(Nt)
        vsum_s = jnp.zeros((1, D), jnp.float32)
        vsum_t = jnp.zeros((1, D), jnp.float32)
        for b in range(B):
            vsum_s = vsum_s + jnp.sum(
                jnp.square(xs_gated[b] - mean_s) * sval_ref[b],
                axis=0, keepdims=True)
            vsum_t = vsum_t + jnp.sum(
                jnp.square(ht_ref[b] - mean_t) * tval_ref[b],
                axis=0, keepdims=True)
        inv_s = lax.rsqrt(vsum_s / float(Ns) + BN_EPS)
        inv_t = lax.rsqrt(vsum_t / float(Nt) + BN_EPS)
        for b in range(B):
            os_ref[b] = gs_ref[...] * (xs_gated[b] - mean_s) * inv_s + bs_ref[...]
            ot_ref[b] = gt_ref[...] * (ht_ref[b] - mean_t) * inv_t + bt_ref[...]

    return kernel


def _gatv2_kernel(x_ref, wl_ref, bl_ref, wr_ref, br_ref, att_ref, adj_ref,
                  bias_ref, o_ref):
    """GATv2Conv(hidden, hidden, heads=1, concat=False) + fused F.relu for one
    graph stream (grid axis selects the s or t stream)."""
    # TODO(synk): tile target rows once N grows (the [N, N, D] broadcast is
    # N^2*D*4 bytes and would exceed VMEM for N >~ 512 on v7x).
    x = x_ref[0]                              # [N, D] (padded rows are zero)
    xl = jnp.dot(x, wl_ref[...], preferred_element_type=jnp.float32) + bl_ref[...]
    xr = jnp.dot(x, wr_ref[...], preferred_element_type=jnp.float32) + br_ref[...]
    z = xr[:, None, :] + xl[None, :, :]       # [N, N, D]  z[i, j] = x_i + x_j
    z = jnp.where(z > 0, z, NEG_SLOPE * z)    # LeakyReLU(0.2)
    e = jnp.sum(z * att_ref[...][None, :, :], axis=-1)        # [N, N]
    e = jnp.where(adj_ref[0] > 0, e, MASK_VALUE)               # edges + self loops
    e = e - jnp.max(e, axis=-1, keepdims=True)
    p = jnp.exp(e)
    p = p / jnp.sum(p, axis=-1, keepdims=True)                 # softmax over nbrs
    o_ref[0] = jnp.maximum(
        jnp.dot(p, xl, preferred_element_type=jnp.float32) + bias_ref[...], 0.0)


def gatv2_pallas(x_stack, p, adj_stack):
    """x_stack: [2, Nmax, D] (s / t streams, zero-padded), adj_stack: [2, Nmax, Nmax]."""
    G, Nmax, D = x_stack.shape
    return pl.pallas_call(
        _gatv2_kernel,
        out_shape=jax.ShapeDtypeStruct((G, Nmax, D), jnp.float32),
        grid=(G,),
        in_specs=[pl.BlockSpec((1, Nmax, D), lambda g: (g, 0, 0)),
                  pl.BlockSpec((D, D), lambda g: (0, 0)),
                  pl.BlockSpec((1, D), lambda g: (0, 0)),
                  pl.BlockSpec((D, D), lambda g: (0, 0)),
                  pl.BlockSpec((1, D), lambda g: (0, 0)),
                  pl.BlockSpec((1, D), lambda g: (0, 0)),
                  pl.BlockSpec((1, Nmax, Nmax), lambda g: (g, 0, 0)),
                  pl.BlockSpec((1, D), lambda g: (0, 0))],
        out_specs=pl.BlockSpec((1, Nmax, D), lambda g: (g, 0, 0)),
        compiler_params=pltpu.CompilerParams(
            dimension_semantics=("parallel",)),   # v7x: split streams across TCs
    )(x_stack, p['w_l'], p['b_l'].reshape(1, D), p['w_r'],
      p['b_r'].reshape(1, D), p['att'].reshape(1, D), adj_stack,
      p['bias'].reshape(1, D))


# ---------------------------------------------------------------------------
# JAX glue (static dense-batch tables, layer composition)
# ---------------------------------------------------------------------------
def make_forward(B, s_batch, s_pos, Ss, t_batch, t_pos, St):
    s_batch = np.asarray(s_batch); s_pos = np.asarray(s_pos)
    t_batch = np.asarray(t_batch); t_pos = np.asarray(t_pos)
    Ns, Nt = len(s_batch), len(t_batch)
    D, H, hd = HIDDEN_DIM, N_HEADS, HEAD_DIM

    def dense_tables(batch, pos, S, N):
        slot = (batch * S + pos).astype(np.int32)
        scat = np.full((B * S,), N, np.int32)          # sentinel -> zero row
        scat[slot] = np.arange(N, dtype=np.int32)
        valid2d = np.zeros((B, S), np.float32)
        valid2d[batch, pos] = 1.0
        return (jnp.asarray(scat), jnp.asarray(slot),
                jnp.asarray(valid2d[..., None]), valid2d)

    s_scat, s_gather, s_valid, _ = dense_tables(s_batch, s_pos, Ss, Ns)
    t_scat, t_gather, t_valid, tv2 = dense_tables(t_batch, t_pos, St, Nt)
    # additive key-padding bias for the cross attention (0 valid / -1e30 pad)
    t_bias = jnp.asarray(
        np.where(tv2 > 0, 0.0, MASK_VALUE).astype(np.float32).reshape(B, 1, St))

    mha_call = pl.pallas_call(
        _make_mha_block_kernel(B, Ss, St, Ns, Nt),
        out_shape=(jax.ShapeDtypeStruct((B, Ss, D), jnp.float32),
                   jax.ShapeDtypeStruct((B, St, D), jnp.float32)),
        grid=(1,),
        in_specs=[
            _full_spec((B, Ss, D)), _full_spec((B, St, D)),
            _full_spec((B, Ss, 1)), _full_spec((B, St, 1)),
            _full_spec((B, 1, St)),
            _full_spec((H, D, hd)), _full_spec((H, 1, hd)),
            _full_spec((H, D, hd)), _full_spec((H, 1, hd)),
            _full_spec((H, D, hd)), _full_spec((H, 1, hd)),
            _full_spec((H, hd, D)), _full_spec((1, D)),
            _full_spec((1, D)), _full_spec((1, 1)),
            _full_spec((1, D)), _full_spec((1, D)),
            _full_spec((1, D)), _full_spec((1, D)),
        ],
        out_specs=(_full_spec((B, Ss, D)), _full_spec((B, St, D))),
    )

    zrow = jnp.zeros((1, D), jnp.float32)

    def to_dense(x, scat, S):
        # scatter-as-gather: static index table, sentinel picks the zero row
        return jnp.take(jnp.concatenate([x, zrow], axis=0), scat,
                        axis=0).reshape(B, S, D)

    def mha_block(p, hs_flat, ht_flat):
        hs_dense = to_dense(hs_flat, s_scat, Ss)
        ht_dense = to_dense(ht_flat, t_scat, St)
        wq_h = p['wq'].reshape(D, H, hd).transpose(1, 0, 2)
        wk_h = p['wk'].reshape(D, H, hd).transpose(1, 0, 2)
        wv_h = p['wv'].reshape(D, H, hd).transpose(1, 0, 2)
        os_d, ot_d = mha_call(
            hs_dense, ht_dense, s_valid, t_valid, t_bias,
            wq_h, p['bq'].reshape(H, 1, hd),
            wk_h, p['bk'].reshape(H, 1, hd),
            wv_h, p['bv'].reshape(H, 1, hd),
            p['wo'].reshape(H, hd, D), p['bo'].reshape(1, D),
            p['w_gate'].reshape(1, D), p['b_gate'].reshape(1, 1),
            p['gamma_s'].reshape(1, D), p['beta_s'].reshape(1, D),
            p['gamma_t'].reshape(1, D), p['beta_t'].reshape(1, D))
        x_s = jnp.take(os_d.reshape(B * Ss, D), s_gather, axis=0)
        x_t = jnp.take(ot_d.reshape(B * St, D), t_gather, axis=0)
        return x_s, x_t

    Nmax = max(Ns, Nt)

    def forward(params, xs, xt, adj_s, adj_t):
        # self.pre on both streams with one fused linear call
        h_all = linear_pallas(jnp.concatenate([xs, xt], axis=0),
                              params['pre_w'], params['pre_b'])
        x_s, x_t = h_all[:Ns], h_all[Ns:]
        x_s, x_t = mha_block(params['mha'][0], x_s, x_t)
        emb_s, emb_t = [x_s], [x_t]
        adj_stack = jnp.stack([
            jnp.pad(adj_s, ((0, Nmax - Ns), (0, Nmax - Ns))),
            jnp.pad(adj_t, ((0, Nmax - Nt), (0, Nmax - Nt)))], axis=0)
        for i in range(N_LAYERS):
            x_stack = jnp.stack([
                jnp.pad(x_s, ((0, Nmax - Ns), (0, 0))),
                jnp.pad(x_t, ((0, Nmax - Nt), (0, 0)))], axis=0)
            conv_out = gatv2_pallas(x_stack, params['conv'][i], adj_stack)  # relu fused
            x_s, x_t = conv_out[0, :Ns], conv_out[1, :Nt]
            x_s, x_t = mha_block(params['mha'][i + 1], x_s, x_t)
            emb_s.append(x_s)
            emb_t.append(x_t)
        return jnp.concatenate(emb_s, axis=1), jnp.concatenate(emb_t, axis=1)

    return jax.jit(forward)


# ---------------------------------------------------------------------------
# Deterministic parameter construction (shapes from MutualForward.__init__)
# ---------------------------------------------------------------------------
def init_params(key):
    keys = iter(jax.random.split(key, 256))

    def nrm(shape, scale=0.1):
        return (scale * jax.random.normal(next(keys), shape)).astype(jnp.float32)

    params = {'pre_w': nrm((INPUT_DIM, HIDDEN_DIM)),
              'pre_b': nrm((HIDDEN_DIM,), 0.01)}
    mhas = []
    # __init__ builds n_layers + 2 MHA / gate / BN stacks; forward uses 0..n_layers
    for _ in range(N_LAYERS + 2):
        mhas.append(dict(
            wq=nrm((HIDDEN_DIM, HIDDEN_DIM)), bq=nrm((HIDDEN_DIM,), 0.01),
            wk=nrm((HIDDEN_DIM, HIDDEN_DIM)), bk=nrm((HIDDEN_DIM,), 0.01),
            wv=nrm((HIDDEN_DIM, HIDDEN_DIM)), bv=nrm((HIDDEN_DIM,), 0.01),
            wo=nrm((HIDDEN_DIM, HIDDEN_DIM)), bo=nrm((HIDDEN_DIM,), 0.01),
            w_gate=nrm((HIDDEN_DIM,)), b_gate=nrm((1,), 0.01),
            gamma_s=jnp.ones((HIDDEN_DIM,), jnp.float32),
            beta_s=jnp.zeros((HIDDEN_DIM,), jnp.float32),
            gamma_t=jnp.ones((HIDDEN_DIM,), jnp.float32),
            beta_t=jnp.zeros((HIDDEN_DIM,), jnp.float32)))
    convs = []
    for _ in range(N_LAYERS):
        convs.append(dict(
            w_l=nrm((HIDDEN_DIM, HIDDEN_DIM)), b_l=nrm((HIDDEN_DIM,), 0.01),
            w_r=nrm((HIDDEN_DIM, HIDDEN_DIM)), b_r=nrm((HIDDEN_DIM,), 0.01),
            att=nrm((HIDDEN_DIM,)),
            bias=nrm((HIDDEN_DIM,), 0.01)))
    params['mha'] = mhas
    params['conv'] = convs
    return params


def build_graph(sizes):
    """Ring-connected small graphs; returns batch ids, in-graph positions,
    max-graph-size, dense adjacency (with self loops), and node count."""
    sizes = list(sizes)
    N = int(sum(sizes))
    batch = np.concatenate([np.full(n, g, np.int32) for g, n in enumerate(sizes)])
    pos = np.concatenate([np.arange(n, dtype=np.int32) for n in sizes])
    S = int(max(sizes))
    adj = np.zeros((N, N), np.float32)      # adj[target, source]
    off = 0
    for n in sizes:
        for i in range(n):
            j = (i + 1) % n
            if j != i:
                adj[off + j, off + i] = 1.0
                adj[off + i, off + j] = 1.0
        off += n
    adj[np.arange(N), np.arange(N)] = 1.0   # GATv2Conv add_self_loops=True
    return batch, pos, S, adj, N


if __name__ == "__main__":
    key = jax.random.PRNGKey(0)
    k_params, k_xs, k_xt = jax.random.split(key, 3)

    s_sizes = (5, 3)   # data_s: batch of 2 graphs -> 8 nodes
    t_sizes = (4, 6)   # data_t: batch of 2 graphs -> 10 nodes
    B = len(s_sizes)
    s_batch, s_pos, Ss, adj_s, Ns = build_graph(s_sizes)
    t_batch, t_pos, St, adj_t, Nt = build_graph(t_sizes)

    xs = jax.random.normal(k_xs, (Ns, INPUT_DIM), dtype=jnp.float32)
    xt = jax.random.normal(k_xt, (Nt, INPUT_DIM), dtype=jnp.float32)
    params = init_params(k_params)

    fwd = make_forward(B, s_batch, s_pos, Ss, t_batch, t_pos, St)
    emb_s, emb_t = fwd(params, xs, xt, jnp.asarray(adj_s), jnp.asarray(adj_t))
    jax.block_until_ready((emb_s, emb_t))

    assert emb_s.shape == (Ns, HIDDEN_DIM * (N_LAYERS + 1))
    assert emb_t.shape == (Nt, HIDDEN_DIM * (N_LAYERS + 1))
    assert bool(jnp.all(jnp.isfinite(emb_s))) and bool(jnp.all(jnp.isfinite(emb_t)))
    print("KERNEL_OK")
</pallas_src>

<mosaic_0001>
module attributes {stable_mosaic.version = 11 : i64} {
  func.func @_linear_kernel(%arg0: i32, %arg1: memref<18x16xf32, #tpu.memory_space<vmem>>, %arg2: memref<16x32xf32, #tpu.memory_space<vmem>>, %arg3: memref<1x32xf32, #tpu.memory_space<vmem>>, %arg4: memref<18x32xf32, #tpu.memory_space<vmem>>) attributes {dimension_semantics = [#tpu.dimension_semantics<arbitrary>], iteration_bounds = array<i64: 1>, scalar_prefetch = 0 : i64, scratch_operands = 0 : i64, tpu.core_type = #tpu.core_type<tc>, window_params = [{pipeline_mode = #tpu.pipeline_mode<synchronous>, transform_indices = @transform_0, window_bounds = array<i64: 18, 16>}, {pipeline_mode = #tpu.pipeline_mode<synchronous>, transform_indices = @transform_1, window_bounds = array<i64: 16, 32>}, {pipeline_mode = #tpu.pipeline_mode<synchronous>, transform_indices = @transform_2, window_bounds = array<i64: 1, 32>}, {pipeline_mode = #tpu.pipeline_mode<synchronous>, transform_indices = @transform_3, window_bounds = array<i64: 18, 32>}]} {
    %c0 = arith.constant 0 : index
    %c0_0 = arith.constant 0 : index
    %0 = vector.load %arg1[%c0, %c0_0] : memref<18x16xf32, #tpu.memory_space<vmem>>, vector<18x16xf32>
    %c0_1 = arith.constant 0 : index
    %c0_2 = arith.constant 0 : index
    %1 = vector.load %arg2[%c0_1, %c0_2] : memref<16x32xf32, #tpu.memory_space<vmem>>, vector<16x32xf32>
    %cst = arith.constant dense<0.000000e+00> : vector<18x32xf32>
    %2 = tpu.matmul %0, %1, %cst {dimension_numbers = #tpu.dot_dimension_numbers<[1], [0], [0], [1], [0, 0, 1, 1], [], []>} : vector<18x16xf32>, vector<16x32xf32>, vector<18x32xf32> -> vector<18x32xf32>
    %c0_3 = arith.constant 0 : index
    %c0_4 = arith.constant 0 : index
    %3 = vector.load %arg3[%c0_3, %c0_4] : memref<1x32xf32, #tpu.memory_space<vmem>>, vector<1x32xf32>
    %4 = vector.broadcast %3 : vector<1x32xf32> to vector<18x32xf32>
    %5 = arith.addf %2, %4 : vector<18x32xf32>
    %c0_5 = arith.constant 0 : index
    %c0_6 = arith.constant 0 : index
    %6 = vector.load %arg4[%c0_5, %c0_6] : memref<18x32xf32, #tpu.memory_space<vmem>>, vector<18x32xf32>
    tpu.vector_store %arg4[%c0_5, %c0_6], %5 {strides = array<i32>} : memref<18x32xf32, #tpu.memory_space<vmem>>, vector<18x32xf32>,
    return
  }
  func.func @transform_0(%arg0: i32) -> (i32, i32) {
    %c0_i32 = arith.constant 0 : i32
    %c0_i32_0 = arith.constant 0 : i32
    %c0_i32_1 = arith.constant 0 : i32
    return %c0_i32, %c0_i32_0 : i32, i32
  }
  func.func @transform_1(%arg0: i32) -> (i32, i32) {
    %c0_i32 = arith.constant 0 : i32
    %c0_i32_0 = arith.constant 0 : i32
    %c0_i32_1 = arith.constant 0 : i32
    return %c0_i32, %c0_i32_0 : i32, i32
  }
  func.func @transform_2(%arg0: i32) -> (i32, i32) {
    %c0_i32 = arith.constant 0 : i32
    %c0_i32_0 = arith.constant 0 : i32
    %c0_i32_1 = arith.constant 0 : i32
    return %c0_i32, %c0_i32_0 : i32, i32
  }
  func.func @transform_3(%arg0: i32) -> (i32, i32) {
    %c0_i32 = arith.constant 0 : i32
    %c0_i32_0 = arith.constant 0 : i32
    %c0_i32_1 = arith.constant 0 : i32
    return %c0_i32, %c0_i32_0 : i32, i32
  }
}

module attributes {stable_mosaic.version = 11 : i64} {
  func.func @kernel(%arg0: i32, %arg1: memref<2x5x32xf32, #tpu.memory_space<vmem>>, %arg2: memref<2x6x32xf32, #tpu.memory_space<vmem>>, %arg3: memref<2x5x1xf32, #tpu.memory_space<vmem>>, %arg4: memref<2x6x1xf32, #tpu.memory_space<vmem>>, %arg5: memref<2x1x6xf32, #tpu.memory_space<vmem>>, %arg6: memref<4x32x8xf32, #tpu.memory_space<vmem>>, %arg7: memref<4x1x8xf32, #tpu.memory_space<vmem>>, %arg8: memref<4x32x8xf32, #tpu.memory_space<vmem>>, %arg9: memref<4x1x8xf32, #tpu.memory_space<vmem>>, %arg10: memref<4x32x8xf32, #tpu.memory_space<vmem>>, %arg11: memref<4x1x8xf32, #tpu.memory_space<vmem>>, %arg12: memref<4x8x32xf32, #tpu.memory_space<vmem>>, %arg13: memref<1x32xf32, #tpu.memory_space<vmem>>, %arg14: memref<1x32xf32, #tpu.memory_space<vmem>>, %arg15: memref<1x1xf32, #tpu.memory_space<vmem>>, %arg16: memref<1x32xf32, #tpu.memory_space<vmem>>, %arg17: memref<1x32xf32, #tpu.memory_space<vmem>>, %arg18: memref<1x32xf32, #tpu.memory_space<vmem>>, %arg19: memref<1x32xf32, #tpu.memory_space<vmem>>, %arg20: memref<2x5x32xf32, #tpu.memory_space<vmem>>, %arg21: memref<2x6x32xf32, #tpu.memory_space<vmem>>) attributes {dimension_semantics = [#tpu.dimension_semantics<arbitrary>], iteration_bounds = array<i64: 1>, scalar_prefetch = 0 : i64, scratch_operands = 0 : i64, tpu.core_type = #tpu.core_type<tc>, window_params = [{pipeline_mode = #tpu.pipeline_mode<synchronous>, transform_indices = @transform_0, window_bounds = array<i64: 2, 5, 32>}, {pipeline_mode = #tpu.pipeline_mode<synchronous>, transform_indices = @transform_1, window_bounds = array<i64: 2, 6, 32>}, {pipeline_mode = #tpu.pipeline_mode<synchronous>, transform_indices = @transform_2, window_bounds = array<i64: 2, 5, 1>}, {pipeline_mode = #tpu.pipeline_mode<synchronous>, transform_indices = @transform_3, window_bounds = array<i64: 2, 6, 1>}, {pipeline_mode = #tpu.pipeline_mode<synchronous>, transform_indices = @transform_4, window_bounds = array<i64: 2, 1, 6>}, {pipeline_mode = #tpu.pipeline_mode<synchronous>, transform_indices = @transform_5, window_bounds = array<i64: 4, 32, 8>}, {pipeline_mode = #tpu.pipeline_mode<synchronous>, transform_indices = @transform_6, window_bounds = array<i64: 4, 1, 8>}, {pipeline_mode = #tpu.pipeline_mode<synchronous>, transform_indices = @transform_7, window_bounds = array<i64: 4, 32, 8>}, {pipeline_mode = #tpu.pipeline_mode<synchronous>, transform_indices = @transform_8, window_bounds = array<i64: 4, 1, 8>}, {pipeline_mode = #tpu.pipeline_mode<synchronous>, transform_indices = @transform_9, window_bounds = array<i64: 4, 32, 8>}, {pipeline_mode = #tpu.pipeline_mode<synchronous>, transform_indices = @transform_10, window_bounds = array<i64: 4, 1, 8>}, {pipeline_mode = #tpu.pipeline_mode<synchronous>, transform_indices = @transform_11, window_bounds = array<i64: 4, 8, 32>}, {pipeline_mode = #tpu.pipeline_mode<synchronous>, transform_indices = @transform_12, window_bounds = array<i64: 1, 32>}, {pipeline_mode = #tpu.pipeline_mode<synchronous>, transform_indices = @transform_13, window_bounds = array<i64: 1, 32>}, {pipeline_mode = #tpu.pipeline_mode<synchronous>, transform_indices = @transform_14, window_bounds = array<i64: 1, 1>}, {pipeline_mode = #tpu.pipeline_mode<synchronous>, transform_indices = @transform_15, window_bounds = array<i64: 1, 32>}, {pipeline_mode = #tpu.pipeline_mode<synchronous>, transform_indices = @transform_16, window_bounds = array<i64: 1, 32>}, {pipeline_mode = #tpu.pipeline_mode<synchronous>, transform_indices = @transform_17, window_bounds = array<i64: 1, 32>}, {pipeline_mode = #tpu.pipeline_mode<synchronous>, transform_indices = @transform_18, window_bounds = array<i64: 1, 32>}, {pipeline_mode = #tpu.pipeline_mode<synchronous>, transform_indices = @transform_19, window_bounds = array<i64: 2, 5, 32>}, {pipeline_mode = #tpu.pipeline_mode<synchronous>, transform_indices = @transform_20, window_bounds = array<i64: 2, 6, 32>}]} {
    %cst = arith.constant 0.000000e+00 : f32
    %0 = vector.broadcast %cst : f32 to vector<1x32xf32>
    %cst_0 = arith.constant 0.000000e+00 : f32
    %1 = vector.broadcast %cst_0 : f32 to vector<1x32xf32>
    %c0 = arith.constant 0 : index
    %c0_1 = arith.constant 0 : index
    %c0_2 = arith.constant 0 : index
    %2 = vector.load %arg1[%c0, %c0_1, %c0_2] : memref<2x5x32xf32, #tpu.memory_space<vmem>>, vector<1x5x32xf32>
    %3 = vector.shape_cast %2 : vector<1x5x32xf32> to vector<5x32xf32>
    %c0_3 = arith.constant 0 : index
    %c0_4 = arith.constant 0 : index
    %c0_5 = arith.constant 0 : index
    %4 = vector.load %arg2[%c0_3, %c0_4, %c0_5] : memref<2x6x32xf32, #tpu.memory_space<vmem>>, vector<1x6x32xf32>
    %5 = vector.shape_cast %4 : vector<1x6x32xf32> to vector<6x32xf32>
    %c0_6 = arith.constant 0 : index
    %c0_7 = arith.constant 0 : index
    %c0_8 = arith.constant 0 : index
    %6 = vector.load %arg5[%c0_6, %c0_7, %c0_8] : memref<2x1x6xf32, #tpu.memory_space<vmem>>, vector<1x1x6xf32>
    %7 = vector.shape_cast %6 : vector<1x1x6xf32> to vector<1x6xf32>
    %cst_9 = arith.constant 0.000000e+00 : f32
    %8 = vector.broadcast %cst_9 : f32 to vector<5x32xf32>
    %c0_10 = arith.constant 0 : index
    %c0_11 = arith.constant 0 : index
    %c0_12 = arith.constant 0 : index
    %9 = vector.load %arg6[%c0_10, %c0_11, %c0_12] : memref<4x32x8xf32, #tpu.memory_space<vmem>>, vector<1x32x8xf32>
    %10 = vector.shape_cast %9 : vector<1x32x8xf32> to vector<32x8xf32>
    %cst_13 = arith.constant dense<0.000000e+00> : vector<5x8xf32>
    %11 = tpu.matmul %3, %10, %cst_13 {dimension_numbers = #tpu.dot_dimension_numbers<[1], [0], [0], [1], [0, 0, 1, 1], [], []>} : vector<5x32xf32>, vector<32x8xf32>, vector<5x8xf32> -> vector<5x8xf32>
    %c0_14 = arith.constant 0 : index
    %c0_15 = arith.constant 0 : index
    %c0_16 = arith.constant 0 : index
    %12 = vector.load %arg7[%c0_14, %c0_15, %c0_16] : memref<4x1x8xf32, #tpu.memory_space<vmem>>, vector<1x1x8xf32>
    %13 = vector.shape_cast %12 : vector<1x1x8xf32> to vector<1x8xf32>
    %14 = vector.broadcast %13 : vector<1x8xf32> to vector<5x8xf32>
    %15 = arith.addf %11, %14 : vector<5x8xf32>
    %c0_17 = arith.constant 0 : index
    %c0_18 = arith.constant 0 : index
    %c0_19 = arith.constant 0 : index
    %16 = vector.load %arg8[%c0_17, %c0_18, %c0_19] : memref<4x32x8xf32, #tpu.memory_space<vmem>>, vector<1x32x8xf32>
    %17 = vector.shape_cast %16 : vector<1x32x8xf32> to vector<32x8xf32>
    %cst_20 = arith.constant dense<0.000000e+00> : vector<6x8xf32>
    %18 = tpu.matmul %5, %17, %cst_20 {dimension_numbers = #tpu.dot_dimension_numbers<[1], [0], [0], [1], [0, 0, 1, 1], [], []>} : vector<6x32xf32>, vector<32x8xf32>, vector<6x8xf32> -> vector<6x8xf32>
    %c0_21 = arith.constant 0 : index
    %c0_22 = arith.constant 0 : index
    %c0_23 = arith.constant 0 : index
    %19 = vector.load %arg9[%c0_21, %c0_22, %c0_23] : memref<4x1x8xf32, #tpu.memory_space<vmem>>, vector<1x1x8xf32>
    %20 = vector.shape_cast %19 : vector<1x1x8xf32> to vector<1x8xf32>
    %21 = vector.broadcast %20 : vector<1x8xf32> to vector<6x8xf32>
    %22 = arith.addf %18, %21 : vector<6x8xf32>
    %c0_24 = arith.constant 0 : index
    %c0_25 = arith.constant 0 : index
    %c0_26 = arith.constant 0 : index
    %23 = vector.load %arg10[%c0_24, %c0_25, %c0_26] : memref<4x32x8xf32, #tpu.memory_space<vmem>>, vector<1x32x8xf32>
    %24 = vector.shape_cast %23 : vector<1x32x8xf32> to vector<32x8xf32>
    %cst_27 = arith.constant dense<0.000000e+00> : vector<6x8xf32>
    %25 = tpu.matmul %5, %24, %cst_27 {dimension_numbers = #tpu.dot_dimension_numbers<[1], [0], [0], [1], [0, 0, 1, 1], [], []>} : vector<6x32xf32>, vector<32x8xf32>, vector<6x8xf32> -> vector<6x8xf32>
    %c0_28 = arith.constant 0 : index
    %c0_29 = arith.constant 0 : index
    %c0_30 = arith.constant 0 : index
    %26 = vector.load %arg11[%c0_28, %c0_29, %c0_30] : memref<4x1x8xf32, #tpu.memory_space<vmem>>, vector<1x1x8xf32>
    %27 = vector.shape_cast %26 : vector<1x1x8xf32> to vector<1x8xf32>
    %28 = vector.broadcast %27 : vector<1x8xf32> to vector<6x8xf32>
    %29 = arith.addf %25, %28 : vector<6x8xf32>
    %cst_31 = arith.constant dense<0.000000e+00> : vector<5x6xf32>
    %30 = tpu.matmul %15, %22, %cst_31 {dimension_numbers = #tpu.dot_dimension_numbers<[1], [1], [0], [0], [0, 0, 1, 0], [], []>} : vector<5x8xf32>, vector<6x8xf32>, vector<5x6xf32> -> vector<5x6xf32>
    %cst_32 = arith.constant 0.353553385 : f32
    %31 = vector.broadcast %cst_32 : f32 to vector<5x6xf32>
    %32 = arith.mulf %30, %31 : vector<5x6xf32>
    %33 = vector.broadcast %7 : vector<1x6xf32> to vector<5x6xf32>
    %34 = arith.addf %32, %33 : vector<5x6xf32>
    %cst_33 = arith.constant dense<0xFF800000> : vector<5xf32>
    %35 = vector.multi_reduction <maximumf>, %34, %cst_33 [1] : vector<5x6xf32> to vector<5xf32>
    %36 = vector.shape_cast %35 : vector<5xf32> to vector<5x1xf32>
    %cst_34 = arith.constant 0.000000e+00 : f32
    %37 = vector.broadcast %cst_34 : f32 to vector<5x1xf32>
    %38 = arith.maximumf %36, %37 : vector<5x1xf32>
    %39 = vector.broadcast %38 : vector<5x1xf32> to vector<5x6xf32>
    %40 = arith.subf %34, %39 : vector<5x6xf32>
    %41 = math.exp %40 : vector<5x6xf32>
    %cst_35 = arith.constant dense<0.000000e+00> : vector<5xf32>
    %42 = vector.multi_reduction <add>, %41, %cst_35 [1] : vector<5x6xf32> to vector<5xf32>
    %43 = vector.shape_cast %42 : vector<5xf32> to vector<5x1xf32>
    %cst_36 = arith.constant 0.000000e+00 : f32
    %44 = vector.broadcast %cst_36 : f32 to vector<5x1xf32>
    %45 = arith.subf %44, %38 : vector<5x1xf32>
    %46 = math.exp %45 : vector<5x1xf32>
    %47 = arith.addf %43, %46 : vector<5x1xf32>
    %cst_37 = arith.constant dense<0.000000e+00> : vector<5x8xf32>
    %48 = tpu.matmul %41, %29, %cst_37 {dimension_numbers = #tpu.dot_dimension_numbers<[1], [0], [0], [1], [0, 0, 1, 1], [], []>} : vector<5x6xf32>, vector<6x8xf32>, vector<5x8xf32> -> vector<5x8xf32>
    %49 = vector.broadcast %47 : vector<5x1xf32> to vector<5x8xf32>
    %50 = arith.divf %48, %49 : vector<5x8xf32>
    %c0_38 = arith.constant 0 : index
    %c0_39 = arith.constant 0 : index
    %c0_40 = arith.constant 0 : index
    %51 = vector.load %arg12[%c0_38, %c0_39, %c0_40] : memref<4x8x32xf32, #tpu.memory_space<vmem>>, vector<1x8x32xf32>
    %52 = vector.shape_cast %51 : vector<1x8x32xf32> to vector<8x32xf32>
    %cst_41 = arith.constant dense<0.000000e+00> : vector<5x32xf32>
    %53 = tpu.matmul %50, %52, %cst_41 {dimension_numbers = #tpu.dot_dimension_numbers<[1], [0], [0], [1], [0, 0, 1, 1], [], []>} : vector<5x8xf32>, vector<8x32xf32>, vector<5x32xf32> -> vector<5x32xf32>
    %54 = arith.addf %8, %53 : vector<5x32xf32>
    %c1 = arith.constant 1 : index
    %c0_42 = arith.constant 0 : index
    %c0_43 = arith.constant 0 : index
    %55 = vector.load %arg6[%c1, %c0_42, %c0_43] : memref<4x32x8xf32, #tpu.memory_space<vmem>>, vector<1x32x8xf32>
    %56 = vector.shape_cast %55 : vector<1x32x8xf32> to vector<32x8xf32>
    %cst_44 = arith.constant dense<0.000000e+00> : vector<5x8xf32>
    %57 = tpu.matmul %3, %56, %cst_44 {dimension_numbers = #tpu.dot_dimension_numbers<[1], [0], [0], [1], [0, 0, 1, 1], [], []>} : vector<5x32xf32>, vector<32x8xf32>, vector<5x8xf32> -> vector<5x8xf32>
    %c1_45 = arith.constant 1 : index
    %c0_46 = arith.constant 0 : index
    %c0_47 = arith.constant 0 : index
    %58 = vector.load %arg7[%c1_45, %c0_46, %c0_47] : memref<4x1x8xf32, #tpu.memory_space<vmem>>, vector<1x1x8xf32>
    %59 = vector.shape_cast %58 : vector<1x1x8xf32> to vector<1x8xf32>
    %60 = vector.broadcast %59 : vector<1x8xf32> to vector<5x8xf32>
    %61 = arith.addf %57, %60 : vector<5x8xf32>
    %c1_48 = arith.constant 1 : index
    %c0_49 = arith.constant 0 : index
    %c0_50 = arith.constant 0 : index
    %62 = vector.load %arg8[%c1_48, %c0_49, %c0_50] : memref<4x32x8xf32, #tpu.memory_space<vmem>>, vector<1x32x8xf32>
    %63 = vector.shape_cast %62 : vector<1x32x8xf32> to vector<32x8xf32>
    %cst_51 = arith.constant dense<0.000000e+00> : vector<6x8xf32>
    %64 = tpu.matmul %5, %63, %cst_51 {dimension_numbers = #tpu.dot_dimension_numbers<[1], [0], [0], [1], [0, 0, 1, 1], [], []>} : vector<6x32xf32>, vector<32x8xf32>, vector<6x8xf32> -> vector<6x8xf32>
    %c1_52 = arith.constant 1 : index
    %c0_53 = arith.constant 0 : index
    %c0_54 = arith.constant 0 : index
    %65 = vector.load %arg9[%c1_52, %c0_53, %c0_54] : memref<4x1x8xf32, #tpu.memory_space<vmem>>, vector<1x1x8xf32>
    %66 = vector.shape_cast %65 : vector<1x1x8xf32> to vector<1x8xf32>
    %67 = vector.broadcast %66 : vector<1x8xf32> to vector<6x8xf32>
    %68 = arith.addf %64, %67 : vector<6x8xf32>
    %c1_55 = arith.constant 1 : index
    %c0_56 = arith.constant 0 : index
    %c0_57 = arith.constant 0 : index
    %69 = vector.load %arg10[%c1_55, %c0_56, %c0_57] : memref<4x32x8xf32, #tpu.memory_space<vmem>>, vector<1x32x8xf32>
    %70 = vector.shape_cast %69 : vector<1x32x8xf32> to vector<32x8xf32>
    %cst_58 = arith.constant dense<0.000000e+00> : vector<6x8xf32>
    %71 = tpu.matmul %5, %70, %cst_58 {dimension_numbers = #tpu.dot_dimension_numbers<[1], [0], [0], [1], [0, 0, 1, 1], [], []>} : vector<6x32xf32>, vector<32x8xf32>, vector<6x8xf32> -> vector<6x8xf32>
    %c1_59 = arith.constant 1 : index
    %c0_60 = arith.constant 0 : index
    %c0_61 = arith.constant 0 : index
    %72 = vector.load %arg11[%c1_59, %c0_60, %c0_61] : memref<4x1x8xf32, #tpu.memory_space<vmem>>, vector<1x1x8xf32>
    %73 = vector.shape_cast %72 : vector<1x1x8xf32> to vector<1x8xf32>
    %74 = vector.broadcast %73 : vector<1x8xf32> to vector<6x8xf32>
    %75 = arith.addf %71, %74 : vector<6x8xf32>
    %cst_62 = arith.constant dense<0.000000e+00> : vector<5x6xf32>
    %76 = tpu.matmul %61, %68, %cst_62 {dimension_numbers = #tpu.dot_dimension_numbers<[1], [1], [0], [0], [0, 0, 1, 0], [], []>} : vector<5x8xf32>, vector<6x8xf32>, vector<5x6xf32> -> vector<5x6xf32>
    %cst_63 = arith.constant 0.353553385 : f32
    %77 = vector.broadcast %cst_63 : f32 to vector<5x6xf32>
    %78 = arith.mulf %76, %77 : vector<5x6xf32>
    %79 = vector.broadcast %7 : vector<1x6xf32> to vector<5x6xf32>
    %80 = arith.addf %78, %79 : vector<5x6xf32>
    %cst_64 = arith.constant dense<0xFF800000> : vector<5xf32>
    %81 = vector.multi_reduction <maximumf>, %80, %cst_64 [1] : vector<5x6xf32> to vector<5xf32>
    %82 = vector.shape_cast %81 : vector<5xf32> to vector<5x1xf32>
    %cst_65 = arith.constant 0.000000e+00 : f32
    %83 = vector.broadcast %cst_65 : f32 to vector<5x1xf32>
    %84 = arith.maximumf %82, %83 : vector<5x1xf32>
    %85 = vector.broadcast %84 : vector<5x1xf32> to vector<5x6xf32>
    %86 = arith.subf %80, %85 : vector<5x6xf32>
    %87 = math.exp %86 : vector<5x6xf32>
    %cst_66 = arith.constant dense<0.000000e+00> : vector<5xf32>
    %88 = vector.multi_reduction <add>, %87, %cst_66 [1] : vector<5x6xf32> to vector<5xf32>
    %89 = vector.shape_cast %88 : vector<5xf32> to vector<5x1xf32>
    %cst_67 = arith.constant 0.000000e+00 : f32
    %90 = vector.broadcast %cst_67 : f32 to vector<5x1xf32>
    %91 = arith.subf %90, %84 : vector<5x1xf32>
    %92 = math.exp %91 : vector<5x1xf32>
    %93 = arith.addf %89, %92 : vector<5x1xf32>
    %cst_68 = arith.constant dense<0.000000e+00> : vector<5x8xf32>
    %94 = tpu.matmul %87, %75, %cst_68 {dimension_numbers = #tpu.dot_dimension_numbers<[1], [0], [0], [1], [0, 0, 1, 1], [], []>} : vector<5x6xf32>, vector<6x8xf32>, vector<5x8xf32> -> vector<5x8xf32>
    %95 = vector.broadcast %93 : vector<5x1xf32> to vector<5x8xf32>
    %96 = arith.divf %94, %95 : vector<5x8xf32>
    %c1_69 = arith.constant 1 : index
    %c0_70 = arith.constant 0 : index
    %c0_71 = arith.constant 0 : index
    %97 = vector.load %arg12[%c1_69, %c0_70, %c0_71] : memref<4x8x32xf32, #tpu.memory_space<vmem>>, vector<1x8x32xf32>
    %98 = vector.shape_cast %97 : vector<1x8x32xf32> to vector<8x32xf32>
    %cst_72 = arith.constant dense<0.000000e+00> : vector<5x32xf32>
    %99 = tpu.matmul %96, %98, %cst_72 {dimension_numbers = #tpu.dot_dimension_numbers<[1], [0], [0], [1], [0, 0, 1, 1], [], []>} : vector<5x8xf32>, vector<8x32xf32>, vector<5x32xf32> -> vector<5x32xf32>
    %100 = arith.addf %54, %99 : vector<5x32xf32>
    %c2 = arith.constant 2 : index
    %c0_73 = arith.constant 0 : index
    %c0_74 = arith.constant 0 : index
    %101 = vector.load %arg6[%c2, %c0_73, %c0_74] : memref<4x32x8xf32, #tpu.memory_space<vmem>>, vector<1x32x8xf32>
    %102 = vector.shape_cast %101 : vector<1x32x8xf32> to vector<32x8xf32>
    %cst_75 = arith.constant dense<0.000000e+00> : vector<5x8xf32>
    %103 = tpu.matmul %3, %102, %cst_75 {dimension_numbers = #tpu.dot_dimension_numbers<[1], [0], [0], [1], [0, 0, 1, 1], [], []>} : vector<5x32xf32>, vector<32x8xf32>, vector<5x8xf32> -> vector<5x8xf32>
    %c2_76 = arith.constant 2 : index
    %c0_77 = arith.constant 0 : index
    %c0_78 = arith.constant 0 : index
    %104 = vector.load %arg7[%c2_76, %c0_77, %c0_78] : memref<4x1x8xf32, #tpu.memory_space<vmem>>, vector<1x1x8xf32>
    %105 = vector.shape_cast %104 : vector<1x1x8xf32> to vector<1x8xf32>
    %106 = vector.broadcast %105 : vector<1x8xf32> to vector<5x8xf32>
    %107 = arith.addf %103, %106 : vector<5x8xf32>
    %c2_79 = arith.constant 2 : index
    %c0_80 = arith.constant 0 : index
    %c0_81 = arith.constant 0 : index
    %108 = vector.load %arg8[%c2_79, %c0_80, %c0_81] : memref<4x32x8xf32, #tpu.memory_space<vmem>>, vector<1x32x8xf32>
    %109 = vector.shape_cast %108 : vector<1x32x8xf32> to vector<32x8xf32>
    %cst_82 = arith.constant dense<0.000000e+00> : vector<6x8xf32>
    %110 = tpu.matmul %5, %109, %cst_82 {dimension_numbers = #tpu.dot_dimension_numbers<[1], [0], [0], [1], [0, 0, 1, 1], [], []>} : vector<6x32xf32>, vector<32x8xf32>, vector<6x8xf32> -> vector<6x8xf32>
    %c2_83 = arith.constant 2 : index
    %c0_84 = arith.constant 0 : index
    %c0_85 = arith.constant 0 : index
    %111 = vector.load %arg9[%c2_83, %c0_84, %c0_85] : memref<4x1x8xf32, #tpu.memory_space<vmem>>, vector<1x1x8xf32>
    %112 = vector.shape_cast %111 : vector<1x1x8xf32> to vector<1x8xf32>
    %113 = vector.broadcast %112 : vector<1x8xf32> to vector<6x8xf32>
    %114 = arith.addf %110, %113 : vector<6x8xf32>
    %c2_86 = arith.constant 2 : index
    %c0_87 = arith.constant 0 : index
    %c0_88 = arith.constant 0 : index
    %115 = vector.load %arg10[%c2_86, %c0_87, %c0_88] : memref<4x32x8xf32, #tpu.memory_space<vmem>>, vector<1x32x8xf32>
    %116 = vector.shape_cast %115 : vector<1x32x8xf32> to vector<32x8xf32>
    %cst_89 = arith.constant dense<0.000000e+00> : vector<6x8xf32>
    %117 = tpu.matmul %5, %116, %cst_89 {dimension_numbers = #tpu.dot_dimension_numbers<[1], [0], [0], [1], [0, 0, 1, 1], [], []>} : vector<6x32xf32>, vector<32x8xf32>, vector<6x8xf32> -> vector<6x8xf32>
    %c2_90 = arith.constant 2 : index
    %c0_91 = arith.constant 0 : index
    %c0_92 = arith.constant 0 : index
    %118 = vector.load %arg11[%c2_90, %c0_91, %c0_92] : memref<4x1x8xf32, #tpu.memory_space<vmem>>, vector<1x1x8xf32>
    %119 = vector.shape_cast %118 : vector<1x1x8xf32> to vector<1x8xf32>
    %120 = vector.broadcast %119 : vector<1x8xf32> to vector<6x8xf32>
    %121 = arith.addf %117, %120 : vector<6x8xf32>
    %cst_93 = arith.constant dense<0.000000e+00> : vector<5x6xf32>
    %122 = tpu.matmul %107, %114, %cst_93 {dimension_numbers = #tpu.dot_dimension_numbers<[1], [1], [0], [0], [0, 0, 1, 0], [], []>} : vector<5x8xf32>, vector<6x8xf32>, vector<5x6xf32> -> vector<5x6xf32>
    %cst_94 = arith.constant 0.353553385 : f32
    %123 = vector.broadcast %cst_94 : f32 to vector<5x6xf32>
    %124 = arith.mulf %122, %123 : vector<5x6xf32>
    %125 = vector.broadcast %7 : vector<1x6xf32> to vector<5x6xf32>
    %126 = arith.addf %124, %125 : vector<5x6xf32>
    %cst_95 = arith.constant dense<0xFF800000> : vector<5xf32>
    %127 = vector.multi_reduction <maximumf>, %126, %cst_95 [1] : vector<5x6xf32> to vector<5xf32>
    %128 = vector.shape_cast %127 : vector<5xf32> to vector<5x1xf32>
    %cst_96 = arith.constant 0.000000e+00 : f32
    %129 = vector.broadcast %cst_96 : f32 to vector<5x1xf32>
    %130 = arith.maximumf %128, %129 : vector<5x1xf32>
    %131 = vector.broadcast %130 : vector<5x1xf32> to vector<5x6xf32>
    %132 = arith.subf %126, %131 : vector<5x6xf32>
    %133 = math.exp %132 : vector<5x6xf32>
    %cst_97 = arith.constant dense<0.000000e+00> : vector<5xf32>
    %134 = vector.multi_reduction <add>, %133, %cst_97 [1] : vector<5x6xf32> to vector<5xf32>
    %135 = vector.shape_cast %134 : vector<5xf32> to vector<5x1xf32>
    %cst_98 = arith.constant 0.000000e+00 : f32
    %136 = vector.broadcast %cst_98 : f32 to vector<5x1xf32>
    %137 = arith.subf %136, %130 : vector<5x1xf32>
    %138 = math.exp %137 : vector<5x1xf32>
    %139 = arith.addf %135, %138 : vector<5x1xf32>
    %cst_99 = arith.constant dense<0.000000e+00> : vector<5x8xf32>
    %140 = tpu.matmul %133, %121, %cst_99 {dimension_numbers = #tpu.dot_dimension_numbers<[1], [0], [0], [1], [0, 0, 1, 1], [], []>} : vector<5x6xf32>, vector<6x8xf32>, vector<5x8xf32> -> vector<5x8xf32>
    %141 = vector.broadcast %139 : vector<5x1xf32> to vector<5x8xf32>
    %142 = arith.divf %140, %141 : vector<5x8xf32>
    %c2_100 = arith.constant 2 : index
    %c0_101 = arith.constant 0 : index
    %c0_102 = arith.constant 0 : index
    %143 = vector.load %arg12[%c2_100, %c0_101, %c0_102] : memref<4x8x32xf32, #tpu.memory_space<vmem>>, vector<1x8x32xf32>
    %144 = vector.shape_cast %143 : vector<1x8x32xf32> to vector<8x32xf32>
    %cst_103 = arith.constant dense<0.000000e+00> : vector<5x32xf32>
    %145 = tpu.matmul %142, %144, %cst_103 {dimension_numbers = #tpu.dot_dimension_numbers<[1], [0], [0], [1], [0, 0, 1, 1], [], []>} : vector<5x8xf32>, vector<8x32xf32>, vector<5x32xf32> -> vector<5x32xf32>
    %146 = arith.addf %100, %145 : vector<5x32xf32>
    %c3 = arith.constant 3 : index
    %c0_104 = arith.constant 0 : index
    %c0_105 = arith.constant 0 : index
    %147 = vector.load %arg6[%c3, %c0_104, %c0_105] : memref<4x32x8xf32, #tpu.memory_space<vmem>>, vector<1x32x8xf32>
    %148 = vector.shape_cast %147 : vector<1x32x8xf32> to vector<32x8xf32>
    %cst_106 = arith.constant dense<0.000000e+00> : vector<5x8xf32>
    %149 = tpu.matmul %3, %148, %cst_106 {dimension_numbers = #tpu.dot_dimension_numbers<[1], [0], [0], [1], [0, 0, 1, 1], [], []>} : vector<5x32xf32>, vector<32x8xf32>, vector<5x8xf32> -> vector<5x8xf32>
    %c3_107 = arith.constant 3 : index
    %c0_108 = arith.constant 0 : index
    %c0_109 = arith.constant 0 : index
    %150 = vector.load %arg7[%c3_107, %c0_108, %c0_109] : memref<4x1x8xf32, #tpu.memory_space<vmem>>, vector<1x1x8xf32>
    %151 = vector.shape_cast %150 : vector<1x1x8xf32> to vector<1x8xf32>
    %152 = vector.broadcast %151 : vector<1x8xf32> to vector<5x8xf32>
    %153 = arith.addf %149, %152 : vector<5x8xf32>
    %c3_110 = arith.constant 3 : index
    %c0_111 = arith.constant 0 : index
    %c0_112 = arith.constant 0 : index
    %154 = vector.load %arg8[%c3_110, %c0_111, %c0_112] : memref<4x32x8xf32, #tpu.memory_space<vmem>>, vector<1x32x8xf32>
    %155 = vector.shape_cast %154 : vector<1x32x8xf32> to vector<32x8xf32>
    %cst_113 = arith.constant dense<0.000000e+00> : vector<6x8xf32>
    %156 = tpu.matmul %5, %155, %cst_113 {dimension_numbers = #tpu.dot_dimension_numbers<[1], [0], [0], [1], [0, 0, 1, 1], [], []>} : vector<6x32xf32>, vector<32x8xf32>, vector<6x8xf32> -> vector<6x8xf32>
    %c3_114 = arith.constant 3 : index
    %c0_115 = arith.constant 0 : index
    %c0_116 = arith.constant 0 : index
    %157 = vector.load %arg9[%c3_114, %c0_115, %c0_116] : memref<4x1x8xf32, #tpu.memory_space<vmem>>, vector<1x1x8xf32>
    %158 = vector.shape_cast %157 : vector<1x1x8xf32> to vector<1x8xf32>
    %159 = vector.broadcast %158 : vector<1x8xf32> to vector<6x8xf32>
    %160 = arith.addf %156, %159 : vector<6x8xf32>
    %c3_117 = arith.constant 3 : index
    %c0_118 = arith.constant 0 : index
    %c0_119 = arith.constant 0 : index
    %161 = vector.load %arg10[%c3_117, %c0_118, %c0_119] : memref<4x32x8xf32, #tpu.memory_space<vmem>>, vector<1x32x8xf32>
    %162 = vector.shape_cast %161 : vector<1x32x8xf32> to vector<32x8xf32>
    %cst_120 = arith.constant dense<0.000000e+00> : vector<6x8xf32>
    %163 = tpu.matmul %5, %162, %cst_120 {dimension_numbers = #tpu.dot_dimension_numbers<[1], [0], [0], [1], [0, 0, 1, 1], [], []>} : vector<6x32xf32>, vector<32x8xf32>, vector<6x8xf32> -> vector<6x8xf32>
    %c3_121 = arith.constant 3 : index
    %c0_122 = arith.constant 0 : index
    %c0_123 = arith.constant 0 : index
    %164 = vector.load %arg11[%c3_121, %c0_122, %c0_123] : memref<4x1x8xf32, #tpu.memory_space<vmem>>, vector<1x1x8xf32>
    %165 = vector.shape_cast %164 : vector<1x1x8xf32> to vector<1x8xf32>
    %166 = vector.broadcast %165 : vector<1x8xf32> to vector<6x8xf32>
    %167 = arith.addf %163, %166 : vector<6x8xf32>
    %cst_124 = arith.constant dense<0.000000e+00> : vector<5x6xf32>
    %168 = tpu.matmul %153, %160, %cst_124 {dimension_numbers = #tpu.dot_dimension_numbers<[1], [1], [0], [0], [0, 0, 1, 0], [], []>} : vector<5x8xf32>, vector<6x8xf32>, vector<5x6xf32> -> vector<5x6xf32>
    %cst_125 = arith.constant 0.353553385 : f32
    %169 = vector.broadcast %cst_125 : f32 to vector<5x6xf32>
    %170 = arith.mulf %168, %169 : vector<5x6xf32>
    %171 = vector.broadcast %7 : vector<1x6xf32> to vector<5x6xf32>
    %172 = arith.addf %170, %171 : vector<5x6xf32>
    %cst_126 = arith.constant dense<0xFF800000> : vector<5xf32>
    %173 = vector.multi_reduction <maximumf>, %172, %cst_126 [1] : vector<5x6xf32> to vector<5xf32>
    %174 = vector.shape_cast %173 : vector<5xf32> to vector<5x1xf32>
    %cst_127 = arith.constant 0.000000e+00 : f32
    %175 = vector.broadcast %cst_127 : f32 to vector<5x1xf32>
    %176 = arith.maximumf %174, %175 : vector<5x1xf32>
    %177 = vector.broadcast %176 : vector<5x1xf32> to vector<5x6xf32>
    %178 = arith.subf %172, %177 : vector<5x6xf32>
    %179 = math.exp %178 : vector<5x6xf32>
    %cst_128 = arith.constant dense<0.000000e+00> : vector<5xf32>
    %180 = vector.multi_reduction <add>, %179, %cst_128 [1] : vector<5x6xf32> to vector<5xf32>
    %181 = vector.shape_cast %180 : vector<5xf32> to vector<5x1xf32>
    %cst_129 = arith.constant 0.000000e+00 : f32
    %182 = vector.broadcast %cst_129 : f32 to vector<5x1xf32>
    %183 = arith.subf %182, %176 : vector<5x1xf32>
    %184 = math.exp %183 : vector<5x1xf32>
    %185 = arith.addf %181, %184 : vector<5x1xf32>
    %cst_130 = arith.constant dense<0.000000e+00> : vector<5x8xf32>
    %186 = tpu.matmul %179, %167, %cst_130 {dimension_numbers = #tpu.dot_dimension_numbers<[1], [0], [0], [1], [0, 0, 1, 1], [], []>} : vector<5x6xf32>, vector<6x8xf32>, vector<5x8xf32> -> vector<5x8xf32>
    %187 = vector.broadcast %185 : vector<5x1xf32> to vector<5x8xf32>
    %188 = arith.divf %186, %187 : vector<5x8xf32>
    %c3_131 = arith.constant 3 : index
    %c0_132 = arith.constant 0 : index
    %c0_133 = arith.constant 0 : index
    %189 = vector.load %arg12[%c3_131, %c0_132, %c0_133] : memref<4x8x32xf32, #tpu.memory_space<vmem>>, vector<1x8x32xf32>
    %190 = vector.shape_cast %189 : vector<1x8x32xf32> to vector<8x32xf32>
    %cst_134 = arith.constant dense<0.000000e+00> : vector<5x32xf32>
    %191 = tpu.matmul %188, %190, %cst_134 {dimension_numbers = #tpu.dot_dimension_numbers<[1], [0], [0], [1], [0, 0, 1, 1], [], []>} : vector<5x8xf32>, vector<8x32xf32>, vector<5x32xf32> -> vector<5x32xf32>
    %192 = arith.addf %146, %191 : vector<5x32xf32>
    %c0_135 = arith.constant 0 : index
    %c0_136 = arith.constant 0 : index
    %193 = vector.load %arg13[%c0_135, %c0_136] : memref<1x32xf32, #tpu.memory_space<vmem>>, vector<1x32xf32>
    %194 = vector.broadcast %193 : vector<1x32xf32> to vector<5x32xf32>
    %195 = arith.addf %192, %194 : vector<5x32xf32>
    %c0_137 = arith.constant 0 : index
    %c0_138 = arith.constant 0 : index
    %196 = vector.load %arg14[%c0_137, %c0_138] : memref<1x32xf32, #tpu.memory_space<vmem>>, vector<1x32xf32>
    %197 = vector.broadcast %196 : vector<1x32xf32> to vector<5x32xf32>
    %198 = arith.mulf %195, %197 : vector<5x32xf32>
    %cst_139 = arith.constant dense<0.000000e+00> : vector<5xf32>
    %199 = vector.multi_reduction <add>, %198, %cst_139 [1] : vector<5x32xf32> to vector<5xf32>
    %200 = vector.shape_cast %199 : vector<5xf32> to vector<5x1xf32>
    %c0_140 = arith.constant 0 : index
    %c0_141 = arith.constant 0 : index
    %201 = vector.load %arg15[%c0_140, %c0_141] : memref<1x1xf32, #tpu.memory_space<vmem>>, vector<1x1xf32>
    %202 = vector.broadcast %201 : vector<1x1xf32> to vector<5x1xf32>
    %203 = arith.addf %200, %202 : vector<5x1xf32>
    %cst_142 = arith.constant 0.000000e+00 : f32
    %204 = vector.broadcast %cst_142 : f32 to vector<5x1xf32>
    %205 = arith.subf %204, %203 : vector<5x1xf32>
    %206 = math.exp %205 : vector<5x1xf32>
    %cst_143 = arith.constant 1.000000e+00 : f32
    %207 = vector.broadcast %cst_143 : f32 to vector<5x1xf32>
    %208 = arith.addf %207, %206 : vector<5x1xf32>
    %cst_144 = arith.constant 1.000000e+00 : f32
    %209 = vector.broadcast %cst_144 : f32 to vector<5x1xf32>
    %210 = arith.divf %209, %208 : vector<5x1xf32>
    %211 = vector.broadcast %210 : vector<5x1xf32> to vector<5x32xf32>
    %212 = arith.mulf %3, %211 : vector<5x32xf32>
    %c0_145 = arith.constant 0 : index
    %c0_146 = arith.constant 0 : index
    %c0_147 = arith.constant 0 : index
    %213 = vector.load %arg3[%c0_145, %c0_146, %c0_147] : memref<2x5x1xf32, #tpu.memory_space<vmem>>, vector<1x5x1xf32>
    %214 = vector.shape_cast %213 : vector<1x5x1xf32> to vector<5x1xf32>
    %215 = vector.broadcast %214 : vector<5x1xf32> to vector<5x32xf32>
    %216 = arith.mulf %212, %215 : vector<5x32xf32>
    %cst_148 = arith.constant dense<0.000000e+00> : vector<32xf32>
    %217 = vector.multi_reduction <add>, %216, %cst_148 [0] : vector<5x32xf32> to vector<32xf32>
    %218 = vector.shape_cast %217 : vector<32xf32> to vector<1x32xf32>
    %219 = arith.addf %0, %218 : vector<1x32xf32>
    %c0_149 = arith.constant 0 : index
    %c0_150 = arith.constant 0 : index
    %c0_151 = arith.constant 0 : index
    %220 = vector.load %arg4[%c0_149, %c0_150, %c0_151] : memref<2x6x1xf32, #tpu.memory_space<vmem>>, vector<1x6x1xf32>
    %221 = vector.shape_cast %220 : vector<1x6x1xf32> to vector<6x1xf32>
    %222 = vector.broadcast %221 : vector<6x1xf32> to vector<6x32xf32>
    %223 = arith.mulf %5, %222 : vector<6x32xf32>
    %cst_152 = arith.constant dense<0.000000e+00> : vector<32xf32>
    %224 = vector.multi_reduction <add>, %223, %cst_152 [0] : vector<6x32xf32> to vector<32xf32>
    %225 = vector.shape_cast %224 : vector<32xf32> to vector<1x32xf32>
    %226 = arith.addf %1, %225 : vector<1x32xf32>
    %c1_153 = arith.constant 1 : index
    %c0_154 = arith.constant 0 : index
    %c0_155 = arith.constant 0 : index
    %227 = vector.load %arg1[%c1_153, %c0_154, %c0_155] : memref<2x5x32xf32, #tpu.memory_space<vmem>>, vector<1x5x32xf32>
    %228 = vector.shape_cast %227 : vector<1x5x32xf32> to vector<5x32xf32>
    %c1_156 = arith.constant 1 : index
    %c0_157 = arith.constant 0 : index
    %c0_158 = arith.constant 0 : index
    %229 = vector.load %arg2[%c1_156, %c0_157, %c0_158] : memref<2x6x32xf32, #tpu.memory_space<vmem>>, vector<1x6x32xf32>
    %230 = vector.shape_cast %229 : vector<1x6x32xf32> to vector<6x32xf32>
    %c1_159 = arith.constant 1 : index
    %c0_160 = arith.constant 0 : index
    %c0_161 = arith.constant 0 : index
    %231 = vector.load %arg5[%c1_159, %c0_160, %c0_161] : memref<2x1x6xf32, #tpu.memory_space<vmem>>, vector<1x1x6xf32>
    %232 = vector.shape_cast %231 : vector<1x1x6xf32> to vector<1x6xf32>
    %cst_162 = arith.constant 0.000000e+00 : f32
    %233 = vector.broadcast %cst_162 : f32 to vector<5x32xf32>
    %c0_163 = arith.constant 0 : index
    %c0_164 = arith.constant 0 : index
    %c0_165 = arith.constant 0 : index
    %234 = vector.load %arg6[%c0_163, %c0_164, %c0_165] : memref<4x32x8xf32, #tpu.memory_space<vmem>>, vector<1x32x8xf32>
    %235 = vector.shape_cast %234 : vector<1x32x8xf32> to vector<32x8xf32>
    %cst_166 = arith.constant dense<0.000000e+00> : vector<5x8xf32>
    %236 = tpu.matmul %228, %235, %cst_166 {dimension_numbers = #tpu.dot_dimension_numbers<[1], [0], [0], [1], [0, 0, 1, 1], [], []>} : vector<5x32xf32>, vector<32x8xf32>, vector<5x8xf32> -> vector<5x8xf32>
    %c0_167 = arith.constant 0 : index
    %c0_168 = arith.constant 0 : index
    %c0_169 = arith.constant 0 : index
    %237 = vector.load %arg7[%c0_167, %c0_168, %c0_169] : memref<4x1x8xf32, #tpu.memory_space<vmem>>, vector<1x1x8xf32>
    %238 = vector.shape_cast %237 : vector<1x1x8xf32> to vector<1x8xf32>
    %239 = vector.broadcast %238 : vector<1x8xf32> to vector<5x8xf32>
    %240 = arith.addf %236, %239 : vector<5x8xf32>
    %c0_170 = arith.constant 0 : index
    %c0_171 = arith.constant 0 : index
    %c0_172 = arith.constant 0 : index
    %241 = vector.load %arg8[%c0_170, %c0_171, %c0_172] : memref<4x32x8xf32, #tpu.memory_space<vmem>>, vector<1x32x8xf32>
    %242 = vector.shape_cast %241 : vector<1x32x8xf32> to vector<32x8xf32>
    %cst_173 = arith.constant dense<0.000000e+00> : vector<6x8xf32>
    %243 = tpu.matmul %230, %242, %cst_173 {dimension_numbers = #tpu.dot_dimension_numbers<[1], [0], [0], [1], [0, 0, 1, 1], [], []>} : vector<6x32xf32>, vector<32x8xf32>, vector<6x8xf32> -> vector<6x8xf32>
    %c0_174 = arith.constant 0 : index
    %c0_175 = arith.constant 0 : index
    %c0_176 = arith.constant 0 : index
    %244 = vector.load %arg9[%c0_174, %c0_175, %c0_176] : memref<4x1x8xf32, #tpu.memory_space<vmem>>, vector<1x1x8xf32>
    %245 = vector.shape_cast %244 : vector<1x1x8xf32> to vector<1x8xf32>
    %246 = vector.broadcast %245 : vector<1x8xf32> to vector<6x8xf32>
    %247 = arith.addf %243, %246 : vector<6x8xf32>
    %c0_177 = arith.constant 0 : index
    %c0_178 = arith.constant 0 : index
    %c0_179 = arith.constant 0 : index
    %248 = vector.load %arg10[%c0_177, %c0_178, %c0_179] : memref<4x32x8xf32, #tpu.memory_space<vmem>>, vector<1x32x8xf32>
    %249 = vector.shape_cast %248 : vector<1x32x8xf32> to vector<32x8xf32>
    %cst_180 = arith.constant dense<0.000000e+00> : vector<6x8xf32>
    %250 = tpu.matmul %230, %249, %cst_180 {dimension_numbers = #tpu.dot_dimension_numbers<[1], [0], [0], [1], [0, 0, 1, 1], [], []>} : vector<6x32xf32>, vector<32x8xf32>, vector<6x8xf32> -> vector<6x8xf32>
    %c0_181 = arith.constant 0 : index
    %c0_182 = arith.constant 0 : index
    %c0_183 = arith.constant 0 : index
    %251 = vector.load %arg11[%c0_181, %c0_182, %c0_183] : memref<4x1x8xf32, #tpu.memory_space<vmem>>, vector<1x1x8xf32>
    %252 = vector.shape_cast %251 : vector<1x1x8xf32> to vector<1x8xf32>
    %253 = vector.broadcast %252 : vector<1x8xf32> to vector<6x8xf32>
    %254 = arith.addf %250, %253 : vector<6x8xf32>
    %cst_184 = arith.constant dense<0.000000e+00> : vector<5x6xf32>
    %255 = tpu.matmul %240, %247, %cst_184 {dimension_numbers = #tpu.dot_dimension_numbers<[1], [1], [0], [0], [0, 0, 1, 0], [], []>} : vector<5x8xf32>, vector<6x8xf32>, vector<5x6xf32> -> vector<5x6xf32>
    %cst_185 = arith.constant 0.353553385 : f32
    %256 = vector.broadcast %cst_185 : f32 to vector<5x6xf32>
    %257 = arith.mulf %255, %256 : vector<5x6xf32>
    %258 = vector.broadcast %232 : vector<1x6xf32> to vector<5x6xf32>
    %259 = arith.addf %257, %258 : vector<5x6xf32>
    %cst_186 = arith.constant dense<0xFF800000> : vector<5xf32>
    %260 = vector.multi_reduction <maximumf>, %259, %cst_186 [1] : vector<5x6xf32> to vector<5xf32>
    %261 = vector.shape_cast %260 : vector<5xf32> to vector<5x1xf32>
    %cst_187 = arith.constant 0.000000e+00 : f32
    %262 = vector.broadcast %cst_187 : f32 to vector<5x1xf32>
    %263 = arith.maximumf %261, %262 : vector<5x1xf32>
    %264 = vector.broadcast %263 : vector<5x1xf32> to vector<5x6xf32>
    %265 = arith.subf %259, %264 : vector<5x6xf32>
    %266 = math.exp %265 : vector<5x6xf32>
    %cst_188 = arith.constant dense<0.000000e+00> : vector<5xf32>
    %267 = vector.multi_reduction <add>, %266, %cst_188 [1] : vector<5x6xf32> to vector<5xf32>
    %268 = vector.shape_cast %267 : vector<5xf32> to vector<5x1xf32>
    %cst_189 = arith.constant 0.000000e+00 : f32
    %269 = vector.broadcast %cst_189 : f32 to vector<5x1xf32>
    %270 = arith.subf %269, %263 : vector<5x1xf32>
    %271 = math.exp %270 : vector<5x1xf32>
    %272 = arith.addf %268, %271 : vector<5x1xf32>
    %cst_190 = arith.constant dense<0.000000e+00> : vector<5x8xf32>
    %273 = tpu.matmul %266, %254, %cst_190 {dimension_numbers = #tpu.dot_dimension_numbers<[1], [0], [0], [1], [0, 0, 1, 1], [], []>} : vector<5x6xf32>, vector<6x8xf32>, vector<5x8xf32> -> vector<5x8xf32>
    %274 = vector.broadcast %272 : vector<5x1xf32> to vector<5x8xf32>
    %275 = arith.divf %273, %274 : vector<5x8xf32>
    %c0_191 = arith.constant 0 : index
    %c0_192 = arith.constant 0 : index
    %c0_193 = arith.constant 0 : index
    %276 = vector.load %arg12[%c0_191, %c0_192, %c0_193] : memref<4x8x32xf32, #tpu.memory_space<vmem>>, vector<1x8x32xf32>
    %277 = vector.shape_cast %276 : vector<1x8x32xf32> to vector<8x32xf32>
    %cst_194 = arith.constant dense<0.000000e+00> : vector<5x32xf32>
    %278 = tpu.matmul %275, %277, %cst_194 {dimension_numbers = #tpu.dot_dimension_numbers<[1], [0], [0], [1], [0, 0, 1, 1], [], []>} : vector<5x8xf32>, vector<8x32xf32>, vector<5x32xf32> -> vector<5x32xf32>
    %279 = arith.addf %233, %278 : vector<5x32xf32>
    %c1_195 = arith.constant 1 : index
    %c0_196 = arith.constant 0 : index
    %c0_197 = arith.constant 0 : index
    %280 = vector.load %arg6[%c1_195, %c0_196, %c0_197] : memref<4x32x8xf32, #tpu.memory_space<vmem>>, vector<1x32x8xf32>
    %281 = vector.shape_cast %280 : vector<1x32x8xf32> to vector<32x8xf32>
    %cst_198 = arith.constant dense<0.000000e+00> : vector<5x8xf32>
    %282 = tpu.matmul %228, %281, %cst_198 {dimension_numbers = #tpu.dot_dimension_numbers<[1], [0], [0], [1], [0, 0, 1, 1], [], []>} : vector<5x32xf32>, vector<32x8xf32>, vector<5x8xf32> -> vector<5x8xf32>
    %c1_199 = arith.constant 1 : index
    %c0_200 = arith.constant 0 : index
    %c0_201 = arith.constant 0 : index
    %283 = vector.load %arg7[%c1_199, %c0_200, %c0_201] : memref<4x1x8xf32, #tpu.memory_space<vmem>>, vector<1x1x8xf32>
    %284 = vector.shape_cast %283 : vector<1x1x8xf32> to vector<1x8xf32>
    %285 = vector.broadcast %284 : vector<1x8xf32> to vector<5x8xf32>
    %286 = arith.addf %282, %285 : vector<5x8xf32>
    %c1_202 = arith.constant 1 : index
    %c0_203 = arith.constant 0 : index
    %c0_204 = arith.constant 0 : index
    %287 = vector.load %arg8[%c1_202, %c0_203, %c0_204] : memref<4x32x8xf32, #tpu.memory_space<vmem>>, vector<1x32x8xf32>
    %288 = vector.shape_cast %287 : vector<1x32x8xf32> to vector<32x8xf32>
    %cst_205 = arith.constant dense<0.000000e+00> : vector<6x8xf32>
    %289 = tpu.matmul %230, %288, %cst_205 {dimension_numbers = #tpu.dot_dimension_numbers<[1], [0], [0], [1], [0, 0, 1, 1], [], []>} : vector<6x32xf32>, vector<32x8xf32>, vector<6x8xf32> -> vector<6x8xf32>
    %c1_206 = arith.constant 1 : index
    %c0_207 = arith.constant 0 : index
    %c0_208 = arith.constant 0 : index
    %290 = vector.load %arg9[%c1_206, %c0_207, %c0_208] : memref<4x1x8xf32, #tpu.memory_space<vmem>>, vector<1x1x8xf32>
    %291 = vector.shape_cast %290 : vector<1x1x8xf32> to vector<1x8xf32>
    %292 = vector.broadcast %291 : vector<1x8xf32> to vector<6x8xf32>
    %293 = arith.addf %289, %292 : vector<6x8xf32>
    %c1_209 = arith.constant 1 : index
    %c0_210 = arith.constant 0 : index
    %c0_211 = arith.constant 0 : index
    %294 = vector.load %arg10[%c1_209, %c0_210, %c0_211] : memref<4x32x8xf32, #tpu.memory_space<vmem>>, vector<1x32x8xf32>
    %295 = vector.shape_cast %294 : vector<1x32x8xf32> to vector<32x8xf32>
    %cst_212 = arith.constant dense<0.000000e+00> : vector<6x8xf32>
    %296 = tpu.matmul %230, %295, %cst_212 {dimension_numbers = #tpu.dot_dimension_numbers<[1], [0], [0], [1], [0, 0, 1, 1], [], []>} : vector<6x32xf32>, vector<32x8xf32>, vector<6x8xf32> -> vector<6x8xf32>
    %c1_213 = arith.constant 1 : index
    %c0_214 = arith.constant 0 : index
    %c0_215 = arith.constant 0 : index
    %297 = vector.load %arg11[%c1_213, %c0_214, %c0_215] : memref<4x1x8xf32, #tpu.memory_space<vmem>>, vector<1x1x8xf32>
    %298 = vector.shape_cast %297 : vector<1x1x8xf32> to vector<1x8xf32>
    %299 = vector.broadcast %298 : vector<1x8xf32> to vector<6x8xf32>
    %300 = arith.addf %296, %299 : vector<6x8xf32>
    %cst_216 = arith.constant dense<0.000000e+00> : vector<5x6xf32>
    %301 = tpu.matmul %286, %293, %cst_216 {dimension_numbers = #tpu.dot_dimension_numbers<[1], [1], [0], [0], [0, 0, 1, 0], [], []>} : vector<5x8xf32>, vector<6x8xf32>, vector<5x6xf32> -> vector<5x6xf32>
    %cst_217 = arith.constant 0.353553385 : f32
    %302 = vector.broadcast %cst_217 : f32 to vector<5x6xf32>
    %303 = arith.mulf %301, %302 : vector<5x6xf32>
    %304 = vector.broadcast %232 : vector<1x6xf32> to vector<5x6xf32>
    %305 = arith.addf %303, %304 : vector<5x6xf32>
    %cst_218 = arith.constant dense<0xFF800000> : vector<5xf32>
    %306 = vector.multi_reduction <maximumf>, %305, %cst_218 [1] : vector<5x6xf32> to vector<5xf32>
    %307 = vector.shape_cast %306 : vector<5xf32> to vector<5x1xf32>
    %cst_219 = arith.constant 0.000000e+00 : f32
    %308 = vector.broadcast %cst_219 : f32 to vector<5x1xf32>
    %309 = arith.maximumf %307, %308 : vector<5x1xf32>
    %310 = vector.broadcast %309 : vector<5x1xf32> to vector<5x6xf32>
    %311 = arith.subf %305, %310 : vector<5x6xf32>
    %312 = math.exp %311 : vector<5x6xf32>
    %cst_220 = arith.constant dense<0.000000e+00> : vector<5xf32>
    %313 = vector.multi_reduction <add>, %312, %cst_220 [1] : vector<5x6xf32> to vector<5xf32>
    %314 = vector.shape_cast %313 : vector<5xf32> to vector<5x1xf32>
    %cst_221 = arith.constant 0.000000e+00 : f32
    %315 = vector.broadcast %cst_221 : f32 to vector<5x1xf32>
    %316 = arith.subf %315, %309 : vector<5x1xf32>
    %317 = math.exp %316 : vector<5x1xf32>
    %318 = arith.addf %314, %317 : vector<5x1xf32>
    %cst_222 = arith.constant dense<0.000000e+00> : vector<5x8xf32>
    %319 = tpu.matmul %312, %300, %cst_222 {dimension_numbers = #tpu.dot_dimension_numbers<[1], [0], [0], [1], [0, 0, 1, 1], [], []>} : vector<5x6xf32>, vector<6x8xf32>, vector<5x8xf32> -> vector<5x8xf32>
    %320 = vector.broadcast %318 : vector<5x1xf32> to vector<5x8xf32>
    %321 = arith.divf %319, %320 : vector<5x8xf32>
    %c1_223 = arith.constant 1 : index
    %c0_224 = arith.constant 0 : index
    %c0_225 = arith.constant 0 : index
    %322 = vector.load %arg12[%c1_223, %c0_224, %c0_225] : memref<4x8x32xf32, #tpu.memory_space<vmem>>, vector<1x8x32xf32>
    %323 = vector.shape_cast %322 : vector<1x8x32xf32> to vector<8x32xf32>
    %cst_226 = arith.constant dense<0.000000e+00> : vector<5x32xf32>
    %324 = tpu.matmul %321, %323, %cst_226 {dimension_numbers = #tpu.dot_dimension_numbers<[1], [0], [0], [1], [0, 0, 1, 1], [], []>} : vector<5x8xf32>, vector<8x32xf32>, vector<5x32xf32> -> vector<5x32xf32>
    %325 = arith.addf %279, %324 : vector<5x32xf32>
    %c2_227 = arith.constant 2 : index
    %c0_228 = arith.constant 0 : index
    %c0_229 = arith.constant 0 : index
    %326 = vector.load %arg6[%c2_227, %c0_228, %c0_229] : memref<4x32x8xf32, #tpu.memory_space<vmem>>, vector<1x32x8xf32>
    %327 = vector.shape_cast %326 : vector<1x32x8xf32> to vector<32x8xf32>
    %cst_230 = arith.constant dense<0.000000e+00> : vector<5x8xf32>
    %328 = tpu.matmul %228, %327, %cst_230 {dimension_numbers = #tpu.dot_dimension_numbers<[1], [0], [0], [1], [0, 0, 1, 1], [], []>} : vector<5x32xf32>, vector<32x8xf32>, vector<5x8xf32> -> vector<5x8xf32>
    %c2_231 = arith.constant 2 : index
    %c0_232 = arith.constant 0 : index
    %c0_233 = arith.constant 0 : index
    %329 = vector.load %arg7[%c2_231, %c0_232, %c0_233] : memref<4x1x8xf32, #tpu.memory_space<vmem>>, vector<1x1x8xf32>
    %330 = vector.shape_cast %329 : vector<1x1x8xf32> to vector<1x8xf32>
    %331 = vector.broadcast %330 : vector<1x8xf32> to vector<5x8xf32>
    %332 = arith.addf %328, %331 : vector<5x8xf32>
    %c2_234 = arith.constant 2 : index
    %c0_235 = arith.constant 0 : index
    %c0_236 = arith.constant 0 : index
    %333 = vector.load %arg8[%c2_234, %c0_235, %c0_236] : memref<4x32x8xf32, #tpu.memory_space<vmem>>, vector<1x32x8xf32>
    %334 = vector.shape_cast %333 : vector<1x32x8xf32> to vector<32x8xf32>
    %cst_237 = arith.constant dense<0.000000e+00> : vector<6x8xf32>
    %335 = tpu.matmul %230, %334, %cst_237 {dimension_numbers = #tpu.dot_dimension_numbers<[1], [0], [0], [1], [0, 0, 1, 1], [], []>} : vector<6x32xf32>, vector<32x8xf32>, vector<6x8xf32> -> vector<6x8xf32>
    %c2_238 = arith.constant 2 : index
    %c0_239 = arith.constant 0 : index
    %c0_240 = arith.constant 0 : index
    %336 = vector.load %arg9[%c2_238, %c0_239, %c0_240] : memref<4x1x8xf32, #tpu.memory_space<vmem>>, vector<1x1x8xf32>
    %337 = vector.shape_cast %336 : vector<1x1x8xf32> to vector<1x8xf32>
    %338 = vector.broadcast %337 : vector<1x8xf32> to vector<6x8xf32>
    %339 = arith.addf %335, %338 : vector<6x8xf32>
    %c2_241 = arith.constant 2 : index
    %c0_242 = arith.constant 0 : index
    %c0_243 = arith.constant 0 : index
    %340 = vector.load %arg10[%c2_241, %c0_242, %c0_243] : memref<4x32x8xf32, #tpu.memory_space<vmem>>, vector<1x32x8xf32>
    %341 = vector.shape_cast %340 : vector<1x32x8xf32> to vector<32x8xf32>
    %cst_244 = arith.constant dense<0.000000e+00> : vector<6x8xf32>
    %342 = tpu.matmul %230, %341, %cst_244 {dimension_numbers = #tpu.dot_dimension_numbers<[1], [0], [0], [1], [0, 0, 1, 1], [], []>} : vector<6x32xf32>, vector<32x8xf32>, vector<6x8xf32> -> vector<6x8xf32>
    %c2_245 = arith.constant 2 : index
    %c0_246 = arith.constant 0 : index
    %c0_247 = arith.constant 0 : index
    %343 = vector.load %arg11[%c2_245, %c0_246, %c0_247] : memref<4x1x8xf32, #tpu.memory_space<vmem>>, vector<1x1x8xf32>
    %344 = vector.shape_cast %343 : vector<1x1x8xf32> to vector<1x8xf32>
    %345 = vector.broadcast %344 : vector<1x8xf32> to vector<6x8xf32>
    %346 = arith.addf %342, %345 : vector<6x8xf32>
    %cst_248 = arith.constant dense<0.000000e+00> : vector<5x6xf32>
    %347 = tpu.matmul %332, %339, %cst_248 {dimension_numbers = #tpu.dot_dimension_numbers<[1], [1], [0], [0], [0, 0, 1, 0], [], []>} : vector<5x8xf32>, vector<6x8xf32>, vector<5x6xf32> -> vector<5x6xf32>
    %cst_249 = arith.constant 0.353553385 : f32
    %348 = vector.broadcast %cst_249 : f32 to vector<5x6xf32>
    %349 = arith.mulf %347, %348 : vector<5x6xf32>
    %350 = vector.broadcast %232 : vector<1x6xf32> to vector<5x6xf32>
    %351 = arith.addf %349, %350 : vector<5x6xf32>
    %cst_250 = arith.constant dense<0xFF800000> : vector<5xf32>
    %352 = vector.multi_reduction <maximumf>, %351, %cst_250 [1] : vector<5x6xf32> to vector<5xf32>
    %353 = vector.shape_cast %352 : vector<5xf32> to vector<5x1xf32>
    %cst_251 = arith.constant 0.000000e+00 : f32
    %354 = vector.broadcast %cst_251 : f32 to vector<5x1xf32>
    %355 = arith.maximumf %353, %354 : vector<5x1xf32>
    %356 = vector.broadcast %355 : vector<5x1xf32> to vector<5x6xf32>
    %357 = arith.subf %351, %356 : vector<5x6xf32>
    %358 = math.exp %357 : vector<5x6xf32>
    %cst_252 = arith.constant dense<0.000000e+00> : vector<5xf32>
    %359 = vector.multi_reduction <add>, %358, %cst_252 [1] : vector<5x6xf32> to vector<5xf32>
    %360 = vector.shape_cast %359 : vector<5xf32> to vector<5x1xf32>
    %cst_253 = arith.constant 0.000000e+00 : f32
    %361 = vector.broadcast %cst_253 : f32 to vector<5x1xf32>
    %362 = arith.subf %361, %355 : vector<5x1xf32>
    %363 = math.exp %362 : vector<5x1xf32>
    %364 = arith.addf %360, %363 : vector<5x1xf32>
    %cst_254 = arith.constant dense<0.000000e+00> : vector<5x8xf32>
    %365 = tpu.matmul %358, %346, %cst_254 {dimension_numbers = #tpu.dot_dimension_numbers<[1], [0], [0], [1], [0, 0, 1, 1], [], []>} : vector<5x6xf32>, vector<6x8xf32>, vector<5x8xf32> -> vector<5x8xf32>
    %366 = vector.broadcast %364 : vector<5x1xf32> to vector<5x8xf32>
    %367 = arith.divf %365, %366 : vector<5x8xf32>
    %c2_255 = arith.constant 2 : index
    %c0_256 = arith.constant 0 : index
    %c0_257 = arith.constant 0 : index
    %368 = vector.load %arg12[%c2_255, %c0_256, %c0_257] : memref<4x8x32xf32, #tpu.memory_space<vmem>>, vector<1x8x32xf32>
    %369 = vector.shape_cast %368 : vector<1x8x32xf32> to vector<8x32xf32>
    %cst_258 = arith.constant dense<0.000000e+00> : vector<5x32xf32>
    %370 = tpu.matmul %367, %369, %cst_258 {dimension_numbers = #tpu.dot_dimension_numbers<[1], [0], [0], [1], [0, 0, 1, 1], [], []>} : vector<5x8xf32>, vector<8x32xf32>, vector<5x32xf32> -> vector<5x32xf32>
    %371 = arith.addf %325, %370 : vector<5x32xf32>
    %c3_259 = arith.constant 3 : index
    %c0_260 = arith.constant 0 : index
    %c0_261 = arith.constant 0 : index
    %372 = vector.load %arg6[%c3_259, %c0_260, %c0_261] : memref<4x32x8xf32, #tpu.memory_space<vmem>>, vector<1x32x8xf32>
    %373 = vector.shape_cast %372 : vector<1x32x8xf32> to vector<32x8xf32>
    %cst_262 = arith.constant dense<0.000000e+00> : vector<5x8xf32>
    %374 = tpu.matmul %228, %373, %cst_262 {dimension_numbers = #tpu.dot_dimension_numbers<[1], [0], [0], [1], [0, 0, 1, 1], [], []>} : vector<5x32xf32>, vector<32x8xf32>, vector<5x8xf32> -> vector<5x8xf32>
    %c3_263 = arith.constant 3 : index
    %c0_264 = arith.constant 0 : index
    %c0_265 = arith.constant 0 : index
    %375 = vector.load %arg7[%c3_263, %c0_264, %c0_265] : memref<4x1x8xf32, #tpu.memory_space<vmem>>, vector<1x1x8xf32>
    %376 = vector.shape_cast %375 : vector<1x1x8xf32> to vector<1x8xf32>
    %377 = vector.broadcast %376 : vector<1x8xf32> to vector<5x8xf32>
    %378 = arith.addf %374, %377 : vector<5x8xf32>
    %c3_266 = arith.constant 3 : index
    %c0_267 = arith.constant 0 : index
    %c0_268 = arith.constant 0 : index
    %379 = vector.load %arg8[%c3_266, %c0_267, %c0_268] : memref<4x32x8xf32, #tpu.memory_space<vmem>>, vector<1x32x8xf32>
    %380 = vector.shape_cast %379 : vector<1x32x8xf32> to vector<32x8xf32>
    %cst_269 = arith.constant dense<0.000000e+00> : vector<6x8xf32>
    %381 = tpu.matmul %230, %380, %cst_269 {dimension_numbers = #tpu.dot_dimension_numbers<[1], [0], [0], [1], [0, 0, 1, 1], [], []>} : vector<6x32xf32>, vector<32x8xf32>, vector<6x8xf32> -> vector<6x8xf32>
    %c3_270 = arith.constant 3 : index
    %c0_271 = arith.constant 0 : index
    %c0_272 = arith.constant 0 : index
    %382 = vector.load %arg9[%c3_270, %c0_271, %c0_272] : memref<4x1x8xf32, #tpu.memory_space<vmem>>, vector<1x1x8xf32>
    %383 = vector.shape_cast %382 : vector<1x1x8xf32> to vector<1x8xf32>
    %384 = vector.broadcast %383 : vector<1x8xf32> to vector<6x8xf32>
    %385 = arith.addf %381, %384 : vector<6x8xf32>
    %c3_273 = arith.constant 3 : index
    %c0_274 = arith.constant 0 : index
    %c0_275 = arith.constant 0 : index
    %386 = vector.load %arg10[%c3_273, %c0_274, %c0_275] : memref<4x32x8xf32, #tpu.memory_space<vmem>>, vector<1x32x8xf32>
    %387 = vector.shape_cast %386 : vector<1x32x8xf32> to vector<32x8xf32>
    %cst_276 = arith.constant dense<0.000000e+00> : vector<6x8xf32>
    %388 = tpu.matmul %230, %387, %cst_276 {dimension_numbers = #tpu.dot_dimension_numbers<[1], [0], [0], [1], [0, 0, 1, 1], [], []>} : vector<6x32xf32>, vector<32x8xf32>, vector<6x8xf32> -> vector<6x8xf32>
    %c3_277 = arith.constant 3 : index
    %c0_278 = arith.constant 0 : index
    %c0_279 = arith.constant 0 : index
    %389 = vector.load %arg11[%c3_277, %c0_278, %c0_279] : memref<4x1x8xf32, #tpu.memory_space<vmem>>, vector<1x1x8xf32>
    %390 = vector.shape_cast %389 : vector<1x1x8xf32> to vector<1x8xf32>
    %391 = vector.broadcast %390 : vector<1x8xf32> to vector<6x8xf32>
    %392 = arith.addf %388, %391 : vector<6x8xf32>
    %cst_280 = arith.constant dense<0.000000e+00> : vector<5x6xf32>
    %393 = tpu.matmul %378, %385, %cst_280 {dimension_numbers = #tpu.dot_dimension_numbers<[1], [1], [0], [0], [0, 0, 1, 0], [], []>} : vector<5x8xf32>, vector<6x8xf32>, vector<5x6xf32> -> vector<5x6xf32>
    %cst_281 = arith.constant 0.353553385 : f32
    %394 = vector.broadcast %cst_281 : f32 to vector<5x6xf32>
    %395 = arith.mulf %393, %394 : vector<5x6xf32>
    %396 = vector.broadcast %232 : vector<1x6xf32> to vector<5x6xf32>
    %397 = arith.addf %395, %396 : vector<5x6xf32>
    %cst_282 = arith.constant dense<0xFF800000> : vector<5xf32>
    %398 = vector.multi_reduction <maximumf>, %397, %cst_282 [1] : vector<5x6xf32> to vector<5xf32>
    %399 = vector.shape_cast %398 : vector<5xf32> to vector<5x1xf32>
    %cst_283 = arith.constant 0.000000e+00 : f32
    %400 = vector.broadcast %cst_283 : f32 to vector<5x1xf32>
    %401 = arith.maximumf %399, %400 : vector<5x1xf32>
    %402 = vector.broadcast %401 : vector<5x1xf32> to vector<5x6xf32>
    %403 = arith.subf %397, %402 : vector<5x6xf32>
    %404 = math.exp %403 : vector<5x6xf32>
    %cst_284 = arith.constant dense<0.000000e+00> : vector<5xf32>
    %405 = vector.multi_reduction <add>, %404, %cst_284 [1] : vector<5x6xf32> to vector<5xf32>
    %406 = vector.shape_cast %405 : vector<5xf32> to vector<5x1xf32>
    %cst_285 = arith.constant 0.000000e+00 : f32
    %407 = vector.broadcast %cst_285 : f32 to vector<5x1xf32>
    %408 = arith.subf %407, %401 : vector<5x1xf32>
    %409 = math.exp %408 : vector<5x1xf32>
    %410 = arith.addf %406, %409 : vector<5x1xf32>
    %cst_286 = arith.constant dense<0.000000e+00> : vector<5x8xf32>
    %411 = tpu.matmul %404, %392, %cst_286 {dimension_numbers = #tpu.dot_dimension_numbers<[1], [0], [0], [1], [0, 0, 1, 1], [], []>} : vector<5x6xf32>, vector<6x8xf32>, vector<5x8xf32> -> vector<5x8xf32>
    %412 = vector.broadcast %410 : vector<5x1xf32> to vector<5x8xf32>
    %413 = arith.divf %411, %412 : vector<5x8xf32>
    %c3_287 = arith.constant 3 : index
    %c0_288 = arith.constant 0 : index
    %c0_289 = arith.constant 0 : index
    %414 = vector.load %arg12[%c3_287, %c0_288, %c0_289] : memref<4x8x32xf32, #tpu.memory_space<vmem>>, vector<1x8x32xf32>
    %415 = vector.shape_cast %414 : vector<1x8x32xf32> to vector<8x32xf32>
    %cst_290 = arith.constant dense<0.000000e+00> : vector<5x32xf32>
    %416 = tpu.matmul %413, %415, %cst_290 {dimension_numbers = #tpu.dot_dimension_numbers<[1], [0], [0], [1], [0, 0, 1, 1], [], []>} : vector<5x8xf32>, vector<8x32xf32>, vector<5x32xf32> -> vector<5x32xf32>
    %417 = arith.addf %371, %416 : vector<5x32xf32>
    %c0_291 = arith.constant 0 : index
    %c0_292 = arith.constant 0 : index
    %418 = vector.load %arg13[%c0_291, %c0_292] : memref<1x32xf32, #tpu.memory_space<vmem>>, vector<1x32xf32>
    %419 = vector.broadcast %418 : vector<1x32xf32> to vector<5x32xf32>
    %420 = arith.addf %417, %419 : vector<5x32xf32>
    %c0_293 = arith.constant 0 : index
    %c0_294 = arith.constant 0 : index
    %421 = vector.load %arg14[%c0_293, %c0_294] : memref<1x32xf32, #tpu.memory_space<vmem>>, vector<1x32xf32>
    %422 = vector.broadcast %421 : vector<1x32xf32> to vector<5x32xf32>
    %423 = arith.mulf %420, %422 : vector<5x32xf32>
    %cst_295 = arith.constant dense<0.000000e+00> : vector<5xf32>
    %424 = vector.multi_reduction <add>, %423, %cst_295 [1] : vector<5x32xf32> to vector<5xf32>
    %425 = vector.shape_cast %424 : vector<5xf32> to vector<5x1xf32>
    %c0_296 = arith.constant 0 : index
    %c0_297 = arith.constant 0 : index
    %426 = vector.load %arg15[%c0_296, %c0_297] : memref<1x1xf32, #tpu.memory_space<vmem>>, vector<1x1xf32>
    %427 = vector.broadcast %426 : vector<1x1xf32> to vector<5x1xf32>
    %428 = arith.addf %425, %427 : vector<5x1xf32>
    %cst_298 = arith.constant 0.000000e+00 : f32
    %429 = vector.broadcast %cst_298 : f32 to vector<5x1xf32>
    %430 = arith.subf %429, %428 : vector<5x1xf32>
    %431 = math.exp %430 : vector<5x1xf32>
    %cst_299 = arith.constant 1.000000e+00 : f32
    %432 = vector.broadcast %cst_299 : f32 to vector<5x1xf32>
    %433 = arith.addf %432, %431 : vector<5x1xf32>
    %cst_300 = arith.constant 1.000000e+00 : f32
    %434 = vector.broadcast %cst_300 : f32 to vector<5x1xf32>
    %435 = arith.divf %434, %433 : vector<5x1xf32>
    %436 = vector.broadcast %435 : vector<5x1xf32> to vector<5x32xf32>
    %437 = arith.mulf %228, %436 : vector<5x32xf32>
    %c1_301 = arith.constant 1 : index
    %c0_302 = arith.constant 0 : index
    %c0_303 = arith.constant 0 : index
    %438 = vector.load %arg3[%c1_301, %c0_302, %c0_303] : memref<2x5x1xf32, #tpu.memory_space<vmem>>, vector<1x5x1xf32>
    %439 = vector.shape_cast %438 : vector<1x5x1xf32> to vector<5x1xf32>
    %440 = vector.broadcast %439 : vector<5x1xf32> to vector<5x32xf32>
    %441 = arith.mulf %437, %440 : vector<5x32xf32>
    %cst_304 = arith.constant dense<0.000000e+00> : vector<32xf32>
    %442 = vector.multi_reduction <add>, %441, %cst_304 [0] : vector<5x32xf32> to vector<32xf32>
    %443 = vector.shape_cast %442 : vector<32xf32> to vector<1x32xf32>
    %444 = arith.addf %219, %443 : vector<1x32xf32>
    %c1_305 = arith.constant 1 : index
    %c0_306 = arith.constant 0 : index
    %c0_307 = arith.constant 0 : index
    %445 = vector.load %arg4[%c1_305, %c0_306, %c0_307] : memref<2x6x1xf32, #tpu.memory_space<vmem>>, vector<1x6x1xf32>
    %446 = vector.shape_cast %445 : vector<1x6x1xf32> to vector<6x1xf32>
    %447 = vector.broadcast %446 : vector<6x1xf32> to vector<6x32xf32>
    %448 = arith.mulf %230, %447 : vector<6x32xf32>
    %cst_308 = arith.constant dense<0.000000e+00> : vector<32xf32>
    %449 = vector.multi_reduction <add>, %448, %cst_308 [0] : vector<6x32xf32> to vector<32xf32>
    %450 = vector.shape_cast %449 : vector<32xf32> to vector<1x32xf32>
    %451 = arith.addf %226, %450 : vector<1x32xf32>
    %cst_309 = arith.constant 8.000000e+00 : f32
    %452 = vector.broadcast %cst_309 : f32 to vector<1x32xf32>
    %453 = arith.divf %444, %452 : vector<1x32xf32>
    %cst_310 = arith.constant 1.000000e+01 : f32
    %454 = vector.broadcast %cst_310 : f32 to vector<1x32xf32>
    %455 = arith.divf %451, %454 : vector<1x32xf32>
    %cst_311 = arith.constant 0.000000e+00 : f32
    %456 = vector.broadcast %cst_311 : f32 to vector<1x32xf32>
    %cst_312 = arith.constant 0.000000e+00 : f32
    %457 = vector.broadcast %cst_312 : f32 to vector<1x32xf32>
    %458 = vector.broadcast %453 : vector<1x32xf32> to vector<5x32xf32>
    %459 = arith.subf %212, %458 : vector<5x32xf32>
    %460 = arith.mulf %459, %459 : vector<5x32xf32>
    %c0_313 = arith.constant 0 : index
    %c0_314 = arith.constant 0 : index
    %c0_315 = arith.constant 0 : index
    %461 = vector.load %arg3[%c0_313, %c0_314, %c0_315] : memref<2x5x1xf32, #tpu.memory_space<vmem>>, vector<1x5x1xf32>
    %462 = vector.shape_cast %461 : vector<1x5x1xf32> to vector<5x1xf32>
    %463 = vector.broadcast %462 : vector<5x1xf32> to vector<5x32xf32>
    %464 = arith.mulf %460, %463 : vector<5x32xf32>
    %cst_316 = arith.constant dense<0.000000e+00> : vector<32xf32>
    %465 = vector.multi_reduction <add>, %464, %cst_316 [0] : vector<5x32xf32> to vector<32xf32>
    %466 = vector.shape_cast %465 : vector<32xf32> to vector<1x32xf32>
    %467 = arith.addf %456, %466 : vector<1x32xf32>
    %c0_317 = arith.constant 0 : index
    %c0_318 = arith.constant 0 : index
    %c0_319 = arith.constant 0 : index
    %468 = vector.load %arg2[%c0_317, %c0_318, %c0_319] : memref<2x6x32xf32, #tpu.memory_space<vmem>>, vector<1x6x32xf32>
    %469 = vector.shape_cast %468 : vector<1x6x32xf32> to vector<6x32xf32>
    %470 = vector.broadcast %455 : vector<1x32xf32> to vector<6x32xf32>
    %471 = arith.subf %469, %470 : vector<6x32xf32>
    %472 = arith.mulf %471, %471 : vector<6x32xf32>
    %c0_320 = arith.constant 0 : index
    %c0_321 = arith.constant 0 : index
    %c0_322 = arith.constant 0 : index
    %473 = vector.load %arg4[%c0_320, %c0_321, %c0_322] : memref<2x6x1xf32, #tpu.memory_space<vmem>>, vector<1x6x1xf32>
    %474 = vector.shape_cast %473 : vector<1x6x1xf32> to vector<6x1xf32>
    %475 = vector.broadcast %474 : vector<6x1xf32> to vector<6x32xf32>
    %476 = arith.mulf %472, %475 : vector<6x32xf32>
    %cst_323 = arith.constant dense<0.000000e+00> : vector<32xf32>
    %477 = vector.multi_reduction <add>, %476, %cst_323 [0] : vector<6x32xf32> to vector<32xf32>
    %478 = vector.shape_cast %477 : vector<32xf32> to vector<1x32xf32>
    %479 = arith.addf %457, %478 : vector<1x32xf32>
    %480 = vector.broadcast %453 : vector<1x32xf32> to vector<5x32xf32>
    %481 = arith.subf %437, %480 : vector<5x32xf32>
    %482 = arith.mulf %481, %481 : vector<5x32xf32>
    %c1_324 = arith.constant 1 : index
    %c0_325 = arith.constant 0 : index
    %c0_326 = arith.constant 0 : index
    %483 = vector.load %arg3[%c1_324, %c0_325, %c0_326] : memref<2x5x1xf32, #tpu.memory_space<vmem>>, vector<1x5x1xf32>
    %484 = vector.shape_cast %483 : vector<1x5x1xf32> to vector<5x1xf32>
    %485 = vector.broadcast %484 : vector<5x1xf32> to vector<5x32xf32>
    %486 = arith.mulf %482, %485 : vector<5x32xf32>
    %cst_327 = arith.constant dense<0.000000e+00> : vector<32xf32>
    %487 = vector.multi_reduction <add>, %486, %cst_327 [0] : vector<5x32xf32> to vector<32xf32>
    %488 = vector.shape_cast %487 : vector<32xf32> to vector<1x32xf32>
    %489 = arith.addf %467, %488 : vector<1x32xf32>
    %c1_328 = arith.constant 1 : index
    %c0_329 = arith.constant 0 : index
    %c0_330 = arith.constant 0 : index
    %490 = vector.load %arg2[%c1_328, %c0_329, %c0_330] : memref<2x6x32xf32, #tpu.memory_space<vmem>>, vector<1x6x32xf32>
    %491 = vector.shape_cast %490 : vector<1x6x32xf32> to vector<6x32xf32>
    %492 = vector.broadcast %455 : vector<1x32xf32> to vector<6x32xf32>
    %493 = arith.subf %491, %492 : vector<6x32xf32>
    %494 = arith.mulf %493, %493 : vector<6x32xf32>
    %c1_331 = arith.constant 1 : index
    %c0_332 = arith.constant 0 : index
    %c0_333 = arith.constant 0 : index
    %495 = vector.load %arg4[%c1_331, %c0_332, %c0_333] : memref<2x6x1xf32, #tpu.memory_space<vmem>>, vector<1x6x1xf32>
    %496 = vector.shape_cast %495 : vector<1x6x1xf32> to vector<6x1xf32>
    %497 = vector.broadcast %496 : vector<6x1xf32> to vector<6x32xf32>
    %498 = arith.mulf %494, %497 : vector<6x32xf32>
    %cst_334 = arith.constant dense<0.000000e+00> : vector<32xf32>
    %499 = vector.multi_reduction <add>, %498, %cst_334 [0] : vector<6x32xf32> to vector<32xf32>
    %500 = vector.shape_cast %499 : vector<32xf32> to vector<1x32xf32>
    %501 = arith.addf %479, %500 : vector<1x32xf32>
    %cst_335 = arith.constant 8.000000e+00 : f32
    %502 = vector.broadcast %cst_335 : f32 to vector<1x32xf32>
    %503 = arith.divf %489, %502 : vector<1x32xf32>
    %cst_336 = arith.constant 9.99999974E-6 : f32
    %504 = vector.broadcast %cst_336 : f32 to vector<1x32xf32>
    %505 = arith.addf %503, %504 : vector<1x32xf32>
    %506 = math.rsqrt %505 : vector<1x32xf32>
    %cst_337 = arith.constant 1.000000e+01 : f32
    %507 = vector.broadcast %cst_337 : f32 to vector<1x32xf32>
    %508 = arith.divf %501, %507 : vector<1x32xf32>
    %cst_338 = arith.constant 9.99999974E-6 : f32
    %509 = vector.broadcast %cst_338 : f32 to vector<1x32xf32>
    %510 = arith.addf %508, %509 : vector<1x32xf32>
    %511 = math.rsqrt %510 : vector<1x32xf32>
    %c0_339 = arith.constant 0 : index
    %c0_340 = arith.constant 0 : index
    %512 = vector.load %arg16[%c0_339, %c0_340] : memref<1x32xf32, #tpu.memory_space<vmem>>, vector<1x32xf32>
    %513 = vector.broadcast %453 : vector<1x32xf32> to vector<5x32xf32>
    %514 = arith.subf %212, %513 : vector<5x32xf32>
    %515 = vector.broadcast %512 : vector<1x32xf32> to vector<5x32xf32>
    %516 = arith.mulf %515, %514 : vector<5x32xf32>
    %517 = vector.broadcast %506 : vector<1x32xf32> to vector<5x32xf32>
    %518 = arith.mulf %516, %517 : vector<5x32xf32>
    %c0_341 = arith.constant 0 : index
    %c0_342 = arith.constant 0 : index
    %519 = vector.load %arg17[%c0_341, %c0_342] : memref<1x32xf32, #tpu.memory_space<vmem>>, vector<1x32xf32>
    %520 = vector.broadcast %519 : vector<1x32xf32> to vector<5x32xf32>
    %521 = arith.addf %518, %520 : vector<5x32xf32>
    %c0_343 = arith.constant 0 : index
    %c0_344 = arith.constant 0 : index
    %c0_345 = arith.constant 0 : index
    %522 = vector.load %arg20[%c0_343, %c0_344, %c0_345] : memref<2x5x32xf32, #tpu.memory_space<vmem>>, vector<1x5x32xf32>
    %523 = vector.shape_cast %522 : vector<1x5x32xf32> to vector<5x32xf32>
    %524 = vector.shape_cast %521 : vector<5x32xf32> to vector<1x5x32xf32>
    tpu.vector_store %arg20[%c0_343, %c0_344, %c0_345], %524 {strides = array<i32>} : memref<2x5x32xf32, #tpu.memory_space<vmem>>, vector<1x5x32xf32>,
    %c0_346 = arith.constant 0 : index
    %c0_347 = arith.constant 0 : index
    %525 = vector.load %arg18[%c0_346, %c0_347] : memref<1x32xf32, #tpu.memory_space<vmem>>, vector<1x32xf32>
    %c0_348 = arith.constant 0 : index
    %c0_349 = arith.constant 0 : index
    %c0_350 = arith.constant 0 : index
    %526 = vector.load %arg2[%c0_348, %c0_349, %c0_350] : memref<2x6x32xf32, #tpu.memory_space<vmem>>, vector<1x6x32xf32>
    %527 = vector.shape_cast %526 : vector<1x6x32xf32> to vector<6x32xf32>
    %528 = vector.broadcast %455 : vector<1x32xf32> to vector<6x32xf32>
    %529 = arith.subf %527, %528 : vector<6x32xf32>
    %530 = vector.broadcast %525 : vector<1x32xf32> to vector<6x32xf32>
    %531 = arith.mulf %530, %529 : vector<6x32xf32>
    %532 = vector.broadcast %511 : vector<1x32xf32> to vector<6x32xf32>
    %533 = arith.mulf %531, %532 : vector<6x32xf32>
    %c0_351 = arith.constant 0 : index
    %c0_352 = arith.constant 0 : index
    %534 = vector.load %arg19[%c0_351, %c0_352] : memref<1x32xf32, #tpu.memory_space<vmem>>, vector<1x32xf32>
    %535 = vector.broadcast %534 : vector<1x32xf32> to vector<6x32xf32>
    %536 = arith.addf %533, %535 : vector<6x32xf32>
    %c0_353 = arith.constant 0 : index
    %c0_354 = arith.constant 0 : index
    %c0_355 = arith.constant 0 : index
    %537 = vector.load %arg21[%c0_353, %c0_354, %c0_355] : memref<2x6x32xf32, #tpu.memory_space<vmem>>, vector<1x6x32xf32>
    %538 = vector.shape_cast %537 : vector<1x6x32xf32> to vector<6x32xf32>
    %539 = vector.shape_cast %536 : vector<6x32xf32> to vector<1x6x32xf32>
    tpu.vector_store %arg21[%c0_353, %c0_354, %c0_355], %539 {strides = array<i32>} : memref<2x6x32xf32, #tpu.memory_space<vmem>>, vector<1x6x32xf32>,
    %c0_356 = arith.constant 0 : index
    %c0_357 = arith.constant 0 : index
    %540 = vector.load %arg16[%c0_356, %c0_357] : memref<1x32xf32, #tpu.memory_space<vmem>>, vector<1x32xf32>
    %541 = vector.broadcast %453 : vector<1x32xf32> to vector<5x32xf32>
    %542 = arith.subf %437, %541 : vector<5x32xf32>
    %543 = vector.broadcast %540 : vector<1x32xf32> to vector<5x32xf32>
    %544 = arith.mulf %543, %542 : vector<5x32xf32>
    %545 = vector.broadcast %506 : vector<1x32xf32> to vector<5x32xf32>
    %546 = arith.mulf %544, %545 : vector<5x32xf32>
    %c0_358 = arith.constant 0 : index
    %c0_359 = arith.constant 0 : index
    %547 = vector.load %arg17[%c0_358, %c0_359] : memref<1x32xf32, #tpu.memory_space<vmem>>, vector<1x32xf32>
    %548 = vector.broadcast %547 : vector<1x32xf32> to vector<5x32xf32>
    %549 = arith.addf %546, %548 : vector<5x32xf32>
    %c1_360 = arith.constant 1 : index
    %c0_361 = arith.constant 0 : index
    %c0_362 = arith.constant 0 : index
    %550 = vector.load %arg20[%c1_360, %c0_361, %c0_362] : memref<2x5x32xf32, #tpu.memory_space<vmem>>, vector<1x5x32xf32>
    %551 = vector.shape_cast %550 : vector<1x5x32xf32> to vector<5x32xf32>
    %552 = vector.shape_cast %549 : vector<5x32xf32> to vector<1x5x32xf32>
    tpu.vector_store %arg20[%c1_360, %c0_361, %c0_362], %552 {strides = array<i32>} : memref<2x5x32xf32, #tpu.memory_space<vmem>>, vector<1x5x32xf32>,
    %c0_363 = arith.constant 0 : index
    %c0_364 = arith.constant 0 : index
    %553 = vector.load %arg18[%c0_363, %c0_364] : memref<1x32xf32, #tpu.memory_space<vmem>>, vector<1x32xf32>
    %c1_365 = arith.constant 1 : index
    %c0_366 = arith.constant 0 : index
    %c0_367 = arith.constant 0 : index
    %554 = vector.load %arg2[%c1_365, %c0_366, %c0_367] : memref<2x6x32xf32, #tpu.memory_space<vmem>>, vector<1x6x32xf32>
    %555 = vector.shape_cast %554 : vector<1x6x32xf32> to vector<6x32xf32>
    %556 = vector.broadcast %455 : vector<1x32xf32> to vector<6x32xf32>
    %557 = arith.subf %555, %556 : vector<6x32xf32>
    %558 = vector.broadcast %553 : vector<1x32xf32> to vector<6x32xf32>
    %559 = arith.mulf %558, %557 : vector<6x32xf32>
    %560 = vector.broadcast %511 : vector<1x32xf32> to vector<6x32xf32>
    %561 = arith.mulf %559, %560 : vector<6x32xf32>
    %c0_368 = arith.constant 0 : index
    %c0_369 = arith.constant 0 : index
    %562 = vector.load %arg19[%c0_368, %c0_369] : memref<1x32xf32, #tpu.memory_space<vmem>>, vector<1x32xf32>
    %563 = vector.broadcast %562 : vector<1x32xf32> to vector<6x32xf32>
    %564 = arith.addf %561, %563 : vector<6x32xf32>
    %c1_370 = arith.constant 1 : index
    %c0_371 = arith.constant 0 : index
    %c0_372 = arith.constant 0 : index
    %565 = vector.load %arg21[%c1_370, %c0_371, %c0_372] : memref<2x6x32xf32, #tpu.memory_space<vmem>>, vector<1x6x32xf32>
    %566 = vector.shape_cast %565 : vector<1x6x32xf32> to vector<6x32xf32>
    %567 = vector.shape_cast %564 : vector<6x32xf32> to vector<1x6x32xf32>
    tpu.vector_store %arg21[%c1_370, %c0_371, %c0_372], %567 {strides = array<i32>} : memref<2x6x32xf32, #tpu.memory_space<vmem>>, vector<1x6x32xf32>,
    return
  }
  func.func @transform_0(%arg0: i32) -> (i32, i32, i32) {
    %c0_i32 = arith.constant 0 : i32
    %c0_i32_0 = arith.constant 0 : i32
    %c0_i32_1 = arith.constant 0 : i32
    %c0_i32_2 = arith.constant 0 : i32
    return %c0_i32, %c0_i32_0, %c0_i32_1 : i32, i32, i32
  }
  func.func @transform_1(%arg0: i32) -> (i32, i32, i32) {
    %c0_i32 = arith.constant 0 : i32
    %c0_i32_0 = arith.constant 0 : i32
    %c0_i32_1 = arith.constant 0 : i32
    %c0_i32_2 = arith.constant 0 : i32
    return %c0_i32, %c0_i32_0, %c0_i32_1 : i32, i32, i32
  }
  func.func @transform_2(%arg0: i32) -> (i32, i32, i32) {
    %c0_i32 = arith.constant 0 : i32
    %c0_i32_0 = arith.constant 0 : i32
    %c0_i32_1 = arith.constant 0 : i32
    %c0_i32_2 = arith.constant 0 : i32
    return %c0_i32, %c0_i32_0, %c0_i32_1 : i32, i32, i32
  }
  func.func @transform_3(%arg0: i32) -> (i32, i32, i32) {
    %c0_i32 = arith.constant 0 : i32
    %c0_i32_0 = arith.constant 0 : i32
    %c0_i32_1 = arith.constant 0 : i32
    %c0_i32_2 = arith.constant 0 : i32
    return %c0_i32, %c0_i32_0, %c0_i32_1 : i32, i32, i32
  }
  func.func @transform_4(%arg0: i32) -> (i32, i32, i32) {
    %c0_i32 = arith.constant 0 : i32
    %c0_i32_0 = arith.constant 0 : i32
    %c0_i32_1 = arith.constant 0 : i32
    %c0_i32_2 = arith.constant 0 : i32
    return %c0_i32, %c0_i32_0, %c0_i32_1 : i32, i32, i32
  }
  func.func @transform_5(%arg0: i32) -> (i32, i32, i32) {
    %c0_i32 = arith.constant 0 : i32
    %c0_i32_0 = arith.constant 0 : i32
    %c0_i32_1 = arith.constant 0 : i32
    %c0_i32_2 = arith.constant 0 : i32
    return %c0_i32, %c0_i32_0, %c0_i32_1 : i32, i32, i32
  }
  func.func @transform_6(%arg0: i32) -> (i32, i32, i32) {
    %c0_i32 = arith.constant 0 : i32
    %c0_i32_0 = arith.constant 0 : i32
    %c0_i32_1 = arith.constant 0 : i32
    %c0_i32_2 = arith.constant 0 : i32
    return %c0_i32, %c0_i32_0, %c0_i32_1 : i32, i32, i32
  }
  func.func @transform_7(%arg0: i32) -> (i32, i32, i32) {
    %c0_i32 = arith.constant 0 : i32
    %c0_i32_0 = arith.constant 0 : i32
    %c0_i32_1 = arith.constant 0 : i32
    %c0_i32_2 = arith.constant 0 : i32
    return %c0_i32, %c0_i32_0, %c0_i32_1 : i32, i32, i32
  }
  func.func @transform_8(%arg0: i32) -> (i32, i32, i32) {
    %c0_i32 = arith.constant 0 : i32
    %c0_i32_0 = arith.constant 0 : i32
    %c0_i32_1 = arith.constant 0 : i32
    %c0_i32_2 = arith.constant 0 : i32
    return %c0_i32, %c0_i32_0, %c0_i32_1 : i32, i32, i32
  }
  func.func @transform_9(%arg0: i32) -> (i32, i32, i32) {
    %c0_i32 = arith.constant 0 : i32
    %c0_i32_0 = arith.constant 0 : i32
    %c0_i32_1 = arith.constant 0 : i32
    %c0_i32_2 = arith.constant 0 : i32
    return %c0_i32, %c0_i32_0, %c0_i32_1 : i32, i32, i32
  }
  func.func @transform_10(%arg0: i32) -> (i32, i32, i32) {
    %c0_i32 = arith.constant 0 : i32
    %c0_i32_0 = arith.constant 0 : i32
    %c0_i32_1 = arith.constant 0 : i32
    %c0_i32_2 = arith.constant 0 : i32
    return %c0_i32, %c0_i32_0, %c0_i32_1 : i32, i32, i32
  }
  func.func @transform_11(%arg0: i32) -> (i32, i32, i32) {
    %c0_i32 = arith.constant 0 : i32
    %c0_i32_0 = arith.constant 0 : i32
    %c0_i32_1 = arith.constant 0 : i32
    %c0_i32_2 = arith.constant 0 : i32
    return %c0_i32, %c0_i32_0, %c0_i32_1 : i32, i32, i32
  }
  func.func @transform_12(%arg0: i32) -> (i32, i32) {
    %c0_i32 = arith.constant 0 : i32
    %c0_i32_0 = arith.constant 0 : i32
    %c0_i32_1 = arith.constant 0 : i32
    return %c0_i32, %c0_i32_0 : i32, i32
  }
  func.func @transform_13(%arg0: i32) -> (i32, i32) {
    %c0_i32 = arith.constant 0 : i32
    %c0_i32_0 = arith.constant 0 : i32
    %c0_i32_1 = arith.constant 0 : i32
    return %c0_i32, %c0_i32_0 : i32, i32
  }
  func.func @transform_14(%arg0: i32) -> (i32, i32) {
    %c0_i32 = arith.constant 0 : i32
    %c0_i32_0 = arith.constant 0 : i32
    %c0_i32_1 = arith.constant 0 : i32
    return %c0_i32, %c0_i32_0 : i32, i32
  }
  func.func @transform_15(%arg0: i32) -> (i32, i32) {
    %c0_i32 = arith.constant 0 : i32
    %c0_i32_0 = arith.constant 0 : i32
    %c0_i32_1 = arith.constant 0 : i32
    return %c0_i32, %c0_i32_0 : i32, i32
  }
  func.func @transform_16(%arg0: i32) -> (i32, i32) {
    %c0_i32 = arith.constant 0 : i32
    %c0_i32_0 = arith.constant 0 : i32
    %c0_i32_1 = arith.constant 0 : i32
    return %c0_i32, %c0_i32_0 : i32, i32
  }
  func.func @transform_17(%arg0: i32) -> (i32, i32) {
    %c0_i32 = arith.constant 0 : i32
    %c0_i32_0 = arith.constant 0 : i32
    %c0_i32_1 = arith.constant 0 : i32
    return %c0_i32, %c0_i32_0 : i32, i32
  }
  func.func @transform_18(%arg0: i32) -> (i32, i32) {
    %c0_i32 = arith.constant 0 : i32
    %c0_i32_0 = arith.constant 0 : i32
    %c0_i32_1 = arith.constant 0 : i32
    return %c0_i32, %c0_i32_0 : i32, i32
  }
  func.func @transform_19(%arg0: i32) -> (i32, i32, i32) {
    %c0_i32 = arith.constant 0 : i32
    %c0_i32_0 = arith.constant 0 : i32
    %c0_i32_1 = arith.constant 0 : i32
    %c0_i32_2 = arith.constant 0 : i32
    return %c0_i32, %c0_i32_0, %c0_i32_1 : i32, i32, i32
  }
  func.func @transform_20(%arg0: i32) -> (i32, i32, i32) {
    %c0_i32 = arith.constant 0 : i32
    %c0_i32_0 = arith.constant 0 : i32
    %c0_i32_1 = arith.constant 0 : i32
    %c0_i32_2 = arith.constant 0 : i32
    return %c0_i32, %c0_i32_0, %c0_i32_1 : i32, i32, i32
  }
}

module attributes {stable_mosaic.version = 11 : i64} {
  func.func @_gatv2_kernel(%arg0: i32, %arg1: memref<1x10x32xf32, #tpu.memory_space<vmem>>, %arg2: memref<32x32xf32, #tpu.memory_space<vmem>>, %arg3: memref<1x32xf32, #tpu.memory_space<vmem>>, %arg4: memref<32x32xf32, #tpu.memory_space<vmem>>, %arg5: memref<1x32xf32, #tpu.memory_space<vmem>>, %arg6: memref<1x32xf32, #tpu.memory_space<vmem>>, %arg7: memref<1x10x10xf32, #tpu.memory_space<vmem>>, %arg8: memref<1x32xf32, #tpu.memory_space<vmem>>, %arg9: memref<1x10x32xf32, #tpu.memory_space<vmem>>) attributes {dimension_semantics = [#tpu.dimension_semantics<parallel>], iteration_bounds = array<i64: 2>, scalar_prefetch = 0 : i64, scratch_operands = 0 : i64, tpu.core_type = #tpu.core_type<tc>, window_params = [{transform_indices = @transform_0, window_bounds = array<i64: 1, 10, 32>}, {pipeline_mode = #tpu.pipeline_mode<synchronous>, transform_indices = @transform_1, window_bounds = array<i64: 32, 32>}, {pipeline_mode = #tpu.pipeline_mode<synchronous>, transform_indices = @transform_2, window_bounds = array<i64: 1, 32>}, {pipeline_mode = #tpu.pipeline_mode<synchronous>, transform_indices = @transform_3, window_bounds = array<i64: 32, 32>}, {pipeline_mode = #tpu.pipeline_mode<synchronous>, transform_indices = @transform_4, window_bounds = array<i64: 1, 32>}, {pipeline_mode = #tpu.pipeline_mode<synchronous>, transform_indices = @transform_5, window_bounds = array<i64: 1, 32>}, {transform_indices = @transform_6, window_bounds = array<i64: 1, 10, 10>}, {pipeline_mode = #tpu.pipeline_mode<synchronous>, transform_indices = @transform_7, window_bounds = array<i64: 1, 32>}, {transform_indices = @transform_8, window_bounds = array<i64: 1, 10, 32>}]} {
    %c0 = arith.constant 0 : index
    %c0_0 = arith.constant 0 : index
    %c0_1 = arith.constant 0 : index
    %0 = vector.load %arg1[%c0, %c0_0, %c0_1] : memref<1x10x32xf32, #tpu.memory_space<vmem>>, vector<1x10x32xf32>
    %1 = vector.shape_cast %0 : vector<1x10x32xf32> to vector<10x32xf32>
    %c0_2 = arith.constant 0 : index
    %c0_3 = arith.constant 0 : index
    %2 = vector.load %arg2[%c0_2, %c0_3] : memref<32x32xf32, #tpu.memory_space<vmem>>, vector<32x32xf32>
    %cst = arith.constant dense<0.000000e+00> : vector<10x32xf32>
    %3 = tpu.matmul %1, %2, %cst {dimension_numbers = #tpu.dot_dimension_numbers<[1], [0], [0], [1], [0, 0, 1, 1], [], []>} : vector<10x32xf32>, vector<32x32xf32>, vector<10x32xf32> -> vector<10x32xf32>
    %c0_4 = arith.constant 0 : index
    %c0_5 = arith.constant 0 : index
    %4 = vector.load %arg3[%c0_4, %c0_5] : memref<1x32xf32, #tpu.memory_space<vmem>>, vector<1x32xf32>
    %5 = vector.broadcast %4 : vector<1x32xf32> to vector<10x32xf32>
    %6 = arith.addf %3, %5 : vector<10x32xf32>
    %c0_6 = arith.constant 0 : index
    %c0_7 = arith.constant 0 : index
    %7 = vector.load %arg4[%c0_6, %c0_7] : memref<32x32xf32, #tpu.memory_space<vmem>>, vector<32x32xf32>
    %cst_8 = arith.constant dense<0.000000e+00> : vector<10x32xf32>
    %8 = tpu.matmul %1, %7, %cst_8 {dimension_numbers = #tpu.dot_dimension_numbers<[1], [0], [0], [1], [0, 0, 1, 1], [], []>} : vector<10x32xf32>, vector<32x32xf32>, vector<10x32xf32> -> vector<10x32xf32>
    %c0_9 = arith.constant 0 : index
    %c0_10 = arith.constant 0 : index
    %9 = vector.load %arg5[%c0_9, %c0_10] : memref<1x32xf32, #tpu.memory_space<vmem>>, vector<1x32xf32>
    %10 = vector.broadcast %9 : vector<1x32xf32> to vector<10x32xf32>
    %11 = arith.addf %8, %10 : vector<10x32xf32>
    %12 = vector.shape_cast %11 : vector<10x32xf32> to vector<10x1x32xf32>
    %13 = vector.shape_cast %6 : vector<10x32xf32> to vector<1x10x32xf32>
    %14 = vector.broadcast %12 : vector<10x1x32xf32> to vector<10x10x32xf32>
    %15 = vector.broadcast %13 : vector<1x10x32xf32> to vector<10x10x32xf32>
    %16 = arith.addf %14, %15 : vector<10x10x32xf32>
    %cst_11 = arith.constant 0.000000e+00 : f32
    %17 = vector.broadcast %cst_11 : f32 to vector<10x10x32xf32>
    %18 = arith.cmpf ogt, %16, %17 : vector<10x10x32xf32>
    %cst_12 = arith.constant 2.000000e-01 : f32
    %19 = vector.broadcast %cst_12 : f32 to vector<10x10x32xf32>
    %20 = arith.mulf %19, %16 : vector<10x10x32xf32>
    %21 = arith.select %18, %16, %20 : vector<10x10x32xi1>, vector<10x10x32xf32>
    %c0_13 = arith.constant 0 : index
    %c0_14 = arith.constant 0 : index
    %22 = vector.load %arg6[%c0_13, %c0_14] : memref<1x32xf32, #tpu.memory_space<vmem>>, vector<1x32xf32>
    %23 = vector.shape_cast %22 : vector<1x32xf32> to vector<1x1x32xf32>
    %24 = vector.broadcast %23 : vector<1x1x32xf32> to vector<10x10x32xf32>
    %25 = arith.mulf %21, %24 : vector<10x10x32xf32>
    %cst_15 = arith.constant dense<0.000000e+00> : vector<10x10xf32>
    %26 = vector.multi_reduction <add>, %25, %cst_15 [2] : vector<10x10x32xf32> to vector<10x10xf32>
    %c0_16 = arith.constant 0 : index
    %c0_17 = arith.constant 0 : index
    %c0_18 = arith.constant 0 : index
    %27 = vector.load %arg7[%c0_16, %c0_17, %c0_18] : memref<1x10x10xf32, #tpu.memory_space<vmem>>, vector<1x10x10xf32>
    %28 = vector.shape_cast %27 : vector<1x10x10xf32> to vector<10x10xf32>
    %cst_19 = arith.constant 0.000000e+00 : f32
    %29 = vector.broadcast %cst_19 : f32 to vector<10x10xf32>
    %30 = arith.cmpf ogt, %28, %29 : vector<10x10xf32>
    %cst_20 = arith.constant -1.000000e+30 : f32
    %31 = vector.broadcast %cst_20 : f32 to vector<10x10xf32>
    %32 = arith.select %30, %26, %31 : vector<10x10xi1>, vector<10x10xf32>
    %cst_21 = arith.constant dense<0xFF800000> : vector<10xf32>
    %33 = vector.multi_reduction <maximumf>, %32, %cst_21 [1] : vector<10x10xf32> to vector<10xf32>
    %34 = vector.shape_cast %33 : vector<10xf32> to vector<10x1xf32>
    %35 = vector.broadcast %34 : vector<10x1xf32> to vector<10x10xf32>
    %36 = arith.subf %32, %35 : vector<10x10xf32>
    %37 = math.exp %36 : vector<10x10xf32>
    %cst_22 = arith.constant dense<0.000000e+00> : vector<10xf32>
    %38 = vector.multi_reduction <add>, %37, %cst_22 [1] : vector<10x10xf32> to vector<10xf32>
    %39 = vector.shape_cast %38 : vector<10xf32> to vector<10x1xf32>
    %40 = vector.broadcast %39 : vector<10x1xf32> to vector<10x10xf32>
    %41 = arith.divf %37, %40 : vector<10x10xf32>
    %cst_23 = arith.constant dense<0.000000e+00> : vector<10x32xf32>
    %42 = tpu.matmul %41, %6, %cst_23 {dimension_numbers = #tpu.dot_dimension_numbers<[1], [0], [0], [1], [0, 0, 1, 1], [], []>} : vector<10x10xf32>, vector<10x32xf32>, vector<10x32xf32> -> vector<10x32xf32>
    %c0_24 = arith.constant 0 : index
    %c0_25 = arith.constant 0 : index
    %43 = vector.load %arg8[%c0_24, %c0_25] : memref<1x32xf32, #tpu.memory_space<vmem>>, vector<1x32xf32>
    %44 = vector.broadcast %43 : vector<1x32xf32> to vector<10x32xf32>
    %45 = arith.addf %42, %44 : vector<10x32xf32>
    %cst_26 = arith.constant 0.000000e+00 : f32
    %46 = vector.broadcast %cst_26 : f32 to vector<10x32xf32>
    %47 = arith.maximumf %45, %46 : vector<10x32xf32>
    %c0_27 = arith.constant 0 : index
    %c0_28 = arith.constant 0 : index
    %c0_29 = arith.constant 0 : index
    %48 = vector.load %arg9[%c0_27, %c0_28, %c0_29] : memref<1x10x32xf32, #tpu.memory_space<vmem>>, vector<1x10x32xf32>
    %49 = vector.shape_cast %48 : vector<1x10x32xf32> to vector<10x32xf32>
    %50 = vector.shape_cast %47 : vector<10x32xf32> to vector<1x10x32xf32>
    tpu.vector_store %arg9[%c0_27, %c0_28, %c0_29], %50 {strides = array<i32>} : memref<1x10x32xf32, #tpu.memory_space<vmem>>, vector<1x10x32xf32>,
    return
  }
  func.func @transform_0(%arg0: i32) -> (i32, i32, i32) {
    %c0_i32 = arith.constant 0 : i32
    %c0_i32_0 = arith.constant 0 : i32
    %c0_i32_1 = arith.constant 0 : i32
    return %arg0, %c0_i32, %c0_i32_0 : i32, i32, i32
  }
  func.func @transform_1(%arg0: i32) -> (i32, i32) {
    %c0_i32 = arith.constant 0 : i32
    %c0_i32_0 = arith.constant 0 : i32
    %c0_i32_1 = arith.constant 0 : i32
    return %c0_i32, %c0_i32_0 : i32, i32
  }
  func.func @transform_2(%arg0: i32) -> (i32, i32) {
    %c0_i32 = arith.constant 0 : i32
    %c0_i32_0 = arith.constant 0 : i32
    %c0_i32_1 = arith.constant 0 : i32
    return %c0_i32, %c0_i32_0 : i32, i32
  }
  func.func @transform_3(%arg0: i32) -> (i32, i32) {
    %c0_i32 = arith.constant 0 : i32
    %c0_i32_0 = arith.constant 0 : i32
    %c0_i32_1 = arith.constant 0 : i32
    return %c0_i32, %c0_i32_0 : i32, i32
  }
  func.func @transform_4(%arg0: i32) -> (i32, i32) {
    %c0_i32 = arith.constant 0 : i32
    %c0_i32_0 = arith.constant 0 : i32
    %c0_i32_1 = arith.constant 0 : i32
    return %c0_i32, %c0_i32_0 : i32, i32
  }
  func.func @transform_5(%arg0: i32) -> (i32, i32) {
    %c0_i32 = arith.constant 0 : i32
    %c0_i32_0 = arith.constant 0 : i32
    %c0_i32_1 = arith.constant 0 : i32
    return %c0_i32, %c0_i32_0 : i32, i32
  }
  func.func @transform_6(%arg0: i32) -> (i32, i32, i32) {
    %c0_i32 = arith.constant 0 : i32
    %c0_i32_0 = arith.constant 0 : i32
    %c0_i32_1 = arith.constant 0 : i32
    return %arg0, %c0_i32, %c0_i32_0 : i32, i32, i32
  }
  func.func @transform_7(%arg0: i32) -> (i32, i32) {
    %c0_i32 = arith.constant 0 : i32
    %c0_i32_0 = arith.constant 0 : i32
    %c0_i32_1 = arith.constant 0 : i32
    return %c0_i32, %c0_i32_0 : i32, i32
  }
  func.func @transform_8(%arg0: i32) -> (i32, i32, i32) {
    %c0_i32 = arith.constant 0 : i32
    %c0_i32_0 = arith.constant 0 : i32
    %c0_i32_1 = arith.constant 0 : i32
    return %arg0, %c0_i32, %c0_i32_0 : i32, i32, i32
  }
}

</mosaic_0001>

<bundles_post_ra>
// kernel: forward.6
= control target key start
LH: loop header
LB: loop body
LE: loop exit
PB: predicated region body
PF: predicated region fallthrough
CT: control target
= control target key end

     0   :  { %v153_v0 = vmov 0.0   ;;  %vm26_vm0 = vcmask 130048   ;;  %vm154_vm1 = vmmov 0   ;;  %vm116_vm2 = vcmask 261120   ;;  %s202_s1 = inlined_call_operand.vmem [shape: f32[16,32], index: 1, kind: input, shape index: {}]   ;;  %s203_s0 = inlined_call_operand.vmem [shape: f32[18,16], index: 0, kind: input, shape index: {}]   ;;  %s204_s2 = inlined_call_operand.vmem [shape: f32[1,32], index: 2, kind: input, shape index: {}]   ;;  %s205_s3 = inlined_call_operand.vmem [shape: f32[18,32], index: 3, kind: output, shape index: {}]  }
   0x1   :  { %147 = vmatprep.subr.mxu1 %v153_v0  ;;  %v18_v1 = vld [vmem:[%s202_s1 + $0x8] sm:$0xff]  ;;  %134 = vmatprep.subr.mxu0 %v153_v0  ;;  %v17_v2 = vld [vmem:[%s202_s1] sm:$0xff]  ;;  %v16_v5 = vld [vmem:[%s203_s0 + $0x10] sm:$0x3]  ;;  %vm119_vm3 = vcmask 254976  }
   0x2   :  { %149 = vmatpush3.msra.mxu1 %v18_v1  ;;  %135 = vmatpush3.msra.mxu0 %v18_v1  ;;  %v15_v3 = vld [vmem:[%s203_s0 + $0x8] sm:$0xff]  ;;  %v14_v4 = vld [vmem:[%s203_s0] sm:$0xff] }
   0x3   :  { %148 = vmatprep.subr.mxu1 %v153_v0  ;;  %141 = vmatprep.mubr.msk.f32.mxu1 %vm154_vm1, %v153_v0  ;;  %v125_v6 = vld [vmem:[%s204_s2] ss:$0 sm:$0xff] }
   0x4   :  { %150 = vmatpush3.msra.mxu1 %v17_v2  ;;  %136 = vmatprep.subr.mxu0 %v153_v0 }
   0x5   :  { %142 = vmatmul.mubr.msk.f32.vlgmr.msra.gmra.mxu1 %vm26_vm0, %v15_v3  ;;  %137 = vmatpush3.msra.mxu0 %v17_v2 }
   0x6   :  { %138 = vmatprep.mubr.msk.f32.mxu0 %vm154_vm1, %v153_v0  ;;  %144 = vmatprep.mubr.msk.f32.mxu1 %vm154_vm1, %v153_v0 }
   0x7   :  { %139 = vmatmul.mubr.msk.f32.vlgmr.msra.gmra.mxu0 %vm26_vm0, %v14_v4 }
   0x9   :  { %145 = vmatmul.mubr.msk.f32.gmra.mxu1 %vm26_vm0, %v16_v5 }
  0xc5   :  { %v107_v7 = vpop.f32.mrf.mxu1 }
  0xc6   :  { %v108_v8 = vadd.f32 %v125_v6, %v107_v7 }
  0xc7   :  { %v102_v9 = vpop.f32.mrf.mxu0  ;;  %v143_v10 = vpop.f32.mrf.mxu1 }
  0xc8   :  { %118 = vst.msk [vmem:[%s205_s3 + $0x8] sm:$0xff] %vm116_vm2, %v108_v8  ;;  %v103_v11 = vadd.f32 %v125_v6, %v102_v9 }
  0xc9   :  { %v140_v12 = vpop.f32.mrf.mxu0  ;;  %v112_v13 = vpop.f32.mrf.mxu1 }
  0xca   :  { %117 = vst.msk [vmem:[%s205_s3] sm:$0xff] %vm116_vm2, %v103_v11  ;;  %v113_v14 = vadd.f32 %v125_v6, %v112_v13 }
  0xcb   :  { %v146_v15 = vpop.f32.mrf.mxu1 }
  0xcc   :  { %120 = vst.msk [vmem:[%s205_s3 + $0x10] sm:$0x3] %vm119_vm3, %v113_v14 }

// kernel: forward.8
= control target key start
LH: loop header
LB: loop body
LE: loop exit
PB: predicated region body
PF: predicated region fallthrough
CT: control target
= control target key end

     0   :  { %s1265_s27 = smov 0   ;;  %s1501_s0 = inlined_call_operand.vmem [shape: f32[2,10,32], index: 0, kind: input, shape index: {}]   ;;  %s1502_s1 = inlined_call_operand.vmem [shape: f32[32,32], index: 1, kind: input, shape index: {}]   ;;  %s1503_s2 = inlined_call_operand.vmem [shape: f32[1,32], index: 2, kind: input, shape index: {}]   ;;  %s1504_s3 = inlined_call_operand.vmem [shape: f32[32,32], index: 3, kind: input, shape index: {}]   ;;  %s1505_s4 = inlined_call_operand.vmem [shape: f32[1,32], index: 4, kind: input, shape index: {}]   ;;  %s1506_s5 = inlined_call_operand.vmem [shape: f32[1,32], index: 5, kind: input, shape index: {}]   ;;  %s1507_s6 = inlined_call_operand.vmem [shape: f32[2,10,10], index: 6, kind: input, shape index: {}]   ;;  %s1508_s7 = inlined_call_operand.vmem [shape: f32[1,32], index: 7, kind: input, shape index: {}]   ;;  %s1509_s8 = inlined_call_operand.vmem [shape: f32[2,10,32], index: 8, kind: output, shape index: {}]  }
   0x1 LB: > { %s1122_s28 = sadd.s32 4294967295, %s1217_s27   ;;  %p1126_p0 = scmp.ge.s32.totalorder %s1217_s27, 1  ;;  %s1217_s27 = sphi %s1265_s27, %s18_s27  }
   0x2   : > { %p272_p1 = scmp.lt.s32.totalorder %s1217_s27, 3 }
   0x4   : > { %p273_p2 = pnand %p1126_p0, %p272_p1 }
   0x5   : > { %p311_p3 = scmp.lt.s32.totalorder (!%p273_p2), %s1122_s28, 1 }
   0x6   : > { %276 = sbr.rel (%p273_p2) target bundleno = 923 (0x39b), region = 52 }
   0xb   : > { %v424_v0 = vld [vmem:[%s1504_s3 + $0x18] sm:$0xff]  ;;  %v423_v2 = vld [vmem:[%s1504_s3 + $0x10] sm:$0xff]  ;;  %v422_v4 = vld [vmem:[%s1504_s3 + $0x8] sm:$0xff]  ;;  %s1511_s28 = smov (!%p311_p3, %s1122_s28), 1  ;;  %vm339_vm0 = vcmask 261120   ;;  %v513_v12 = vlaneseq  ;;  %vm972_vm1 = vcmask 1041408  }
   0xc   : > { %v331_v1 = vld [vmem:[%s1502_s1 + $0x18] sm:$0xff]  ;;  %1176 = vmatprep.subr.mxu1 %v424_v0  ;;  %v330_v3 = vld [vmem:[%s1502_s1 + $0x10] sm:$0xff]  ;;  %v329_v5 = vld [vmem:[%s1502_s1 + $0x8] sm:$0xff]  ;;  %s1297_s23 = sshll.u32 %s1511_s28, 4  ;;  %v1219_v10 = vmov 1966171168  }
   0xd   : > { %1165 = vmatprep.subr.mxu0 %v331_v1  ;;  %1177 = vmatpush3.msra.mxu1 %v424_v0  ;;  %v421_v6 = vld [vmem:[%s1504_s3] sm:$0xff]  ;;  %s315_s26 = scalar_lea.vmem %s1501_s0, %s1297_s23  ;;  %v511_v11 = vunpack.c.l.s4 %v1219_v10  ;;  %v1308_v14 = vshrl.u32 %v513_v12, 7  ;;  %vm740_vm2 = vcmask 254976   ;;  %s320_s14 = scalar_lea.vmem %s1507_s6, %s1297_s23 }
   0xe   : > { %1166 = vmatpush3.msra.mxu0 %v331_v1  ;;  %1178 = vmatprep.subr.mxu1 %v423_v2  ;;  %v328_v7 = vld [vmem:[%s1502_s1] sm:$0xff]  ;;  %v327_v9 = vld [vmem:[%s315_s26 + $0x8] sm:$0x3]  ;;  %s325_s19 = scalar_lea.vmem %s1509_s8, %s1297_s23 }
   0xf   : > { %1167 = vmatprep.subr.mxu0 %v330_v3  ;;  %1179 = vmatpush3.msra.mxu1 %v423_v2  ;;  %v326_v8 = vld [vmem:[%s315_s26] sm:$0xff]  ;;  %v512_v13 = vunpack.c.0.s8 %v511_v11  ;;  %v1325_v25 = vsub.s32 0, %v1308_v14 }
  0x10   : > { %1168 = vmatpush3.msra.mxu0 %v330_v3  ;;  %1180 = vmatprep.subr.mxu1 %v422_v4  ;;  %v1136_v15 = vld [vmem:[%s1505_s4] ss:$0 sm:$0xff] }
  0x11   : > { %1169 = vmatprep.subr.mxu0 %v329_v5  ;;  %1181 = vmatpush3.msra.mxu1 %v422_v4  ;;  %v1133_v16 = vld [vmem:[%s1503_s2] ss:$0 sm:$0xff]  ;;  %v1317_v17 = vsub.s32 %v512_v13, %v1308_v14 }
  0x12   : > { %1170 = vmatpush3.msra.mxu0 %v329_v5  ;;  %1182 = vmatprep.subr.mxu1 %v421_v6  ;;  %v1361_v48 = vld [vmem:[%s1506_s5] ss:$0 sm:$0xff] }
  0x13   : > { %1171 = vmatprep.subr.mxu0 %v328_v7  ;;  %1183 = vmatpush3.msra.mxu1 %v421_v6 }
  0x14   : > { %1184 = vmatprep.mubr.msk.f32.mxu1 %vm339_vm0, %v326_v8  ;;  %1172 = vmatpush3.msra.mxu0 %v328_v7 }
  0x15   : > { %1173 = vmatprep.mubr.msk.f32.mxu0 %vm339_vm0, %v326_v8  ;;  %1185 = vmatmul.mubr.msk.f32.vlgmr.msra.gmra.mxu1 %vm339_vm0, %v327_v9 }
  0x16   : > { %1174 = vmatmul.mubr.msk.f32.vlgmr.msra.gmra.mxu0 %vm339_vm0, %v327_v9 }
  0xd5   : > { %v1186_v18 = vpop.f32.mrf.mxu1 }
  0xd6   : > { %v1175_v19 = vpop.f32.mrf.mxu0  ;;  %v504_v20 = vadd.f32 %v1186_v18, %v1136_v15 }
  0xd7   : > { %v1319_v21 = vadd.f32 %v1175_v19, %v1133_v16  ;;  %v498_v22 = vpop.f32.mrf.mxu1 }
  0xd8   : > { %v412_v23 = vpop.f32.mrf.mxu0  ;;  %v1322_v24 = vrot.slane %v504_v20, %v1317_v17  ;;  %v499_v26 = vadd.f32 %v1136_v15, %v498_v22 }
  0xd9   : > { %v1327_v27 = vadd.f32 %v1133_v16, %v412_v23  ;;  %1187 = vmatprep.subr.msk.mxu0 %vm972_vm1, %v1319_v21 }
  0xda   : > { %1188 = vmatpush3.msk.msra.mxu0 %vm972_vm1, %v1319_v21  ;;  %v572_v28 = vrot.slane %v1322_v24, %v1317_v17  ;;  %v509_v29 = vcombine.high %v499_v26, %v499_v26  ;;  %v516_v30 = vrot.slane %v499_v26, %v1317_v17  ;;  %v565_v42 = vcombine.high %v1322_v24, %v1322_v24 }
  0xdb   : > { %1189 = vmatprep.subr.mxu0 %v1327_v27 }
  0xdc   : > { %1190 = vmatpush3.msra.mxu0 %v1327_v27  ;;  %v615_v31 = vrot.slane %v572_v28, %v1325_v25  ;;  %v523_v32 = vrot.slane %v509_v29, %v1317_v17  ;;  %v524_v33 = vcombine.high %v516_v30, %v516_v30  ;;  %v532_v34 = vrot.slane %v516_v30, %v1317_v17 }
  0xdd   : > { %v579_v19 = vrot.slane %v565_v42, %v1317_v17 }
  0xde   : > { %v525_v35 = vcombine.high %v523_v32, %v523_v32  ;;  %v1340_v36 = vrot.slane %v523_v32, %v1317_v17  ;;  %v1343_v37 = vrot.slane %v524_v33, %v1317_v17  ;;  %v554_v38 = vcombine.high %v532_v34, %v532_v34 }
  0xdf   : > { %v583_v39 = vrot.slane %v532_v34, %v1325_v25  ;;  %v647_v40 = vadd.f32 %v615_v31, %v1319_v21  ;;  %v646_v41 = vadd.f32 %v615_v31, %v1327_v27 }
  0xe0   : > { %v1351_v43 = vrot.slane %v525_v35, %v1317_v17  ;;  %v587_v44 = vrot.slane %v1343_v37, %v1325_v25  ;;  %v556_v45 = vcombine.high %v1343_v37, %v1343_v37  ;;  %v591_v46 = vrot.slane %v554_v38, %v1325_v25 }
  0xe1   : > { %vm667_vm3 = vcmp.gt.f32.partialorder %v647_v40, 0.0  ;;  %v687_v47 = vmul.f32 0.2, %v647_v40  ;;  %v599_v49 = vrot.slane %v1340_v36, %v1325_v25  ;;  %vm666_vm4 = vcmp.gt.f32.partialorder %v646_v41, 0.0 }
  0xe2   : > { %v686_v50 = vmul.f32 0.2, %v646_v41  ;;  %v632_v51 = vadd.f32 %v587_v44, %v1327_v27  ;;  %v630_v53 = vadd.f32 %v583_v39, %v1327_v27  ;;  %v633_v54 = vadd.f32 %v587_v44, %v1319_v21 }
  0xe3   : > { %v707_v52 = vsel %vm667_vm3, %v647_v40, %v687_v47  ;;  %v631_v55 = vadd.f32 %v583_v39, %v1319_v21  ;;  %v635_v6 = vadd.f32 %v591_v46, %v1319_v21  ;;  %v634_v7 = vadd.f32 %v591_v46, %v1327_v27 }
  0xe4   : > { %v734_v56 = vmul.f32 %v1361_v48, %v707_v52  ;;  %v706_v57 = vsel %vm666_vm4, %v646_v41, %v686_v50  ;;  %vm652_vm5 = vcmp.gt.f32.partialorder %v632_v51, 0.0  ;;  %v672_v58 = vmul.f32 0.2, %v632_v51 }
  0xe5   : > { %v733_v59 = vmul.f32 %v1361_v48, %v706_v57  ;;  %vm650_vm6 = vcmp.gt.f32.partialorder %v630_v53, 0.0  ;;  %v670_v60 = vmul.f32 0.2, %v630_v53  ;;  %vm653_vm7 = vcmp.gt.f32.partialorder %v633_v54, 0.0 }
  0xe6   : > { %v789_v61 = vsel %vm740_vm2, %v734_v56, 0.0  ;;  %v692_v62 = vsel %vm652_vm5, %v632_v51, %v672_v58  ;;  %v673_v63 = vmul.f32 0.2, %v633_v54  ;;  %vm651_vm8 = vcmp.gt.f32.partialorder %v631_v55, 0.0 }
  0xe7   : > { %790 = vadd.xlane.f32.xlu1 %v789_v61  ;;  %v786_v0 = vsel %vm339_vm0, %v733_v59, 0.0  ;;  %v719_v1 = vmul.f32 %v1361_v48, %v692_v62  ;;  %v690_v2 = vsel %vm650_vm6, %v630_v53, %v670_v60  ;;  %v671_v3 = vmul.f32 0.2, %v631_v55 }
  0xe8   : > { %787 = vadd.xlane.f32.xlu0 %v786_v0  ;;  %v717_v4 = vmul.f32 %v1361_v48, %v690_v2  ;;  %v693_v5 = vsel %vm653_vm7, %v633_v54, %v673_v63  ;;  %v639_v11 = vadd.f32 %v599_v49, %v1319_v21  ;;  %vm655_vm9 = vcmp.gt.f32.partialorder %v635_v6, 0.0 }
  0xe9   : > { %v744_v8 = vsel %vm339_vm0, %v719_v1, 0.0  ;;  %v720_v9 = vmul.f32 %v1361_v48, %v693_v5  ;;  %v691_v10 = vsel %vm651_vm8, %v631_v55, %v671_v3  ;;  %v675_v15 = vmul.f32 0.2, %v635_v6 }
  0xea   : > { %v737_v13 = vsel %vm339_vm0, %v717_v4, 0.0  ;;  %v718_v16 = vmul.f32 %v1361_v48, %v691_v10  ;;  %vm654_vm10 = vcmp.gt.f32.partialorder %v634_v7, 0.0  ;;  %v674_v18 = vmul.f32 0.2, %v634_v7 }
  0xeb   : > { %745 = vadd.xlane.f32.xlu1 %v744_v8  ;;  %vm659_vm11 = vcmp.gt.f32.partialorder %v639_v11, 0.0  ;;  %v695_v20 = vsel %vm655_vm9, %v635_v6, %v675_v15  ;;  %v679_v22 = vmul.f32 0.2, %v639_v11  ;;  %v638_v23 = vadd.f32 %v599_v49, %v1327_v27 }
  0xec   : > { %738 = vadd.xlane.f32.xlu0 %v737_v13  ;;  %v747_v24 = vsel %vm740_vm2, %v720_v9, 0.0  ;;  %v694_v26 = vsel %vm654_vm10, %v634_v7, %v674_v18  ;;  %v595_v28 = vrot.slane %v556_v45, %v1325_v25  ;;  %v603_v29 = vrot.slane %v1351_v43, %v1325_v25 }
  0xed   : > { %v722_v30 = vmul.f32 %v1361_v48, %v695_v20  ;;  %v699_v31 = vsel %vm659_vm11, %v639_v11, %v679_v22  ;;  %vm658_vm12 = vcmp.gt.f32.partialorder %v638_v23, 0.0  ;;  %v678_v32 = vmul.f32 0.2, %v638_v23 }
  0xee   : > { %v741_v17 = vsel %vm740_vm2, %v718_v16, 0.0  ;;  %v721_v33 = vmul.f32 %v1361_v48, %v694_v26  ;;  %v637_v34 = vadd.f32 %v595_v28, %v1319_v21  ;;  %v636_v35 = vadd.f32 %v595_v28, %v1327_v27 }
  0xef   : > { %748 = vadd.xlane.f32.xlu1 %v747_v24  ;;  %v555_v37 = vcombine.high %v1340_v36, %v1340_v36  ;;  %v698_v38 = vsel %vm658_vm12, %v638_v23, %v678_v32  ;;  %v641_v39 = vadd.f32 %v603_v29, %v1319_v21  ;;  %v640_v40 = vadd.f32 %v603_v29, %v1327_v27 }
  0xf0   : > { %742 = vadd.xlane.f32.xlu0 %v741_v17  ;;  %v557_v41 = vcombine.high %v1351_v43, %v1351_v43  ;;  %v726_v42 = vmul.f32 %v1361_v48, %v699_v31  ;;  %vm657_vm13 = vcmp.gt.f32.partialorder %v637_v34, 0.0  ;;  %v677_v44 = vmul.f32 0.2, %v637_v34 }
  0xf1   : > { %v753_v45 = vsel %vm740_vm2, %v722_v30, 0.0  ;;  %v725_v46 = vmul.f32 %v1361_v48, %v698_v38  ;;  %vm656_vm14 = vcmp.gt.f32.partialorder %v636_v35, 0.0  ;;  %v676_v47 = vmul.f32 0.2, %v636_v35 }
  0xf2   : > { %v750_v36 = vsel %vm339_vm0, %v721_v33, 0.0  ;;  %v697_v49 = vsel %vm657_vm13, %v637_v34, %v677_v44  ;;  %v681_v50 = vmul.f32 0.2, %v641_v39  ;;  %v680_v51 = vmul.f32 0.2, %v640_v40 }
  0xf3   : > { %754 = vadd.xlane.f32.xlu1 %v753_v45  ;;  %v696_v52 = vsel %vm656_vm14, %v636_v35, %v676_v47  ;;  %vm661_vm15 = vcmp.gt.f32.partialorder %v641_v39, 0.0  ;;  %vm660_vm1 = vcmp.gt.f32.partialorder %v640_v40, 0.0  ;;  %v607_v43 = vrot.slane %v555_v37, %v1325_v25 }
  0xf4   : > { %751 = vadd.xlane.f32.xlu0 %v750_v36  ;;  %v619_v53 = vrot.slane %v579_v19, %v1325_v25  ;;  %v765_v54 = vsel %vm740_vm2, %v726_v42, 0.0  ;;  %v611_v55 = vrot.slane %v557_v41, %v1325_v25  ;;  %v762_v56 = vsel %vm339_vm0, %v725_v46, 0.0 }
  0xf5   : > { %v724_v57 = vmul.f32 %v1361_v48, %v697_v49  ;;  %v643_v58 = vadd.f32 %v607_v43, %v1319_v21  ;;  %v642_v59 = vadd.f32 %v607_v43, %v1327_v27  ;;  %v723_v60 = vmul.f32 %v1361_v48, %v696_v52 }
  0xf6   : > { %v701_v61 = vsel %vm661_vm15, %v641_v39, %v681_v50  ;;  %v700_v62 = vsel %vm660_vm1, %v640_v40, %v680_v51  ;;  %v645_v63 = vadd.f32 %v611_v55, %v1319_v21  ;;  %v644_v25 = vadd.f32 %v611_v55, %v1327_v27 }
  0xf7   : > { %766 = vadd.xlane.f32.xlu1 %v765_v54  ;;  %vm663_vm3 = vcmp.gt.f32.partialorder %v643_v58, 0.0  ;;  %v683_v0 = vmul.f32 0.2, %v643_v58  ;;  %vm662_vm4 = vcmp.gt.f32.partialorder %v642_v59, 0.0  ;;  %v682_v1 = vmul.f32 0.2, %v642_v59 }
  0xf8   : > { %763 = vadd.xlane.f32.xlu0 %v762_v56  ;;  %v759_v2 = vsel %vm740_vm2, %v724_v57, 0.0  ;;  %v728_v3 = vmul.f32 %v1361_v48, %v701_v61  ;;  %v727_v4 = vmul.f32 %v1361_v48, %v700_v62  ;;  %v756_v5 = vsel %vm339_vm0, %v723_v60, 0.0 }
  0xf9   : > { %v703_v6 = vsel %vm663_vm3, %v643_v58, %v683_v0  ;;  %v685_v7 = vmul.f32 0.2, %v645_v63  ;;  %v649_v8 = vadd.f32 %v619_v53, %v1319_v21  ;;  %v702_v9 = vsel %vm662_vm4, %v642_v59, %v682_v1 }
  0xfa   : > { %vm665_vm5 = vcmp.gt.f32.partialorder %v645_v63, 0.0  ;;  %v684_v10 = vmul.f32 0.2, %v644_v25  ;;  %v648_v11 = vadd.f32 %v619_v53, %v1327_v27  ;;  %vm664_vm6 = vcmp.gt.f32.partialorder %v644_v25, 0.0 }
  0xfb   : > { %760 = vadd.xlane.f32.xlu1 %v759_v2  ;;  %v771_v13 = vsel %vm740_vm2, %v728_v3, 0.0  ;;  %v730_v15 = vmul.f32 %v1361_v48, %v703_v6  ;;  %v768_v16 = vsel %vm339_vm0, %v727_v4, 0.0  ;;  %v729_v18 = vmul.f32 %v1361_v48, %v702_v9 }
  0xfc   : > { %757 = vadd.xlane.f32.xlu0 %v756_v5  ;;  %v705_v19 = vsel %vm665_vm5, %v645_v63, %v685_v7  ;;  %v689_v20 = vmul.f32 0.2, %v649_v8  ;;  %v704_v21 = vsel %vm664_vm6, %v644_v25, %v684_v10  ;;  %vm669_vm7 = vcmp.gt.f32.partialorder %v649_v8, 0.0 }
  0xfd   : > { %v688_v22 = vmul.f32 0.2, %v648_v11  ;;  %vm668_vm8 = vcmp.gt.f32.partialorder %v648_v11, 0.0  ;;  %v777_v23 = vsel %vm740_vm2, %v730_v15, 0.0  ;;  %v732_v27 = vmul.f32 %v1361_v48, %v705_v19 }
  0xfe   : > { %v774_v24 = vsel %vm339_vm0, %v729_v18, 0.0  ;;  %v731_v26 = vmul.f32 %v1361_v48, %v704_v21  ;;  %v709_v28 = vsel %vm669_vm7, %v649_v8, %v689_v20  ;;  %v823_v42 = vand.u32 127, %v513_v12 }
  0xff   : > { %772 = vadd.xlane.f32.xlu1 %v771_v13  ;;  %v708_v29 = vsel %vm668_vm8, %v648_v11, %v688_v22  ;;  %v783_v30 = vsel %vm740_vm2, %v732_v27, 0.0  ;;  %v736_v31 = vmul.f32 %v1361_v48, %v709_v28  ;;  %vm833_vm9 = vcmask 130112   ;;  %v798_v11 = vld [vmem:[%s320_s14] sm:$0xff]  ;;  %v799_v28 = vld [vmem:[%s320_s14 + $0x8] sm:$0x3] }
 0x100   : > { %769 = vadd.xlane.f32.xlu0 %v768_v16  ;;  %v780_v32 = vsel %vm339_vm0, %v731_v26, 0.0  ;;  %v735_v17 = vmul.f32 %v1361_v48, %v708_v29  ;;  %v828_v48 = vadd.s32 4294967288, %v823_v42  ;;  %v1443_v50 = vsub.s32 %v823_v42, %v1308_v14 }
 0x101   : > { %v795_v33 = vsel %vm740_vm2, %v736_v31, 0.0  ;;  %vm916_vm10 = vcmask 1041409   ;;  %vm918_vm11 = vcmask 1042434   ;;  %vm920_vm12 = vcmask 1043459  }
 0x102   : > { %v792_v34 = vsel %vm339_vm0, %v735_v17, 0.0  ;;  %v1440_v36 = vsub.s32 %v828_v48, %v1308_v14  ;;  %vm922_vm13 = vcmask 1044484   ;;  %vm924_vm14 = vcmask 1045509  }
 0x103   : > { %778 = vadd.xlane.f32.xlu1 %v777_v23  ;;  %vm926_vm15 = vcmask 1046534   ;;  %vm928_vm1 = vcmask 1047559   ;;  %vm800_vm3 = vcmp.gt.f32.partialorder %v798_v11, 0.0  ;;  %vm935_vm4 = vcmask 80896  }
 0x104   : > { %775 = vadd.xlane.f32.xlu0 %v774_v24  ;;  %vm801_vm5 = vcmp.gt.f32.partialorder %v799_v28, 0.0  ;;  %vm939_vm6 = vcmask 74752  }
 0x107   : > { %784 = vadd.xlane.f32.xlu1 %v783_v30 }
 0x108   : > { %781 = vadd.xlane.f32.xlu0 %v780_v32 }
 0x10b   : > { %796 = vadd.xlane.f32.xlu1 %v795_v33 }
 0x10c   : > { %793 = vadd.xlane.f32.xlu0 %v792_v34 }
 0x170   : > { %v1434_v35 = vpop.xlane.xlu1 %790 }
 0x171   : > { %v1436_v37 = vpop.xlane.xlu0 %787  ;;  %v905_v22 = vrot.slane %v1434_v35, %v1440_v36 }
 0x172   : > { %v901_v23 = vrot.slane %v1436_v37, %v1443_v50 }
 0x174   : > { %v746_v38 = vpop.xlane.xlu1 %745  ;;  %v906_v34 = vsel %vm833_vm9, %v905_v22, %v901_v23 }
 0x175   : > { %v739_v39 = vpop.xlane.xlu0 %738  ;;  %v838_v54 = vrot.slane %v746_v38, %v1443_v50 }
 0x176   : > { %v827_v55 = vrot.slane %v739_v39, %v1443_v50 }
 0x178   : > { %v749_v40 = vpop.xlane.xlu1 %748 }
 0x179   : > { %v743_v41 = vpop.xlane.xlu0 %742  ;;  %v842_v52 = vrot.slane %v749_v40, %v1440_v36 }
 0x17a   : > { %v832_v43 = vrot.slane %v743_v41, %v1440_v36 }
 0x17b   : > { %v843_v59 = vsel %vm833_vm9, %v842_v52, %v838_v54  ;;  %v1140_v54 = vld [vmem:[%s1508_s7] ss:$0 sm:$0xff] }
 0x17c   : > { %v755_v44 = vpop.xlane.xlu1 %754  ;;  %v834_v60 = vsel %vm833_vm9, %v832_v43, %v827_v55 }
 0x17d   : > { %v752_v45 = vpop.xlane.xlu0 %751  ;;  %v851_v53 = vrot.slane %v755_v44, %v1440_v36  ;;  %v917_v1 = vsel %vm916_vm10, %v843_v59, %v834_v60 }
 0x17e   : > { %v847_v12 = vrot.slane %v752_v45, %v1443_v50 }
 0x180   : > { %v767_v46 = vpop.xlane.xlu1 %766  ;;  %v852_v61 = vsel %vm833_vm9, %v851_v53, %v847_v12 }
 0x181   : > { %v764_v47 = vpop.xlane.xlu0 %763  ;;  %v869_v2 = vrot.slane %v767_v46, %v1440_v36  ;;  %v919_v6 = vsel %vm918_vm11, %v852_v61, %v917_v1 }
 0x182   : > { %v865_v3 = vrot.slane %v764_v47, %v1443_v50 }
 0x184   : > { %v761_v49 = vpop.xlane.xlu1 %760  ;;  %v870_v13 = vsel %vm833_vm9, %v869_v2, %v865_v3 }
 0x185   : > { %v758_v51 = vpop.xlane.xlu0 %757  ;;  %v860_v56 = vrot.slane %v761_v49, %v1440_v36 }
 0x186   : > { %v856_v57 = vrot.slane %v758_v51, %v1443_v50 }
 0x188   : > { %v773_v58 = vpop.xlane.xlu1 %772  ;;  %v861_v62 = vsel %vm833_vm9, %v860_v56, %v856_v57 }
 0x189   : > { %v770_v14 = vpop.xlane.xlu0 %769  ;;  %v878_v63 = vrot.slane %v773_v58, %v1440_v36  ;;  %v921_v8 = vsel %vm920_vm12, %v861_v62, %v919_v6 }
 0x18a   : > { %v874_v0 = vrot.slane %v770_v14, %v1443_v50  ;;  %v923_v20 = vsel %vm922_vm13, %v870_v13, %v921_v8 }
 0x18c   : > { %v779_v25 = vpop.xlane.xlu1 %778  ;;  %v879_v9 = vsel %vm833_vm9, %v878_v63, %v874_v0 }
 0x18d   : > { %v887_v4 = vrot.slane %v779_v25, %v1440_v36  ;;  %v776_v5 = vpop.xlane.xlu0 %775  ;;  %v925_v21 = vsel %vm924_vm14, %v879_v9, %v923_v20 }
 0x18e   : > { %v883_v7 = vrot.slane %v776_v5, %v1443_v50 }
 0x190   : > { %v785_v10 = vpop.xlane.xlu1 %784  ;;  %v888_v15 = vsel %vm833_vm9, %v887_v4, %v883_v7 }
 0x191   : > { %v896_v16 = vrot.slane %v785_v10, %v1440_v36  ;;  %v782_v18 = vpop.xlane.xlu0 %781  ;;  %v927_v26 = vsel %vm926_vm15, %v888_v15, %v925_v21 }
 0x192   : > { %v892_v19 = vrot.slane %v782_v18, %v1443_v50 }
 0x194   : > { %v797_v27 = vpop.xlane.xlu1 %796  ;;  %v897_v24 = vsel %vm833_vm9, %v896_v16, %v892_v19 }
 0x195   : > { %v914_v29 = vrot.slane %v797_v27, %v1440_v36  ;;  %v794_v30 = vpop.xlane.xlu0 %793  ;;  %v929_v31 = vsel %vm928_vm1, %v897_v24, %v927_v26 }
 0x196   : > { %v910_v32 = vrot.slane %v794_v30, %v1443_v50  ;;  %v933_v17 = vsel %vm800_vm3, %v929_v31, -1e+30 }
 0x197   : > { %v936_v33 = vsel %vm935_vm4, %v933_v17, -inf }
 0x198   : > { %937 = vmax.xlane.f32.xlu0 %v936_v33  ;;  %v915_v35 = vsel %vm833_vm9, %v914_v29, %v910_v32 }
 0x199   : > { %v930_v37 = vsel %vm916_vm10, %v915_v35, %v906_v34 }
 0x19a   : > { %v934_v38 = vsel %vm801_vm5, %v930_v37, -1e+30 }
 0x19b   : > { %v940_v39 = vsel %vm939_vm6, %v934_v38, -inf }
 0x19c   : > { %941 = vmax.xlane.f32.xlu1 %v940_v39 }
 0x221   : > { %v938_v40 = vpop.xlane.xlu0 %937 }
 0x222   : > { %v943_v41 = vsub.f32 %v933_v17, %v938_v40 }
 0x224   : > { %v945_v42 = vmul.f32 1.442695, %v943_v41 }
 0x225   : > { %v942_v44 = vpop.xlane.xlu1 %941 }
 0x226   : > { %1203 = vpow2.f32 %v945_v42  ;;  %v944_v45 = vsub.f32 %v934_v38, %v942_v44 }
 0x228   : > { %v947_v48 = vmul.f32 1.442695, %v944_v45 }
 0x22a   : > { %1205 = vpow2.f32 %v947_v48 }
 0x233   : > { %v1204_v46 = vpop.eup %1203 }
 0x234   : > { %v949_v47 = vsel %vm935_vm4, %v1204_v46, 0.0 }
 0x235   : > { %950 = vadd.xlane.f32.xlu0 %v949_v47 }
 0x237   : > { %v1206_v36 = vpop.eup %1205 }
 0x238   : > { %v952_v49 = vsel %vm939_vm6, %v1206_v36, 0.0 }
 0x239   : > { %953 = vadd.xlane.f32.xlu1 %v952_v49 }
 0x2be   : > { %v951_v50 = vpop.xlane.xlu0 %950 }
 0x2bf   : > { %1207 = vrcp.f32 %v951_v50 }
 0x2c2   : > { %v954_v51 = vpop.xlane.xlu1 %953 }
 0x2c3   : > { %1209 = vrcp.f32 %v954_v51 }
 0x2cc   : > { %v1208_v52 = vpop.eup %1207 }
 0x2cd   : > { %v956_v43 = vmul.f32 %v1208_v52, %v1204_v46 }
 0x2cf   : > { %1191 = vmatprep.mubr.msk.f32.mxu0 %vm935_vm4, %v956_v43 }
 0x2d0   : > { %v1210_v53 = vpop.eup %1209 }
 0x2d1   : > { %v958_v12 = vmul.f32 %v1210_v53, %v1206_v36 }
 0x2d3   : > { %1192 = vmatmul.mubr.msk.f32.vlgmr.msra.gmra.mxu0 %vm935_vm4, %v958_v12 }
 0x393   : > { %v1193_v55 = vpop.f32.mrf.mxu0 }
 0x394   : > { %v1048_v56 = vadd.f32 %v1193_v55, %v1140_v54 }
 0x395   : > { %v1042_v57 = vpop.f32.mrf.mxu0 }
 0x396   : > { %v1052_v58 = vmax.f32 %v1048_v56, 0.0  ;;  %v1043_v14 = vadd.f32 %v1140_v54, %v1042_v57 }
 0x398   : > { %1054 = vst.msk [vmem:[%s325_s19 + $0x8] sm:$0x3] %vm740_vm2, %v1052_v58  ;;  %v1051_v59 = vmax.f32 %v1043_v14, 0.0 }
 0x39a   : > { %1053 = vst.msk [vmem:[%s325_s19] sm:$0xff] %vm339_vm0, %v1051_v59 }
 0x39b PF: > { %s18_s27 = sadd.s32 1, %s1217_s27  }
 0x39c   : > { %p15_p4 = scmp.ge.s32.totalorder %s18_s27, 4  }
 0x39e   :  { %17 = sbr.rel (!%p15_p4) target bundleno = 1 (0x1), region = 85 }

// kernel: forward.7
= control target key start
LH: loop header
LB: loop body
LE: loop exit
PB: predicated region body
PF: predicated region fallthrough
CT: control target
= control target key end

     0   :  { %v5963_v0 = vmov 0.0   ;;  %vm80_vm0 = vcmask 261120   ;;  %vm4915_vm1 = vmmov 0   ;;  %vm319_vm2 = vcmask 64512   ;;  %s5929_s7 = inlined_call_operand.vmem [shape: f32[4,32,8], index: 7, kind: input, shape index: {}]   ;;  %s5930_s5 = inlined_call_operand.vmem [shape: f32[4,32,8], index: 5, kind: input, shape index: {}]   ;;  %s5931_s1 = inlined_call_operand.vmem [shape: f32[2,6,32], index: 1, kind: input, shape index: {}]   ;;  %s5932_s0 = inlined_call_operand.vmem [shape: f32[2,5,32], index: 0, kind: input, shape index: {}]   ;;  %s5933_s9 = inlined_call_operand.vmem [shape: f32[4,32,8], index: 9, kind: input, shape index: {}]   ;;  %s5934_s8 = inlined_call_operand.vmem [shape: f32[4,1,8], index: 8, kind: input, shape index: {}]   ;;  %s5935_s6 = inlined_call_operand.vmem [shape: f32[4,1,8], index: 6, kind: input, shape index: {}]   ;;  %s5936_s4 = inlined_call_operand.vmem [shape: f32[2,1,6], index: 4, kind: input, shape index: {}]   ;;  %s5937_s10 = inlined_call_operand.vmem [shape: f32[4,1,8], index: 10, kind: input, shape index: {}]   ;;  %s5938_s11 = inlined_call_operand.vmem [shape: f32[4,8,32], index: 11, kind: input, shape index: {}]   ;;  %s5939_s12 = inlined_call_operand.vmem [shape: f32[1,32], index: 12, kind: input, shape index: {}]   ;;  %s5940_s13 = inlined_call_operand.vmem [shape: f32[1,32], index: 13, kind: input, shape index: {}]   ;;  %s5941_s14 = inlined_call_operand.<no memory space> [shape: f32[1,1], index: 14, kind: input, shape index: {}]   ;;  %s5942_s2 = inlined_call_operand.vmem [shape: f32[2,5,1], index: 2, kind: input, shape index: {}]   ;;  %s5943_s3 = inlined_call_operand.vmem [shape: f32[2,6,1], index: 3, kind: input, shape index: {}]   ;;  %s5944_s15 = inlined_call_operand.vmem [shape: f32[1,32], index: 15, kind: input, shape index: {}]   ;;  %s5945_s17 = inlined_call_operand.vmem [shape: f32[1,32], index: 17, kind: input, shape index: {}]   ;;  %s5946_s16 = inlined_call_operand.vmem [shape: f32[1,32], index: 16, kind: input, shape index: {}]   ;;  %s5947_s18 = inlined_call_operand.vmem [shape: f32[1,32], index: 18, kind: input, shape index: {}]   ;;  %s5948_s19 = inlined_call_operand.vmem [shape: f32[2,5,32], index: 19, kind: output, shape index: {0}]   ;;  %s5949_s20 = inlined_call_operand.vmem [shape: f32[2,6,32], index: 20, kind: output, shape index: {1}]  }
   0x1   :  { %5968 = sst [smem:[#allocation14_spill]] %s5929_s7  ;;  %4474 = vmatprep.subr.mxu1 %v5963_v0  ;;  %4463 = vmatprep.subr.mxu0 %v5963_v0  ;;  %v5137_v15 = vld [vmem:[%s5934_s8] ss:$0 sm:$0xff]  ;;  %vm404_vm3 = vcmask 45056   ;;  %vm423_vm4 = vcmask 1045504   ;;  %vm419_vm5 = vcmask 48128  }
   0x2   :  { %5969 = sst [smem:[#allocation15_spill]] %s5930_s5  ;;  %4482 = vmatprep.mubr.msk.f32.mxu1 %vm4915_vm1, %v5963_v0  ;;  %4471 = vmatprep.mubr.msk.f32.mxu0 %vm4915_vm1, %v5963_v0  ;;  %v5142_v16 = vld [vmem:[%s5935_s6] ss:$0 sm:$0xff]  ;;  %v5269_v62 = vld [vmem:[%s5934_s8 + $0x1] ss:$0 sm:$0xff]  ;;  %vm2073_vm6 = vcmask 258048  }
   0x3   :  { %5970 = sst [smem:[#allocation16_spill]] %s5931_s1  ;;  %v5154_v24 = vld [vmem:[%s5936_s4] ss:$0 sm:$0xff]  ;;  %v5274_v63 = vld [vmem:[%s5935_s6 + $0x1] ss:$0 sm:$0xff]  ;;  %vm2119_vm7 = vcmask 259072  }
   0x4   :  { %5971 = sst [smem:[#allocation17_spill]] %s5932_s0  ;;  %v5161_v30 = vld [vmem:[%s5937_s10] ss:$0 sm:$0xff] }
   0x5   :  { %5972 = sst [smem:[#allocation18_spill]] %s5933_s9 }
   0x6   :  { %s5973_s23 = sld [smem:[#allocation14_spill]] }
   0x7   :  { %s5974_s25 = sld [smem:[#allocation15_spill]] }
   0x8   :  { %s5975_s26 = sld [smem:[#allocation16_spill]] }
   0x9   :  { %s5976_s9 = sld [smem:[#allocation17_spill]] }
   0xa   :  { %s5977_s7 = sld [smem:[#allocation18_spill]] }
   0xc   :  { %v5027_v1 = vld [vmem:[%s5973_s23 + $0x18] sm:$0xff]  ;;  %v5037_v3 = vld [vmem:[%s5973_s23 + $0x10] sm:$0xff]  ;;  %v5051_v5 = vld [vmem:[%s5973_s23 + $0x8] sm:$0xff] }
   0xd   :  { %v5032_v2 = vld [vmem:[%s5974_s25 + $0x18] sm:$0xff]  ;;  %4475 = vmatpush3.msra.mxu1 %v5027_v1  ;;  %v5044_v4 = vld [vmem:[%s5974_s25 + $0x10] sm:$0xff]  ;;  %v5056_v6 = vld [vmem:[%s5974_s25 + $0x8] sm:$0xff] }
   0xe   :  { %4464 = vmatpush3.msra.mxu0 %v5032_v2  ;;  %4476 = vmatprep.subr.mxu1 %v5963_v0  ;;  %v5065_v7 = vld [vmem:[%s5973_s23] sm:$0xff]  ;;  %v5169_v33 = vld [vmem:[%s5974_s25 + $0x38] sm:$0xff]  ;;  %v5176_v34 = vld [vmem:[%s5974_s25 + $0x30] sm:$0xff] }
   0xf   :  { %4465 = vmatprep.subr.mxu0 %v5963_v0  ;;  %4477 = vmatpush3.msra.mxu1 %v5037_v3  ;;  %v5072_v8 = vld [vmem:[%s5974_s25] sm:$0xff]  ;;  %v5183_v35 = vld [vmem:[%s5974_s25 + $0x28] sm:$0xff]  ;;  %v5201_v41 = vld [vmem:[%s5973_s23 + $0x38] sm:$0xff] }
  0x10   :  { %4466 = vmatpush3.msra.mxu0 %v5044_v4  ;;  %4478 = vmatprep.subr.mxu1 %v5963_v0  ;;  %v5079_v9 = vld [vmem:[%s5975_s26] sm:$0x3f]  ;;  %v5105_v11 = vld [vmem:[%s5977_s7 + $0x18] sm:$0xff]  ;;  %v5110_v12 = vld [vmem:[%s5977_s7 + $0x10] sm:$0xff] }
  0x11   :  { %4467 = vmatprep.subr.mxu0 %v5963_v0  ;;  %4479 = vmatpush3.msra.mxu1 %v5051_v5  ;;  %v5084_v10 = vld [vmem:[%s5976_s9] sm:$0x1f]  ;;  %v5117_v13 = vld [vmem:[%s5977_s7 + $0x8] sm:$0xff]  ;;  %v5208_v44 = vld [vmem:[%s5973_s23 + $0x30] sm:$0xff] }
  0x12   :  { %4468 = vmatpush3.msra.mxu0 %v5056_v6  ;;  %4480 = vmatprep.subr.mxu1 %v5963_v0  ;;  %v5124_v14 = vld [vmem:[%s5977_s7] sm:$0xff]  ;;  %v5215_v45 = vld [vmem:[%s5973_s23 + $0x28] sm:$0xff]  ;;  %v5237_v49 = vld [vmem:[%s5977_s7 + $0x38] sm:$0xff] }
  0x13   :  { %4469 = vmatprep.subr.mxu0 %v5963_v0  ;;  %4481 = vmatpush3.msra.mxu1 %v5065_v7  ;;  %v5190_v36 = vld [vmem:[%s5974_s25 + $0x20] sm:$0xff]  ;;  %v5242_v50 = vld [vmem:[%s5977_s7 + $0x30] sm:$0xff]  ;;  %v5249_v51 = vld [vmem:[%s5977_s7 + $0x28] sm:$0xff] }
  0x14   :  { %4470 = vmatpush3.msra.mxu0 %v5072_v8  ;;  %4483 = vmatmul.mubr.msk.f32.vlgmr.msra.gmra.mxu1 %vm80_vm0, %v5079_v9  ;;  %v5224_v46 = vld [vmem:[%s5973_s23 + $0x20] sm:$0xff] }
  0x15   :  { %4472 = vmatmul.mubr.msk.f32.vlgmr.msra.gmra.mxu0 %vm80_vm0, %v5084_v10  ;;  %4496 = vmatprep.subr.mxu1 %v5963_v0  ;;  %v5256_v52 = vld [vmem:[%s5977_s7 + $0x20] sm:$0xff] }
  0x16   :  { %4498 = vmatprep.mubr.msk.f32.mxu1 %vm4915_vm1, %v5963_v0  ;;  %4485 = vmatprep.subr.mxu0 %v5963_v0 }
  0x17   :  { %4493 = vmatprep.mubr.msk.f32.mxu0 %vm4915_vm1, %v5963_v0  ;;  %4486 = vmatpush3.msra.mxu0 %v5105_v11 }
  0x18   :  { %4487 = vmatprep.subr.mxu0 %v5963_v0 }
  0x19   :  { %4488 = vmatpush3.msra.mxu0 %v5110_v12 }
  0x1a   :  { %4489 = vmatprep.subr.mxu0 %v5963_v0 }
  0x1b   :  { %4490 = vmatpush3.msra.mxu0 %v5117_v13 }
  0x1c   :  { %4491 = vmatprep.subr.mxu0 %v5963_v0 }
  0x1d   :  { %4492 = vmatpush3.msra.mxu0 %v5124_v14 }
  0x1e   :  { %4494 = vmatmul.mubr.msk.f32.vlgmr.msra.gmra.mxu0 %vm80_vm0, %v5079_v9  ;;  %4506 = vmatprep.subr.mxu0 %v5963_v0 }
  0x1f   :  { %4514 = vmatprep.mubr.msk.f32.mxu0 %vm4915_vm1, %v5963_v0  ;;  %4507 = vmatpush3.msra.mxu0 %v5169_v33 }
  0x20   :  { %4508 = vmatprep.subr.mxu0 %v5963_v0 }
  0x21   :  { %4509 = vmatpush3.msra.mxu0 %v5176_v34 }
  0x22   :  { %4510 = vmatprep.subr.mxu0 %v5963_v0 }
  0x23   :  { %4511 = vmatpush3.msra.mxu0 %v5183_v35 }
  0x24   :  { %4512 = vmatprep.subr.mxu0 %v5963_v0 }
  0x25   :  { %4513 = vmatpush3.msra.mxu0 %v5190_v36 }
  0x26   :  { %4515 = vmatmul.mubr.msk.f32.vlgmr.msra.gmra.mxu0 %vm80_vm0, %v5084_v10  ;;  %4528 = vmatprep.subr.mxu0 %v5963_v0 }
  0x27   :  { %4536 = vmatprep.mubr.msk.f32.mxu0 %vm4915_vm1, %v5963_v0  ;;  %4529 = vmatpush3.msra.mxu0 %v5237_v49 }
  0x28   :  { %4530 = vmatprep.subr.mxu0 %v5963_v0 }
  0x29   :  { %4531 = vmatpush3.msra.mxu0 %v5242_v50 }
  0x2a   :  { %4532 = vmatprep.subr.mxu0 %v5963_v0 }
  0x2b   :  { %4533 = vmatpush3.msra.mxu0 %v5249_v51 }
  0x2c   :  { %4534 = vmatprep.subr.mxu0 %v5963_v0 }
  0x2d   :  { %4535 = vmatpush3.msra.mxu0 %v5256_v52 }
  0x2e   :  { %4537 = vmatmul.mubr.msk.f32.vlgmr.msra.gmra.mxu0 %vm80_vm0, %v5079_v9  ;;  %4549 = vmatprep.subr.mxu0 %v5963_v0 }
  0x2f   :  { %4551 = vmatprep.mubr.msk.f32.mxu0 %vm4915_vm1, %v5963_v0 }
  0xd4   :  { %v234_v17 = vpop.f32.mrf.mxu1 }
  0xd5   :  { %v150_v18 = vpop.f32.mrf.mxu0  ;;  %v235_v19 = vadd.f32 %v5137_v15, %v234_v17 }
  0xd6   :  { %v151_v20 = vadd.f32 %v5142_v16, %v150_v18  ;;  %v4484_v21 = vpop.f32.mrf.mxu1 }
  0xd7   :  { %v4473_v22 = vpop.f32.mrf.mxu0  ;;  %4497 = vmatpush3.xpose.msk.msra.mxu1 %vm319_vm2, %v235_v19 }
  0xd8   :  { %4501 = vmatprep.subr.mxu1 %v5963_v0 }
  0xda   :  { %4499 = vmatmul.mubr.msk.f32.vlgmr.msra.gmra.mxu1 %vm319_vm2, %v151_v20 }
  0xdb   :  { %4503 = vmatprep.mubr.msk.f32.mxu1 %vm4915_vm1, %v5963_v0 }
  0xde   :  { %v315_v29 = vpop.f32.mrf.mxu0 }
  0xdf   :  { %v316_v31 = vadd.f32 %v5161_v30, %v315_v29 }
  0xe0   :  { %v4495_v32 = vpop.f32.mrf.mxu0 }
  0xe1   :  { %4502 = vmatpush3.msk.msra.mxu1 %vm423_vm4, %v316_v31 }
  0xe2   :  { %4517 = vmatprep.subr.mxu1 %v5963_v0 }
  0xe6   :  { %v579_v47 = vpop.f32.mrf.mxu0 }
  0xe7   :  { %v580_v19 = vadd.f32 %v5274_v63, %v579_v47  ;;  %v5310_v47 = vld [vmem:[%s5973_s23 + $0x58] sm:$0xff] }
  0xe8   :  { %v4516_v48 = vpop.f32.mrf.mxu0 }
  0xe9   :  { %v5317_v48 = vld [vmem:[%s5973_s23 + $0x50] sm:$0xff] }
 0x19a   :  { %v392_v23 = vpop.f32.mrf.mxu1 }
 0x19b   :  { %v396_v25 = vmul.f32 0.35355338, %v392_v23 }
 0x19c   :  { %v4500_v26 = vpop.f32.mrf.mxu1 }
 0x19d   :  { %v403_v27 = vadd.f32 %v5154_v24, %v396_v25 }
 0x19f   :  { %v405_v28 = vsel %vm404_vm3, %v403_v27, -inf }
 0x1a0   :  { %406 = vmax.xlane.f32.xlu0 %v405_v28  ;;  %v745_v28 = vpop.f32.mrf.mxu0 }
 0x1a2   :  { %v4538_v31 = vpop.f32.mrf.mxu0 }
 0x229   :  { %v407_v37 = vpop.xlane.xlu0 %406 }
 0x22a   :  { %v408_v38 = vmax.f32 %v407_v37, 0.0 }
 0x22c   :  { %v409_v39 = vsub.f32 %v403_v27, %v408_v38  ;;  %v415_v53 = vsub.f32 0.0, %v408_v38  ;;  %v5288_v27 = vld [vmem:[%s5937_s10 + $0x1] ss:$0 sm:$0xff] }
 0x22d   :  { %v746_v29 = vadd.f32 %v5288_v27, %v745_v28  ;;  %v5386_v28 = vld [vmem:[%s5934_s8 + $0x2] ss:$0 sm:$0xff] }
 0x22e   :  { %v410_v40 = vmul.f32 1.442695, %v409_v39  ;;  %v416_v54 = vmul.f32 1.442695, %v415_v53  ;;  %v5322_v53 = vld [vmem:[%s5938_s11 + $0x8] sm:$0xff] }
 0x22f   :  { %4550 = vmatpush3.msra.mxu0 %v5322_v53 }
 0x230   :  { %4852 = vpow2.f32 %v410_v40  ;;  %v5296_v40 = vld [vmem:[%s5938_s11] sm:$0xff]  ;;  %4559 = vmatprep.subr.mxu0 %v5963_v0 }
 0x231   :  { %4854 = vpow2.f32 %v416_v54  ;;  %v5330_v54 = vld [vmem:[%s5973_s23 + $0x48] sm:$0xff] }
 0x23d   :  { %v4853_v42 = vpop.eup %4852 }
 0x23e   :  { %4504 = vmatmul.mubr.msk.f32.vlgmr.msra.gmra.mxu1 %vm419_vm5, %v4853_v42  ;;  %v412_v43 = vsel %vm404_vm3, %v4853_v42, 0.0  ;;  %v4855_v56 = vpop.eup %4854 }
 0x23f   :  { %4518 = vmatpush3.msra.mxu1 %v5201_v41  ;;  %413 = vadd.xlane.f32.xlu1 %v412_v43 }
 0x240   :  { %4519 = vmatprep.subr.mxu1 %v5963_v0  ;;  %4525 = vmatprep.mubr.msk.f32.mxu1 %vm4915_vm1, %v5963_v0 }
 0x241   :  { %4520 = vmatpush3.msra.mxu1 %v5208_v44 }
 0x242   :  { %4521 = vmatprep.subr.mxu1 %v5963_v0 }
 0x243   :  { %4522 = vmatpush3.msra.mxu1 %v5215_v45 }
 0x244   :  { %4523 = vmatprep.subr.mxu1 %v5963_v0 }
 0x245   :  { %4524 = vmatpush3.msra.mxu1 %v5224_v46 }
 0x246   :  { %4526 = vmatmul.mubr.msk.f32.vlgmr.msra.gmra.mxu1 %vm80_vm0, %v5079_v9  ;;  %4539 = vmatprep.subr.mxu1 %v5963_v0 }
 0x247   :  { %4541 = vmatprep.mubr.msk.f32.mxu1 %vm4915_vm1, %v5963_v0 }
 0x2c8   :  { %v414_v55 = vpop.xlane.xlu1 %413 }
 0x2c9   :  { %v418_v57 = vadd.f32 %v4855_v56, %v414_v55  ;;  %v5338_v55 = vld [vmem:[%s5973_s23 + $0x40] sm:$0xff] }
 0x2cb   :  { %4856 = vrcp.f32 %v418_v57 }
 0x2d8   :  { %v4857_v58 = vpop.eup %4856 }
 0x2fe   :  { %v493_v59 = vpop.f32.mrf.mxu1 }
 0x2ff   :  { %v498_v60 = vmul.f32 %v4857_v58, %v493_v59 }
 0x300   :  { %v4505_v61 = vpop.f32.mrf.mxu1 }
 0x306   :  { %v662_v17 = vpop.f32.mrf.mxu1 }
 0x307   :  { %v663_v18 = vadd.f32 %v5269_v62, %v662_v17 }
 0x308   :  { %v4527_v20 = vpop.f32.mrf.mxu1 }
 0x309   :  { %4540 = vmatpush3.xpose.msk.msra.mxu1 %vm319_vm2, %v663_v18 }
 0x30a   :  { %4544 = vmatprep.subr.mxu1 %v5963_v0 }
 0x30c   :  { %4542 = vmatmul.mubr.msk.f32.vlgmr.msra.gmra.mxu1 %vm319_vm2, %v580_v19  ;;  %v5349_v19 = vld [vmem:[%s5974_s25 + $0x58] sm:$0xff] }
 0x30d   :  { %4546 = vmatprep.mubr.msk.f32.mxu1 %vm4915_vm1, %v5963_v0  ;;  %4545 = vmatpush3.msk.msra.mxu1 %vm423_vm4, %v746_v29 }
 0x30e   :  { %4554 = vmatprep.subr.mxu1 %v5963_v0 }
 0x3cc   :  { %v821_v21 = vpop.f32.mrf.mxu1 }
 0x3cd   :  { %v825_v22 = vmul.f32 0.35355338, %v821_v21  ;;  %v5355_v21 = vld [vmem:[%s5974_s25 + $0x50] sm:$0xff] }
 0x3ce   :  { %v4543_v23 = vpop.f32.mrf.mxu1 }
 0x3cf   :  { %v826_v25 = vadd.f32 %v5154_v24, %v825_v22  ;;  %v5366_v23 = vld [vmem:[%s5974_s25 + $0x48] sm:$0xff] }
 0x3d1   :  { %v827_v26 = vsel %vm404_vm3, %v826_v25, -inf }
 0x3d2   :  { %828 = vmax.xlane.f32.xlu0 %v827_v26  ;;  %v5373_v26 = vld [vmem:[%s5974_s25 + $0x40] sm:$0xff] }
 0x45b   :  { %v829_v32 = vpop.xlane.xlu0 %828 }
 0x45c   :  { %v830_v37 = vmax.f32 %v829_v32, 0.0 }
 0x45e   :  { %v831_v38 = vsub.f32 %v826_v25, %v830_v37  ;;  %v837_v56 = vsub.f32 0.0, %v830_v37  ;;  %v5394_v37 = vld [vmem:[%s5977_s7 + $0x58] sm:$0xff] }
 0x460   :  { %v832_v39 = vmul.f32 1.442695, %v831_v38  ;;  %v838_v57 = vmul.f32 1.442695, %v837_v56  ;;  %v5399_v38 = vld [vmem:[%s5977_s7 + $0x50] sm:$0xff] }
 0x462   :  { %4858 = vpow2.f32 %v832_v39  ;;  %v5406_v39 = vld [vmem:[%s5977_s7 + $0x48] sm:$0xff] }
 0x463   :  { %4860 = vpow2.f32 %v838_v57  ;;  %v5428_v57 = vld [vmem:[%s5935_s6 + $0x2] ss:$0 sm:$0xff] }
 0x46f   :  { %v4859_v42 = vpop.eup %4858 }
 0x470   :  { %4547 = vmatmul.mubr.msk.f32.vlgmr.msra.gmra.mxu1 %vm419_vm5, %v4859_v42  ;;  %v834_v43 = vsel %vm404_vm3, %v4859_v42, 0.0  ;;  %v4861_v59 = vpop.eup %4860  ;;  %v5413_v42 = vld [vmem:[%s5977_s7 + $0x40] sm:$0xff] }
 0x471   :  { %835 = vadd.xlane.f32.xlu1 %v834_v43  ;;  %4555 = vmatpush3.msra.mxu1 %v5296_v40 }
 0x472   :  { %4556 = vmatprep.mubr.msk.f32.mxu1 %vm4915_vm1, %v5963_v0  ;;  %4570 = vmatprep.subr.mxu1 %v5963_v0 }
 0x474   :  { %4557 = vmatmul.mubr.msk.f32.vlgmr.msra.gmra.mxu1 %vm319_vm2, %v498_v60 }
 0x475   :  { %4578 = vmatprep.mubr.msk.f32.mxu1 %vm4915_vm1, %v5963_v0  ;;  %4571 = vmatpush3.msra.mxu1 %v5310_v47 }
 0x476   :  { %4572 = vmatprep.subr.mxu1 %v5963_v0 }
 0x477   :  { %4573 = vmatpush3.msra.mxu1 %v5317_v48 }
 0x478   :  { %4574 = vmatprep.subr.mxu1 %v5963_v0 }
 0x479   :  { %4575 = vmatpush3.msra.mxu1 %v5330_v54 }
 0x47a   :  { %4576 = vmatprep.subr.mxu1 %v5963_v0 }
 0x47b   :  { %4577 = vmatpush3.msra.mxu1 %v5338_v55 }
 0x47c   :  { %4579 = vmatmul.mubr.msk.f32.vlgmr.msra.gmra.mxu1 %vm80_vm0, %v5079_v9  ;;  %4592 = vmatprep.subr.mxu1 %v5963_v0 }
 0x47d   :  { %4594 = vmatprep.mubr.msk.f32.mxu1 %vm4915_vm1, %v5963_v0 }
 0x4fa   :  { %v836_v58 = vpop.xlane.xlu1 %835 }
 0x4fb   :  { %v840_v60 = vadd.f32 %v4861_v59, %v836_v58 }
 0x4fd   :  { %4862 = vrcp.f32 %v840_v60 }
 0x50a   :  { %v4863_v61 = vpop.eup %4862 }
 0x530   :  { %v913_v17 = vpop.f32.mrf.mxu1 }
 0x531   :  { %v918_v18 = vmul.f32 %v4863_v61, %v913_v17 }
 0x532   :  { %v4548_v20 = vpop.f32.mrf.mxu1 }
 0x533   :  { %4552 = vmatmul.mubr.msk.f32.vlgmr.msra.gmra.mxu0 %vm319_vm2, %v918_v18 }
 0x534   :  { %4560 = vmatpush3.msra.mxu0 %v5349_v19  ;;  %v5358_v22 = vpop.f32.mrf.mxu1  ;;  %4567 = vmatprep.mubr.msk.f32.mxu0 %vm4915_vm1, %v5963_v0 }
 0x535   :  { %4561 = vmatprep.subr.mxu0 %v5963_v0 }
 0x536   :  { %4562 = vmatpush3.msra.mxu0 %v5355_v21  ;;  %v4558_v25 = vpop.f32.mrf.mxu1 }
 0x537   :  { %4563 = vmatprep.subr.mxu0 %v5963_v0 }
 0x538   :  { %4564 = vmatpush3.msra.mxu0 %v5366_v23 }
 0x539   :  { %4565 = vmatprep.subr.mxu0 %v5963_v0 }
 0x53a   :  { %4566 = vmatpush3.msra.mxu0 %v5373_v26 }
 0x53b   :  { %4568 = vmatmul.mubr.msk.f32.vlgmr.msra.gmra.mxu0 %vm80_vm0, %v5084_v10  ;;  %4581 = vmatprep.subr.mxu0 %v5963_v0 }
 0x53c   :  { %4589 = vmatprep.mubr.msk.f32.mxu0 %vm4915_vm1, %v5963_v0  ;;  %v1229_v29 = vpop.f32.mrf.mxu1  ;;  %4582 = vmatpush3.msra.mxu0 %v5394_v37 }
 0x53d   :  { %v1230_v31 = vadd.f32 %v5386_v28, %v1229_v29  ;;  %4583 = vmatprep.subr.mxu0 %v5963_v0  ;;  %v5439_v29 = vld [vmem:[%s5937_s10 + $0x2] ss:$0 sm:$0xff] }
 0x53e   :  { %v4580_v32 = vpop.f32.mrf.mxu1  ;;  %4584 = vmatpush3.msra.mxu0 %v5399_v38 }
 0x53f   :  { %4593 = vmatpush3.xpose.msk.msra.mxu1 %vm319_vm2, %v1230_v31  ;;  %4585 = vmatprep.subr.mxu0 %v5963_v0 }
 0x540   :  { %4597 = vmatprep.subr.mxu1 %v5963_v0  ;;  %4586 = vmatpush3.msra.mxu0 %v5406_v39 }
 0x541   :  { %4587 = vmatprep.subr.mxu0 %v5963_v0 }
 0x542   :  { %4588 = vmatpush3.msra.mxu0 %v5413_v42 }
 0x543   :  { %4590 = vmatmul.mubr.msk.f32.vlgmr.msra.gmra.mxu0 %vm80_vm0, %v5079_v9  ;;  %4602 = vmatprep.subr.mxu0 %v5963_v0 }
 0x544   :  { %4604 = vmatprep.mubr.msk.f32.mxu0 %vm4915_vm1, %v5963_v0 }
 0x5f3   :  { %v5423_v43 = vpop.f32.mrf.mxu0 }
 0x5f5   :  { %v4553_v56 = vpop.f32.mrf.mxu0 }
 0x5fb   :  { %v1146_v58 = vpop.f32.mrf.mxu0 }
 0x5fc   :  { %v1147_v59 = vadd.f32 %v5428_v57, %v1146_v58 }
 0x5fd   :  { %v4569_v60 = vpop.f32.mrf.mxu0 }
 0x5fe   :  { %4595 = vmatmul.mubr.msk.f32.vlgmr.msra.gmra.mxu1 %vm319_vm2, %v1147_v59 }
 0x5ff   :  { %4599 = vmatprep.mubr.msk.f32.mxu1 %vm4915_vm1, %v5963_v0 }
 0x603   :  { %v1312_v31 = vpop.f32.mrf.mxu0 }
 0x604   :  { %v1313_v32 = vadd.f32 %v5439_v29, %v1312_v31  ;;  %v5465_v31 = vld [vmem:[%s5974_s25 + $0x70] sm:$0xff] }
 0x605   :  { %v4591_v56 = vpop.f32.mrf.mxu0  ;;  %5979 = vst [vmem:[#allocation4_spill] sm:$0xff] %v5465_v31 }
 0x606   :  { %4598 = vmatpush3.msk.msra.mxu1 %vm423_vm4, %v1313_v32  ;;  %v5472_v32 = vld [vmem:[%s5974_s25 + $0x68] sm:$0xff]  ;;  %v5479_v56 = vld [vmem:[%s5974_s25 + $0x60] sm:$0xff] }
 0x607   :  { %4607 = vmatprep.subr.mxu1 %v5963_v0  ;;  %5980 = vst [vmem:[#allocation5_spill] sm:$0xff] %v5472_v32  ;;  %5981 = vst [vmem:[#allocation6_spill] sm:$0xff] %v5479_v56 }
 0x6be   :  { %v1388_v61 = vpop.f32.mrf.mxu1 }
 0x6bf   :  { %v1392_v17 = vmul.f32 0.35355338, %v1388_v61 }
 0x6c0   :  { %v4596_v18 = vpop.f32.mrf.mxu1 }
 0x6c1   :  { %v1393_v20 = vadd.f32 %v5154_v24, %v1392_v17 }
 0x6c3   :  { %v1394_v25 = vsel %vm404_vm3, %v1393_v20, -inf }
 0x6c4   :  { %1395 = vmax.xlane.f32.xlu0 %v1394_v25  ;;  %v5451_v25 = vld [vmem:[%s5938_s11 + $0x10] sm:$0xff] }
 0x6c5   :  { %4603 = vmatpush3.msra.mxu0 %v5451_v25 }
 0x6c6   :  { %4618 = vmatprep.subr.mxu0 %v5963_v0 }
 0x74d   :  { %v1396_v58 = vpop.xlane.xlu0 %1395 }
 0x74e   :  { %v1397_v59 = vmax.f32 %v1396_v58, 0.0 }
 0x750   :  { %v1398_v60 = vsub.f32 %v1393_v20, %v1397_v59  ;;  %v5458_v20 = vld [vmem:[%s5974_s25 + $0x78] sm:$0xff]  ;;  %v1404_v58 = vsub.f32 0.0, %v1397_v59  ;;  %v5496_v59 = vld [vmem:[%s5973_s23 + $0x70] sm:$0xff] }
 0x751   :  { %5978 = vst [vmem:[#allocation3_spill] sm:$0xff] %v5458_v20  ;;  %5983 = vst [vmem:[#allocation8_spill] sm:$0xff] %v5496_v59 }
 0x752   :  { %v1399_v61 = vmul.f32 1.442695, %v1398_v60  ;;  %v1405_v60 = vmul.f32 1.442695, %v1404_v58 }
 0x754   :  { %4864 = vpow2.f32 %v1399_v61 }
 0x755   :  { %4866 = vpow2.f32 %v1405_v60  ;;  %v5525_v60 = vld [vmem:[%s5977_s7 + $0x78] sm:$0xff] }
 0x761   :  { %v4865_v17 = vpop.eup %4864 }
 0x762   :  { %4600 = vmatmul.mubr.msk.f32.vlgmr.msra.gmra.mxu1 %vm419_vm5, %v4865_v17  ;;  %v1401_v18 = vsel %vm404_vm3, %v4865_v17, 0.0  ;;  %v4867_v17 = vpop.eup %4866 }
 0x763   :  { %1402 = vadd.xlane.f32.xlu1 %v1401_v18  ;;  %4615 = vmatprep.mubr.msk.f32.mxu1 %vm4915_vm1, %v5963_v0 }
 0x764   :  { %4608 = vmatpush3.msra.mxu1 %v5458_v20 }
 0x765   :  { %4609 = vmatprep.subr.mxu1 %v5963_v0 }
 0x766   :  { %4610 = vmatpush3.msra.mxu1 %v5465_v31 }
 0x767   :  { %4611 = vmatprep.subr.mxu1 %v5963_v0 }
 0x768   :  { %4612 = vmatpush3.msra.mxu1 %v5472_v32 }
 0x769   :  { %4613 = vmatprep.subr.mxu1 %v5963_v0 }
 0x76a   :  { %4614 = vmatpush3.msra.mxu1 %v5479_v56  ;;  %v5490_v56 = vld [vmem:[%s5973_s23 + $0x78] sm:$0xff] }
 0x76b   :  { %4616 = vmatmul.mubr.msk.f32.vlgmr.msra.gmra.mxu1 %vm80_vm0, %v5084_v10  ;;  %4629 = vmatprep.subr.mxu1 %v5963_v0  ;;  %5982 = vst [vmem:[#allocation7_spill] sm:$0xff] %v5490_v56 }
 0x76c   :  { %4637 = vmatprep.mubr.msk.f32.mxu1 %vm4915_vm1, %v5963_v0  ;;  %4630 = vmatpush3.msra.mxu1 %v5525_v60 }
 0x76d   :  { %4631 = vmatprep.subr.mxu1 %v5963_v0 }
 0x7ec   :  { %v1403_v61 = vpop.xlane.xlu1 %1402 }
 0x7ed   :  { %v1407_v18 = vadd.f32 %v4867_v17, %v1403_v61  ;;  %v5530_v61 = vld [vmem:[%s5977_s7 + $0x70] sm:$0xff]  ;;  %v5537_v17 = vld [vmem:[%s5977_s7 + $0x68] sm:$0xff] }
 0x7ee   :  { %5986 = vst [vmem:[#allocation11_spill] sm:$0xff] %v5530_v61  ;;  %5987 = vst [vmem:[#allocation12_spill] sm:$0xff] %v5537_v17  ;;  %4632 = vmatpush3.msra.mxu1 %v5530_v61 }
 0x7ef   :  { %4868 = vrcp.f32 %v1407_v18  ;;  %4633 = vmatprep.subr.mxu1 %v5963_v0  ;;  %v5544_v18 = vld [vmem:[%s5977_s7 + $0x60] sm:$0xff] }
 0x7f0   :  { %5988 = vst [vmem:[#allocation13_spill] sm:$0xff] %v5544_v18  ;;  %4634 = vmatpush3.msra.mxu1 %v5537_v17 }
 0x7f1   :  { %4635 = vmatprep.subr.mxu1 %v5963_v0 }
 0x7f2   :  { %4636 = vmatpush3.msra.mxu1 %v5544_v18 }
 0x7f3   :  { %4638 = vmatmul.mubr.msk.f32.vlgmr.msra.gmra.mxu1 %vm80_vm0, %v5079_v9  ;;  %4650 = vmatprep.subr.mxu1 %v5963_v0 }
 0x7f4   :  { %4652 = vmatprep.mubr.msk.f32.mxu1 %vm4915_vm1, %v5963_v0 }
 0x7fc   :  { %v4869_v32 = vpop.eup %4868 }
 0x822   :  { %v1480_v31 = vpop.f32.mrf.mxu1 }
 0x823   :  { %v1485_v20 = vmul.f32 %v4869_v32, %v1480_v31  ;;  %v5505_v31 = vld [vmem:[%s5973_s23 + $0x68] sm:$0xff] }
 0x824   :  { %v4601_v10 = vpop.f32.mrf.mxu1  ;;  %5984 = vst [vmem:[#allocation9_spill] sm:$0xff] %v5505_v31 }
 0x825   :  { %4605 = vmatmul.mubr.msk.f32.vlgmr.msra.gmra.mxu0 %vm319_vm2, %v1485_v20  ;;  %v5512_v20 = vld [vmem:[%s5973_s23 + $0x60] sm:$0xff]  ;;  %v1064_v10 = vadd.f32 %v5358_v22, %v5423_v43  ;;  %v5989_v43 = vmov 0.0  }
 0x826   :  { %4619 = vmatpush3.msra.mxu0 %v5490_v56  ;;  %4626 = vmatprep.mubr.msk.f32.mxu0 %vm4915_vm1, %v5963_v0  ;;  %5985 = vst [vmem:[#allocation10_spill] sm:$0xff] %v5512_v20 }
 0x827   :  { %4620 = vmatprep.subr.mxu0 %v5963_v0 }
 0x828   :  { %4621 = vmatpush3.msra.mxu0 %v5496_v59  ;;  %v5561_v59 = vld [vmem:[%s5934_s8 + $0x3] ss:$0 sm:$0xff] }
 0x829   :  { %4622 = vmatprep.subr.mxu0 %v5963_v0 }
 0x82a   :  { %4623 = vmatpush3.msra.mxu0 %v5505_v31 }
 0x82b   :  { %4624 = vmatprep.subr.mxu0 %v5963_v0  ;;  %v1641_v32 = vpop.f32.mrf.mxu1 }
 0x82c   :  { %4625 = vmatpush3.msra.mxu0 %v5512_v20 }
 0x82d   :  { %4627 = vmatmul.mubr.msk.f32.vlgmr.msra.gmra.mxu0 %vm80_vm0, %v5079_v9  ;;  %4640 = vmatprep.subr.mxu0 %v5963_v0  ;;  %v4617_v58 = vpop.f32.mrf.mxu1  ;;  %v5566_v9 = vld [vmem:[%s5935_s6 + $0x3] ss:$0 sm:$0xff] }
 0x82e   :  { %4642 = vmatprep.mubr.msk.f32.mxu0 %vm4915_vm1, %v5963_v0  ;;  %v1642_v18 = vadd.f32 %v5566_v9, %v1641_v32 }
 0x8e5   :  { %v1557_v58 = vpop.f32.mrf.mxu0 }
 0x8e6   :  { %v5556_v20 = vadd.f32 %v1557_v58, %v1064_v10 }
 0x8e7   :  { %v4606_v31 = vpop.f32.mrf.mxu0 }
 0x8ed   :  { %v1724_v56 = vpop.f32.mrf.mxu0 }
 0x8ee   :  { %v1725_v0 = vadd.f32 %v5561_v59, %v1724_v56  ;;  %v5580_v56 = vld [vmem:[%s5937_s10 + $0x3] ss:$0 sm:$0xff] }
 0x8ef   :  { %v4628_v22 = vpop.f32.mrf.mxu0 }
 0x8f0   :  { %4641 = vmatpush3.xpose.msk.msra.mxu0 %vm319_vm2, %v1725_v0  ;;  %v1807_v0 = vpop.f32.mrf.mxu1 }
 0x8f1   :  { %4645 = vmatprep.subr.mxu0 %v5989_v43  ;;  %v1808_v32 = vadd.f32 %v5580_v56, %v1807_v0 }
 0x8f3   :  { %4643 = vmatmul.mubr.msk.f32.vlgmr.msra.gmra.mxu0 %vm319_vm2, %v1642_v18  ;;  %v4639_v18 = vpop.f32.mrf.mxu1 }
 0x8f4   :  { %4647 = vmatprep.mubr.msk.f32.mxu0 %vm4915_vm1, %v5989_v43  ;;  %4646 = vmatpush3.msk.msra.mxu0 %vm423_vm4, %v1808_v32 }
 0x8f5   :  { %4655 = vmatprep.subr.mxu0 %v5989_v43 }
 0x9b3   :  { %v1883_v31 = vpop.f32.mrf.mxu0 }
 0x9b4   :  { %v1887_v10 = vmul.f32 0.35355338, %v1883_v31 }
 0x9b5   :  { %v4644_v58 = vpop.f32.mrf.mxu0 }
 0x9b6   :  { %v1888_v17 = vadd.f32 %v5154_v24, %v1887_v10 }
 0x9b8   :  { %v1889_v61 = vsel %vm404_vm3, %v1888_v17, -inf }
 0x9b9   :  { %1890 = vmax.xlane.f32.xlu0 %v1889_v61 }
 0xa42   :  { %v1891_v22 = vpop.xlane.xlu0 %1890 }
 0xa43   :  { %v1892_v31 = vmax.f32 %v1891_v22, 0.0 }
 0xa45   :  { %v1893_v58 = vsub.f32 %v1888_v17, %v1892_v31 }
 0xa47   :  { %v1894_v24 = vmul.f32 1.442695, %v1893_v58 }
 0xa49   :  { %4870 = vpow2.f32 %v1894_v24 }
 0xa56   :  { %v4871_v10 = vpop.eup %4870 }
 0xa57   :  { %4648 = vmatmul.mubr.msk.f32.vlgmr.msra.gmra.mxu0 %vm419_vm5, %v4871_v10  ;;  %v1896_v61 = vsel %vm404_vm3, %v4871_v10, 0.0 }
 0xa58   :  { %1897 = vadd.xlane.f32.xlu1 %v1896_v61  ;;  %4656 = vmatpush3.msra.mxu0 %v5032_v2  ;;  %v5600_v2 = vld [vmem:[%s5938_s11 + $0x18] sm:$0xff] }
 0xa59   :  { %4657 = vmatprep.subr.mxu0 %v5989_v43  ;;  %4663 = vmatprep.mubr.msk.f32.mxu0 %vm4915_vm1, %v5989_v43 }
 0xa5a   :  { %4658 = vmatpush3.msra.mxu0 %v5044_v4  ;;  %4651 = vmatpush3.msra.mxu1 %v5600_v2  ;;  %v5607_v4 = vld [vmem:[%s5976_s9 + $0x8] sm:$0x1f] }
 0xa5b   :  { %4659 = vmatprep.subr.mxu0 %v5989_v43  ;;  %4666 = vmatprep.subr.mxu1 %v5989_v43 }
 0xa5c   :  { %4660 = vmatpush3.msra.mxu0 %v5056_v6  ;;  %v5622_v6 = vld [vmem:[%s5975_s26 + $0x8] sm:$0x3f] }
 0xa5d   :  { %4661 = vmatprep.subr.mxu0 %v5989_v43 }
 0xa5e   :  { %4662 = vmatpush3.msra.mxu0 %v5072_v8  ;;  %v1899_v8 = vsub.f32 0.0, %v1892_v31 }
 0xa5f   :  { %4677 = vmatprep.subr.mxu0 %v5989_v43  ;;  %4664 = vmatmul.mubr.msk.f32.vlgmr.msra.gmra.mxu0 %vm80_vm0, %v5607_v4 }
 0xa60   :  { %4678 = vmatpush3.msra.mxu0 %v5105_v11  ;;  %4685 = vmatprep.mubr.msk.f32.mxu0 %vm4915_vm1, %v5989_v43  ;;  %v1900_v11 = vmul.f32 1.442695, %v1899_v8 }
 0xa61   :  { %4679 = vmatprep.subr.mxu0 %v5989_v43 }
 0xa62   :  { %4680 = vmatpush3.msra.mxu0 %v5110_v12  ;;  %4872 = vpow2.f32 %v1900_v11 }
 0xa63   :  { %4681 = vmatprep.subr.mxu0 %v5989_v43 }
 0xa64   :  { %4682 = vmatpush3.msra.mxu0 %v5117_v13 }
 0xa65   :  { %4683 = vmatprep.subr.mxu0 %v5989_v43 }
 0xa66   :  { %4684 = vmatpush3.msra.mxu0 %v5124_v14 }
 0xa67   :  { %4686 = vmatmul.mubr.msk.f32.vlgmr.msra.gmra.mxu0 %vm80_vm0, %v5622_v6  ;;  %4698 = vmatprep.subr.mxu0 %v5989_v43 }
 0xa68   :  { %4699 = vmatpush3.msra.mxu0 %v5169_v33  ;;  %4706 = vmatprep.mubr.msk.f32.mxu0 %vm4915_vm1, %v5989_v43 }
 0xa69   :  { %4700 = vmatprep.subr.mxu0 %v5989_v43 }
 0xa6a   :  { %4701 = vmatpush3.msra.mxu0 %v5176_v34 }
 0xa6b   :  { %4702 = vmatprep.subr.mxu0 %v5989_v43 }
 0xa6c   :  { %4703 = vmatpush3.msra.mxu0 %v5183_v35 }
 0xa6d   :  { %4704 = vmatprep.subr.mxu0 %v5989_v43 }
 0xa6e   :  { %4705 = vmatpush3.msra.mxu0 %v5190_v36 }
 0xa6f   :  { %4707 = vmatmul.mubr.msk.f32.vlgmr.msra.gmra.mxu0 %vm80_vm0, %v5607_v4  ;;  %4720 = vmatprep.subr.mxu0 %v5989_v43  ;;  %v4873_v13 = vpop.eup %4872 }
 0xa70   :  { %4721 = vmatpush3.msra.mxu0 %v5237_v49  ;;  %4728 = vmatprep.mubr.msk.f32.mxu0 %vm4915_vm1, %v5989_v43 }
 0xa71   :  { %4722 = vmatprep.subr.mxu0 %v5989_v43 }
 0xa72   :  { %4723 = vmatpush3.msra.mxu0 %v5242_v50 }
 0xa73   :  { %4724 = vmatprep.subr.mxu0 %v5989_v43 }
 0xa74   :  { %4725 = vmatpush3.msra.mxu0 %v5249_v51 }
 0xa75   :  { %4726 = vmatprep.subr.mxu0 %v5989_v43 }
 0xa76   :  { %4727 = vmatpush3.msra.mxu0 %v5256_v52 }
 0xa77   :  { %4729 = vmatmul.mubr.msk.f32.vlgmr.msra.gmra.mxu0 %vm80_vm0, %v5622_v6  ;;  %4741 = vmatprep.subr.mxu0 %v5989_v43 }
 0xa78   :  { %4742 = vmatpush3.msra.mxu0 %v5322_v53  ;;  %4743 = vmatprep.mubr.msk.f32.mxu0 %vm4915_vm1, %v5989_v43 }
 0xa79   :  { %4751 = vmatprep.subr.mxu0 %v5989_v43 }
 0xae1   :  { %v1898_v12 = vpop.xlane.xlu1 %1897 }
 0xae2   :  { %v1902_v14 = vadd.f32 %v4873_v13, %v1898_v12 }
 0xae4   :  { %4874 = vrcp.f32 %v1902_v14 }
 0xaf1   :  { %v4875_v33 = vpop.eup %4874 }
 0xb17   :  { %v1975_v34 = vpop.f32.mrf.mxu0 }
 0xb18   :  { %v1980_v35 = vmul.f32 %v4875_v33, %v1975_v34 }
 0xb19   :  { %v4649_v36 = vpop.f32.mrf.mxu0 }
 0xb1a   :  { %4653 = vmatmul.mubr.msk.f32.vlgmr.msra.gmra.mxu1 %vm319_vm2, %v1980_v35 }
 0xb1b   :  { %4667 = vmatpush3.msra.mxu1 %v5027_v1  ;;  %4674 = vmatprep.mubr.msk.f32.mxu1 %vm4915_vm1, %v5989_v43 }
 0xb1c   :  { %4668 = vmatprep.subr.mxu1 %v5989_v43 }
 0xb1d   :  { %4669 = vmatpush3.msra.mxu1 %v5037_v3 }
 0xb1e   :  { %4670 = vmatprep.subr.mxu1 %v5989_v43 }
 0xb1f   :  { %4671 = vmatpush3.msra.mxu1 %v5051_v5  ;;  %v2203_v1 = vpop.f32.mrf.mxu0 }
 0xb20   :  { %4672 = vmatprep.subr.mxu1 %v5989_v43 }
 0xb21   :  { %4673 = vmatpush3.msra.mxu1 %v5065_v7  ;;  %v4665_v49 = vpop.f32.mrf.mxu0  ;;  %v2204_v7 = vadd.f32 %v5142_v16, %v2203_v1 }
 0xb22   :  { %4675 = vmatmul.mubr.msk.f32.vlgmr.msra.gmra.mxu1 %vm80_vm0, %v5622_v6  ;;  %4688 = vmatprep.subr.mxu1 %v5989_v43 }
 0xb23   :  { %4690 = vmatprep.mubr.msk.f32.mxu1 %vm4915_vm1, %v5989_v43 }
 0xb27   :  { %v2346_v18 = vpop.f32.mrf.mxu0 }
 0xb28   :  { %v2347_v22 = vadd.f32 %v5161_v30, %v2346_v18 }
 0xb29   :  { %v4687_v31 = vpop.f32.mrf.mxu0 }
 0xb2f   :  { %v2592_v30 = vpop.f32.mrf.mxu0 }
 0xb30   :  { %v2593_v49 = vadd.f32 %v5274_v63, %v2592_v30 }
 0xbda   :  { %v2052_v50 = vpop.f32.mrf.mxu1 }
 0xbdb   :  { %v5672_v3 = vadd.f32 %v2052_v50, %v5556_v20  ;;  %v5684_v20 = vld [vmem:[%s5936_s4 + $0x1] ss:$0 sm:$0xff] }
 0xbdc   :  { %v4654_v51 = vpop.f32.mrf.mxu1 }
 0xbe2   :  { %v2276_v5 = vpop.f32.mrf.mxu1 }
 0xbe3   :  { %v2277_v52 = vadd.f32 %v5137_v15, %v2276_v5 }
 0xbe4   :  { %v4676_v53 = vpop.f32.mrf.mxu1 }
 0xbe5   :  { %4689 = vmatpush3.xpose.msk.msra.mxu1 %vm319_vm2, %v2277_v52 }
 0xbe6   :  { %4693 = vmatprep.subr.mxu1 %v5989_v43 }
 0xbe8   :  { %4691 = vmatmul.mubr.msk.f32.vlgmr.msra.gmra.mxu1 %vm319_vm2, %v2204_v7 }
 0xbe9   :  { %4695 = vmatprep.mubr.msk.f32.mxu1 %vm4915_vm1, %v5989_v43  ;;  %4694 = vmatpush3.msk.msra.mxu1 %vm423_vm4, %v2347_v22 }
 0xbea   :  { %4709 = vmatprep.subr.mxu1 %v5989_v43 }
 0xca8   :  { %v2422_v17 = vpop.f32.mrf.mxu1 }
 0xca9   :  { %v2426_v0 = vmul.f32 0.35355338, %v2422_v17 }
 0xcaa   :  { %v4692_v15 = vpop.f32.mrf.mxu1 }
 0xcab   :  { %v2433_v16 = vadd.f32 %v5684_v20, %v2426_v0 }
 0xcad   :  { %v2434_v32 = vsel %vm404_vm3, %v2433_v16, -inf }
 0xcae   :  { %2435 = vmax.xlane.f32.xlu0 %v2434_v32 }
 0xd37   :  { %v2436_v58 = vpop.xlane.xlu0 %2435 }
 0xd38   :  { %v2437_v24 = vmax.f32 %v2436_v58, 0.0 }
 0xd3a   :  { %v2438_v10 = vsub.f32 %v2433_v16, %v2437_v24  ;;  %v2444_v12 = vsub.f32 0.0, %v2437_v24 }
 0xd3c   :  { %v2439_v61 = vmul.f32 1.442695, %v2438_v10 }
 0xd3e   :  { %4876 = vpow2.f32 %v2439_v61 }
 0xd4b   :  { %v4877_v8 = vpop.eup %4876 }
 0xd4c   :  { %4696 = vmatmul.mubr.msk.f32.vlgmr.msra.gmra.mxu1 %vm419_vm5, %v4877_v8  ;;  %v2441_v11 = vsel %vm404_vm3, %v4877_v8, 0.0 }
 0xd4d   :  { %4710 = vmatpush3.msra.mxu1 %v5201_v41  ;;  %2442 = vadd.xlane.f32.xlu0 %v2441_v11  ;;  %v4708_v41 = vpop.f32.mrf.mxu0 }
 0xd4e   :  { %4711 = vmatprep.subr.mxu1 %v5989_v43  ;;  %4717 = vmatprep.mubr.msk.f32.mxu1 %vm4915_vm1, %v5989_v43 }
 0xd4f   :  { %4712 = vmatpush3.msra.mxu1 %v5208_v44  ;;  %v2445_v44 = vmul.f32 1.442695, %v2444_v12 }
 0xd50   :  { %4713 = vmatprep.subr.mxu1 %v5989_v43 }
 0xd51   :  { %4714 = vmatpush3.msra.mxu1 %v5215_v45  ;;  %4878 = vpow2.f32 %v2445_v44 }
 0xd52   :  { %4715 = vmatprep.subr.mxu1 %v5989_v43 }
 0xd53   :  { %4716 = vmatpush3.msra.mxu1 %v5224_v46 }
 0xd54   :  { %4718 = vmatmul.mubr.msk.f32.vlgmr.msra.gmra.mxu1 %vm80_vm0, %v5622_v6  ;;  %4731 = vmatprep.subr.mxu1 %v5989_v43 }
 0xd55   :  { %4733 = vmatprep.mubr.msk.f32.mxu1 %vm4915_vm1, %v5989_v43 }
 0xd5e   :  { %v4879_v14 = vpop.eup %4878 }
 0xdd6   :  { %v2443_v13 = vpop.xlane.xlu0 %2442 }
 0xdd7   :  { %v2447_v45 = vadd.f32 %v4879_v14, %v2443_v13 }
 0xdd9   :  { %4880 = vrcp.f32 %v2447_v45 }
 0xde6   :  { %v4881_v33 = vpop.eup %4880 }
 0xe0c   :  { %v2520_v34 = vpop.f32.mrf.mxu1 }
 0xe0d   :  { %v2525_v46 = vmul.f32 %v4881_v33, %v2520_v34 }
 0xe0e   :  { %v4697_v35 = vpop.f32.mrf.mxu1 }
 0xe0f   :  { %v5992_v35 = vld [vmem:[#allocation5_spill] sm:$0xff] }
 0xe14   :  { %v2662_v36 = vpop.f32.mrf.mxu1 }
 0xe15   :  { %v2663_v1 = vadd.f32 %v5269_v62, %v2662_v36  ;;  %v2732_v62 = vpop.f32.mrf.mxu0  ;;  %v5993_v36 = vld [vmem:[#allocation6_spill] sm:$0xff] }
 0xe16   :  { %v4719_v50 = vpop.f32.mrf.mxu1  ;;  %v2733_v63 = vadd.f32 %v5288_v27, %v2732_v62 }
 0xe17   :  { %4732 = vmatpush3.xpose.msk.msra.mxu1 %vm319_vm2, %v2663_v1  ;;  %v4730_v17 = vpop.f32.mrf.mxu0  ;;  %v5994_v1 = vld [vmem:[#allocation11_spill] sm:$0xff]  ;;  %v5996_v50 = vld [vmem:[#allocation13_spill] sm:$0xff] }
 0xe18   :  { %4736 = vmatprep.subr.mxu1 %v5989_v43 }
 0xe1a   :  { %4734 = vmatmul.mubr.msk.f32.vlgmr.msra.gmra.mxu1 %vm319_vm2, %v2593_v49  ;;  %v5995_v49 = vld [vmem:[#allocation12_spill] sm:$0xff] }
 0xe1b   :  { %4738 = vmatprep.mubr.msk.f32.mxu1 %vm4915_vm1, %v5989_v43  ;;  %4737 = vmatpush3.msk.msra.mxu1 %vm423_vm4, %v2733_v63 }
 0xe1c   :  { %4746 = vmatprep.subr.mxu1 %v5989_v43 }
 0xeda   :  { %v2808_v51 = vpop.f32.mrf.mxu1 }
 0xedb   :  { %v2812_v5 = vmul.f32 0.35355338, %v2808_v51 }
 0xedc   :  { %v4735_v52 = vpop.f32.mrf.mxu1 }
 0xedd   :  { %v2813_v7 = vadd.f32 %v5684_v20, %v2812_v5 }
 0xedf   :  { %v2814_v53 = vsel %vm404_vm3, %v2813_v7, -inf }
 0xee0   :  { %2815 = vmax.xlane.f32.xlu1 %v2814_v53 }
 0xf69   :  { %v2816_v0 = vpop.xlane.xlu1 %2815 }
 0xf6a   :  { %v2817_v15 = vmax.f32 %v2816_v0, 0.0  ;;  %v5997_v0 = vld [vmem:[#allocation7_spill] sm:$0xff] }
 0xf6c   :  { %v2818_v16 = vsub.f32 %v2813_v7, %v2817_v15  ;;  %v2824_v27 = vsub.f32 0.0, %v2817_v15  ;;  %v5999_v15 = vld [vmem:[#allocation9_spill] sm:$0xff] }
 0xf6e   :  { %v2819_v32 = vmul.f32 1.442695, %v2818_v16  ;;  %v6000_v16 = vld [vmem:[#allocation10_spill] sm:$0xff] }
 0xf70   :  { %4882 = vpow2.f32 %v2819_v32 }
 0xf7d   :  { %v4883_v18 = vpop.eup %4882 }
 0xf7e   :  { %4739 = vmatmul.mubr.msk.f32.vlgmr.msra.gmra.mxu1 %vm419_vm5, %v4883_v18  ;;  %v2821_v22 = vsel %vm404_vm3, %v4883_v18, 0.0 }
 0xf7f   :  { %2822 = vadd.xlane.f32.xlu1 %v2821_v22  ;;  %4747 = vmatpush3.msra.mxu1 %v5296_v40  ;;  %v2825_v40 = vmul.f32 1.442695, %v2824_v27 }
 0xf80   :  { %4748 = vmatprep.mubr.msk.f32.mxu1 %vm4915_vm1, %v5989_v43  ;;  %4762 = vmatprep.subr.mxu1 %v5989_v43 }
 0xf81   :  { %4884 = vpow2.f32 %v2825_v40 }
 0xf82   :  { %4749 = vmatmul.mubr.msk.f32.vlgmr.msra.gmra.mxu1 %vm319_vm2, %v2525_v46  ;;  %v5990_v46 = vld [vmem:[#allocation3_spill] sm:$0xff] }
 0xf83   :  { %4763 = vmatpush3.msra.mxu1 %v5310_v47  ;;  %4770 = vmatprep.mubr.msk.f32.mxu1 %vm4915_vm1, %v5989_v43 }
 0xf84   :  { %4764 = vmatprep.subr.mxu1 %v5989_v43 }
 0xf85   :  { %4765 = vmatpush3.msra.mxu1 %v5317_v48 }
 0xf86   :  { %4766 = vmatprep.subr.mxu1 %v5989_v43 }
 0xf87   :  { %4767 = vmatpush3.msra.mxu1 %v5330_v54 }
 0xf88   :  { %4768 = vmatprep.subr.mxu1 %v5989_v43 }
 0xf89   :  { %4769 = vmatpush3.msra.mxu1 %v5338_v55 }
 0xf8a   :  { %4771 = vmatmul.mubr.msk.f32.vlgmr.msra.gmra.mxu1 %vm80_vm0, %v5622_v6  ;;  %4784 = vmatprep.subr.mxu1 %v5989_v43 }
 0xf8b   :  { %4786 = vmatprep.mubr.msk.f32.mxu1 %vm4915_vm1, %v5989_v43 }
 0xf8e   :  { %v4885_v48 = vpop.eup %4884 }
0x1008   :  { %v2823_v47 = vpop.xlane.xlu1 %2822 }
0x1009   :  { %v2827_v31 = vadd.f32 %v4885_v48, %v2823_v47 }
0x100b   :  { %4886 = vrcp.f32 %v2827_v31 }
0x1018   :  { %v4887_v54 = vpop.eup %4886 }
0x103e   :  { %v2900_v58 = vpop.f32.mrf.mxu1 }
0x103f   :  { %v2905_v24 = vmul.f32 %v4887_v54, %v2900_v58 }
0x1040   :  { %v4740_v10 = vpop.f32.mrf.mxu1 }
0x1041   :  { %4744 = vmatmul.mubr.msk.f32.vlgmr.msra.gmra.mxu0 %vm319_vm2, %v2905_v24  ;;  %v4243_v24 = vld [vmem:[%s5939_s12] ss:$0 sm:$0xff] }
0x1042   :  { %4752 = vmatpush3.msra.mxu0 %v5349_v19  ;;  %v5742_v55 = vpop.f32.mrf.mxu1  ;;  %4759 = vmatprep.mubr.msk.f32.mxu0 %vm4915_vm1, %v5989_v43 }
0x1043   :  { %4753 = vmatprep.subr.mxu0 %v5989_v43 }
0x1044   :  { %4754 = vmatpush3.msra.mxu0 %v5355_v21  ;;  %v4750_v61 = vpop.f32.mrf.mxu1 }
0x1045   :  { %4755 = vmatprep.subr.mxu0 %v5989_v43 }
0x1046   :  { %4756 = vmatpush3.msra.mxu0 %v5366_v23 }
0x1047   :  { %4757 = vmatprep.subr.mxu0 %v5989_v43 }
0x1048   :  { %4758 = vmatpush3.msra.mxu0 %v5373_v26 }
0x1049   :  { %4760 = vmatmul.mubr.msk.f32.vlgmr.msra.gmra.mxu0 %vm80_vm0, %v5607_v4  ;;  %4773 = vmatprep.subr.mxu0 %v5989_v43 }
0x104a   :  { %4774 = vmatpush3.msra.mxu0 %v5394_v37  ;;  %4781 = vmatprep.mubr.msk.f32.mxu0 %vm4915_vm1, %v5989_v43  ;;  %v3188_v19 = vpop.f32.mrf.mxu1 }
0x104b   :  { %4775 = vmatprep.subr.mxu0 %v5989_v43  ;;  %v3189_v21 = vadd.f32 %v5386_v28, %v3188_v19 }
0x104c   :  { %4776 = vmatpush3.msra.mxu0 %v5399_v38  ;;  %v4772_v23 = vpop.f32.mrf.mxu1 }
0x104d   :  { %4777 = vmatprep.subr.mxu0 %v5989_v43  ;;  %4785 = vmatpush3.xpose.msk.msra.mxu1 %vm319_vm2, %v3189_v21 }
0x104e   :  { %4778 = vmatpush3.msra.mxu0 %v5406_v39  ;;  %4789 = vmatprep.subr.mxu1 %v5989_v43 }
0x104f   :  { %4779 = vmatprep.subr.mxu0 %v5989_v43 }
0x1050   :  { %4780 = vmatpush3.msra.mxu0 %v5413_v42 }
0x1051   :  { %4782 = vmatmul.mubr.msk.f32.vlgmr.msra.gmra.mxu0 %vm80_vm0, %v5622_v6  ;;  %4794 = vmatprep.subr.mxu0 %v5989_v43 }
0x1052   :  { %4795 = vmatpush3.msra.mxu0 %v5451_v25  ;;  %4796 = vmatprep.mubr.msk.f32.mxu0 %vm4915_vm1, %v5989_v43 }
0x1053   :  { %4810 = vmatprep.subr.mxu0 %v5989_v43 }
0x1101   :  { %v5774_v26 = vpop.f32.mrf.mxu0 }
0x1102   :  { %v3049_v22 = vadd.f32 %v5742_v55, %v5774_v26  ;;  %v2064_v55 = vadd.f32 %v4243_v24, %v5672_v3  ;;  %v26_v3 = vstv %s5941_s14 }
0x1103   :  { %v4745_v37 = vpop.f32.mrf.mxu0  ;;  %27 = vst [vmem:[#allocation2] sm:$0x1] %v26_v3 }
0x1109   :  { %v3118_v38 = vpop.f32.mrf.mxu0 }
0x110a   :  { %v3119_v39 = vadd.f32 %v5428_v57, %v3118_v38 }
0x110b   :  { %v4761_v42 = vpop.f32.mrf.mxu0 }
0x110c   :  { %4787 = vmatmul.mubr.msk.f32.vlgmr.msra.gmra.mxu1 %vm319_vm2, %v3119_v39 }
0x110d   :  { %4791 = vmatprep.mubr.msk.f32.mxu1 %vm4915_vm1, %v5989_v43 }
0x1111   :  { %v3258_v41 = vpop.f32.mrf.mxu0 }
0x1112   :  { %v3259_v12 = vadd.f32 %v5439_v29, %v3258_v41  ;;  %v5991_v29 = vld [vmem:[#allocation4_spill] sm:$0xff] }
0x1113   :  { %v4783_v44 = vpop.f32.mrf.mxu0 }
0x1114   :  { %4790 = vmatpush3.msk.msra.mxu1 %vm423_vm4, %v3259_v12 }
0x1115   :  { %4799 = vmatprep.subr.mxu1 %v5989_v43 }
0x11cc   :  { %v3334_v25 = vpop.f32.mrf.mxu1 }
0x11cd   :  { %v3338_v8 = vmul.f32 0.35355338, %v3334_v25  ;;  %v4245_v25 = vld [vmem:[#allocation2] ss:$0 sm:$0xff] }
0x11ce   :  { %v4788_v28 = vpop.f32.mrf.mxu1 }
0x11cf   :  { %v3339_v11 = vadd.f32 %v5684_v20, %v3338_v8 }
0x11d1   :  { %v3340_v30 = vsel %vm404_vm3, %v3339_v11, -inf }
0x11d2   :  { %3341 = vmax.xlane.f32.xlu0 %v3340_v30 }
0x125b   :  { %v3342_v57 = vpop.xlane.xlu0 %3341 }
0x125c   :  { %v3343_v13 = vmax.f32 %v3342_v57, 0.0 }
0x125e   :  { %v3344_v14 = vsub.f32 %v3339_v11, %v3343_v13 }
0x1260   :  { %v3345_v45 = vmul.f32 1.442695, %v3344_v14 }
0x1262   :  { %4888 = vpow2.f32 %v3345_v45 }
0x126f   :  { %v4889_v33 = vpop.eup %4888 }
0x1270   :  { %4792 = vmatmul.mubr.msk.f32.vlgmr.msra.gmra.mxu1 %vm419_vm5, %v4889_v33  ;;  %v3347_v34 = vsel %vm404_vm3, %v4889_v33, 0.0 }
0x1271   :  { %3348 = vadd.xlane.f32.xlu1 %v3347_v34  ;;  %4800 = vmatpush3.msra.mxu1 %v5990_v46 }
0x1272   :  { %4801 = vmatprep.subr.mxu1 %v5989_v43  ;;  %4807 = vmatprep.mubr.msk.f32.mxu1 %vm4915_vm1, %v5989_v43 }
0x1273   :  { %4802 = vmatpush3.msra.mxu1 %v5991_v29 }
0x1274   :  { %4803 = vmatprep.subr.mxu1 %v5989_v43 }
0x1275   :  { %4804 = vmatpush3.msra.mxu1 %v5992_v35 }
0x1276   :  { %4805 = vmatprep.subr.mxu1 %v5989_v43 }
0x1277   :  { %4806 = vmatpush3.msra.mxu1 %v5993_v36 }
0x1278   :  { %4808 = vmatmul.mubr.msk.f32.vlgmr.msra.gmra.mxu1 %vm80_vm0, %v5607_v4  ;;  %4821 = vmatprep.subr.mxu1 %v5989_v43 }
0x1279   :  { %4822 = vmatpush3.msra.mxu1 %v5525_v60  ;;  %4829 = vmatprep.mubr.msk.f32.mxu1 %vm4915_vm1, %v5989_v43  ;;  %v3350_v60 = vsub.f32 0.0, %v3343_v13 }
0x127a   :  { %4823 = vmatprep.subr.mxu1 %v5989_v43 }
0x127b   :  { %4824 = vmatpush3.msra.mxu1 %v5994_v1  ;;  %v3351_v51 = vmul.f32 1.442695, %v3350_v60 }
0x127c   :  { %4825 = vmatprep.subr.mxu1 %v5989_v43 }
0x127d   :  { %4826 = vmatpush3.msra.mxu1 %v5995_v49  ;;  %4890 = vpow2.f32 %v3351_v51 }
0x127e   :  { %4827 = vmatprep.subr.mxu1 %v5989_v43 }
0x127f   :  { %4828 = vmatpush3.msra.mxu1 %v5996_v50 }
0x1280   :  { %4830 = vmatmul.mubr.msk.f32.vlgmr.msra.gmra.mxu1 %vm80_vm0, %v5622_v6  ;;  %4842 = vmatprep.subr.mxu1 %v5989_v43 }
0x1281   :  { %4843 = vmatpush3.msra.mxu1 %v5600_v2  ;;  %4844 = vmatprep.mubr.msk.f32.mxu1 %vm4915_vm1, %v5989_v43  ;;  %v5998_v2 = vld [vmem:[#allocation8_spill] sm:$0xff] }
0x128a   :  { %v4891_v52 = vpop.eup %4890 }
0x12fa   :  { %v3349_v5 = vpop.xlane.xlu1 %3348 }
0x12fb   :  { %v3353_v7 = vadd.f32 %v4891_v52, %v3349_v5 }
0x12fd   :  { %4892 = vrcp.f32 %v3353_v7 }
0x130a   :  { %v4893_v53 = vpop.eup %4892 }
0x1330   :  { %v3426_v62 = vpop.f32.mrf.mxu1 }
0x1331   :  { %v3431_v63 = vmul.f32 %v4893_v53, %v3426_v62  ;;  %v2097_v53 = vld [vmem:[%s5942_s2] sm:$0x1f] }
0x1332   :  { %v4793_v17 = vpop.f32.mrf.mxu1  ;;  %v2112_v62 = vld [vmem:[%s5943_s3] sm:$0x3f] }
0x1333   :  { %4797 = vmatmul.mubr.msk.f32.vlgmr.msra.gmra.mxu0 %vm319_vm2, %v3431_v63  ;;  %v4282_v63 = vld [vmem:[%s5942_s2 + $0x8] sm:$0x1f] }
0x1334   :  { %4811 = vmatpush3.msra.mxu0 %v5997_v0  ;;  %4818 = vmatprep.mubr.msk.f32.mxu0 %vm4915_vm1, %v5989_v43 }
0x1335   :  { %4812 = vmatprep.subr.mxu0 %v5989_v43 }
0x1336   :  { %4813 = vmatpush3.msra.mxu0 %v5998_v2 }
0x1337   :  { %4814 = vmatprep.subr.mxu0 %v5989_v43 }
0x1338   :  { %4815 = vmatpush3.msra.mxu0 %v5999_v15  ;;  %v3572_v32 = vpop.f32.mrf.mxu1 }
0x1339   :  { %4816 = vmatprep.subr.mxu0 %v5989_v43  ;;  %v3573_v54 = vadd.f32 %v5566_v9, %v3572_v32  ;;  %v4244_v9 = vld [vmem:[%s5940_s13] ss:$0 sm:$0xff] }
0x133a   :  { %4817 = vmatpush3.msra.mxu0 %v6000_v16  ;;  %v4809_v18 = vpop.f32.mrf.mxu1  ;;  %v2072_v23 = vmul.f32 %v4244_v9, %v2064_v55 }
0x133b   :  { %4819 = vmatmul.mubr.msk.f32.vlgmr.msra.gmra.mxu0 %vm80_vm0, %v5622_v6  ;;  %4832 = vmatprep.subr.mxu0 %v5989_v43 }
0x133c   :  { %4834 = vmatprep.mubr.msk.f32.mxu0 %vm4915_vm1, %v5989_v43 }
0x1340   :  { %v3712_v26 = vpop.f32.mrf.mxu1 }
0x1341   :  { %v3713_v38 = vadd.f32 %v5580_v56, %v3712_v26 }
0x1342   :  { %v4831_v37 = vpop.f32.mrf.mxu1 }
0x13f3   :  { %v3501_v27 = vpop.f32.mrf.mxu0 }
0x13f4   :  { %v5831_v40 = vadd.f32 %v3501_v27, %v3049_v22  ;;  %v4283_v22 = vld [vmem:[%s5943_s3 + $0x8] sm:$0x3f] }
0x13f5   :  { %v4798_v47 = vpop.f32.mrf.mxu0 }
0x13f6   :  { %v4912_v47 = vld [vmem:[%s5976_s9] sm:$0x1f] }
0x13fb   :  { %v3642_v48 = vpop.f32.mrf.mxu0 }
0x13fc   :  { %v3643_v31 = vadd.f32 %v5561_v59, %v3642_v48 }
0x13fd   :  { %v4820_v58 = vpop.f32.mrf.mxu0 }
0x13fe   :  { %4833 = vmatpush3.xpose.msk.msra.mxu0 %vm319_vm2, %v3643_v31  ;;  %v4913_v58 = vld [vmem:[%s5975_s26] sm:$0x3f] }
0x13ff   :  { %4837 = vmatprep.subr.mxu0 %v5989_v43 }
0x1401   :  { %4835 = vmatmul.mubr.msk.f32.vlgmr.msra.gmra.mxu0 %vm319_vm2, %v3573_v54 }
0x1402   :  { %4839 = vmatprep.mubr.msk.f32.mxu0 %vm4915_vm1, %v5989_v43  ;;  %v2074_v43 = vsel %vm2073_vm6, %v2072_v23, 0.0  ;;  %4838 = vmatpush3.msk.msra.mxu0 %vm423_vm4, %v3713_v38 }
0x14c1   :  { %v3788_v10 = vpop.f32.mrf.mxu0 }
0x14c2   :  { %v3792_v59 = vmul.f32 0.35355338, %v3788_v10 }
0x14c3   :  { %v4836_v61 = vpop.f32.mrf.mxu0 }
0x14c4   :  { %v3793_v19 = vadd.f32 %v5684_v20, %v3792_v59  ;;  %v4916_v20 = vmov 0  }
0x14c5   :  { %4850 = vset.pattern.permute.xlu0 %v4916_v20  ;;  %4851 = vset.pattern.permute.xlu1 %v4916_v20 }
0x14c6   :  { %v3794_v21 = vsel %vm404_vm3, %v3793_v19, -inf }
0x14c7   :  { %3795 = vmax.xlane.f32.xlu0 %v3794_v21 }
0x14cb   :  { %2075 = vadd.xlane.f32.xlu0 %v2074_v43 }
0x1550   :  { %v3796_v39 = vpop.xlane.xlu0 %3795 }
0x1551   :  { %v3797_v42 = vmax.f32 %v3796_v39, 0.0 }
0x1553   :  { %v3798_v8 = vsub.f32 %v3793_v19, %v3797_v42  ;;  %v3804_v45 = vsub.f32 0.0, %v3797_v42 }
0x1554   :  { %v2076_v28 = vpop.xlane.xlu0 %2075 }
0x1555   :  { %v3799_v11 = vmul.f32 1.442695, %v3798_v8  ;;  %v2084_v30 = vadd.f32 %v4245_v25, %v2076_v28  ;;  %v3805_v33 = vmul.f32 1.442695, %v3804_v45 }
0x1557   :  { %4894 = vpow2.f32 %v3799_v11  ;;  %v2085_v41 = vsub.f32 0.0, %v2084_v30 }
0x1559   :  { %v2086_v12 = vmul.f32 1.442695, %v2085_v41 }
0x155b   :  { %4896 = vpow2.f32 %v2086_v12 }
0x1564   :  { %v4895_v44 = vpop.eup %4894 }
0x1565   :  { %4840 = vmatmul.mubr.msk.f32.vlgmr.msra.gmra.mxu0 %vm419_vm5, %v4895_v44  ;;  %v3801_v56 = vsel %vm404_vm3, %v4895_v44, 0.0 }
0x1566   :  { %3802 = vadd.xlane.f32.xlu1 %v3801_v56 }
0x1568   :  { %v4897_v57 = vpop.eup %4896 }
0x1569   :  { %v2088_v13 = vadd.f32 1.0, %v4897_v57 }
0x156b   :  { %4898 = vrcp.f32 %v2088_v13 }
0x156c   :  { %4900 = vpow2.f32 %v3805_v33 }
0x1578   :  { %v4899_v14 = vpop.eup %4898 }
0x1579   :  { %2093 = vperm.xlu0 %4850, %v4899_v14   ;;  %v4901_v46 = vpop.eup %4900 }
0x15ef   :  { %v3803_v34 = vpop.xlane.xlu1 %3802 }
0x15f0   :  { %v3807_v29 = vadd.f32 %v4901_v46, %v3803_v34 }
0x15f2   :  { %4902 = vrcp.f32 %v3807_v29 }
0x15f4   :  { %v2094_v27 = vpop.permute.xlu0 %2093 }
0x15f5   :  { %v2096_v48 = vmul.f32 %v4912_v47, %v2094_v27 }
0x15ff   :  { %v4903_v35 = vpop.eup %4902 }
0x1625   :  { %v3880_v36 = vpop.f32.mrf.mxu0 }
0x1626   :  { %v3885_v1 = vmul.f32 %v4903_v35, %v3880_v36 }
0x1627   :  { %v4841_v49 = vpop.f32.mrf.mxu0 }
0x1628   :  { %4845 = vmatmul.mubr.msk.f32.vlgmr.msra.gmra.mxu1 %vm319_vm2, %v3885_v1 }
0x16e8   :  { %v3955_v50 = vpop.f32.mrf.mxu1 }
0x16e9   :  { %v3959_v60 = vadd.f32 %v3955_v50, %v5831_v40 }
0x16ea   :  { %v4846_v51 = vpop.f32.mrf.mxu1 }
0x16eb   :  { %v3960_v5 = vadd.f32 %v4243_v24, %v3959_v60 }
0x16ed   :  { %v3961_v52 = vmul.f32 %v4244_v9, %v3960_v5 }
0x16ef   :  { %v3962_v7 = vsel %vm2073_vm6, %v3961_v52, 0.0 }
0x16f0   :  { %3963 = vadd.xlane.f32.xlu1 %v3962_v7 }
0x1701   :  { %2100 = vperm.xlu1 %4851, %v2097_v53  }
0x1705   :  { %2115 = vperm.xlu1 %4851, %v2112_v62  }
0x1709   :  { %3982 = vperm.xlu1 %4851, %v4282_v63  }
0x1779   :  { %v3964_v17 = vpop.xlane.xlu1 %3963 }
0x177a   :  { %v3965_v0 = vadd.f32 %v4245_v25, %v3964_v17 }
0x177c   :  { %v3966_v2 = vsub.f32 0.0, %v3965_v0 }
0x177d   :  { %v2101_v40 = vpop.permute.xlu1 %2100 }
0x177e   :  { %v3967_v15 = vmul.f32 1.442695, %v3966_v2  ;;  %v2103_v54 = vmul.f32 %v2101_v40, %v2096_v48 }
0x1780   :  { %4904 = vpow2.f32 %v3967_v15  ;;  %v2104_v10 = vsel %vm2073_vm6, %v2103_v54, 0.0 }
0x1781   :  { %v2116_v31 = vpop.permute.xlu1 %2115  ;;  %v2105_v59 = vrot.slane %v2104_v10, 4 }
0x1782   :  { %v2118_v24 = vmul.f32 %v4913_v58, %v2116_v31 }
0x1783   :  { %v2106_v19 = vadd.f32 %v2105_v59, %v2104_v10 }
0x1784   :  { %v2120_v55 = vsel %vm2119_vm7, %v2118_v24, 0.0 }
0x1785   :  { %v3983_v61 = vpop.permute.xlu1 %3982  ;;  %v2121_v9 = vrot.slane %v2120_v55, 4  ;;  %v2107_v26 = vrot.slane %v2106_v19, 2 }
0x1787   :  { %v2122_v43 = vadd.f32 %v2121_v9, %v2120_v55  ;;  %v2108_v8 = vadd.f32 %v2107_v26, %v2106_v19 }
0x1789   :  { %v2123_v39 = vrot.slane %v2122_v43, 2  ;;  %v2109_v44 = vrot.slane %v2108_v8, 1 }
0x178b   :  { %v2124_v30 = vadd.f32 %v2123_v39, %v2122_v43  ;;  %v2110_v45 = vadd.f32 %v2109_v44, %v2108_v8 }
0x178d   :  { %v4905_v16 = vpop.eup %4904  ;;  %v2125_v57 = vrot.slane %v2124_v30, 1 }
0x178e   :  { %v3969_v32 = vadd.f32 1.0, %v4905_v16 }
0x178f   :  { %v2126_v46 = vadd.f32 %v2125_v57, %v2124_v30  ;;  %v4083_v30 = vld [vmem:[%s5975_s26] sm:$0x3f] }
0x1790   :  { %4906 = vrcp.f32 %v3969_v32 }
0x179d   :  { %v4907_v18 = vpop.eup %4906 }
0x179e   :  { %3974 = vperm.xlu1 %4851, %v4907_v18  }
0x17a2   :  { %3998 = vperm.xlu1 %4851, %v4283_v22  }
0x1819   :  { %v3975_v21 = vpop.permute.xlu1 %3974 }
0x181a   :  { %v3977_v23 = vmul.f32 %v5607_v4, %v3975_v21 }
0x181c   :  { %v3985_v3 = vmul.f32 %v3983_v61, %v3977_v23 }
0x181d   :  { %v3999_v37 = vpop.permute.xlu1 %3998 }
0x181e   :  { %v3986_v38 = vsel %vm2073_vm6, %v3985_v3, 0.0  ;;  %v4001_v20 = vmul.f32 %v5622_v6, %v3999_v37 }
0x181f   :  { %v3987_v42 = vrot.slane %v3986_v38, 4 }
0x1820   :  { %v4002_v25 = vsel %vm2119_vm7, %v4001_v20, 0.0 }
0x1821   :  { %v3988_v28 = vadd.f32 %v3987_v42, %v3986_v38  ;;  %v4003_v11 = vrot.slane %v4002_v25, 4 }
0x1823   :  { %v3989_v41 = vrot.slane %v3988_v28, 2  ;;  %v4004_v12 = vadd.f32 %v4003_v11, %v4002_v25 }
0x1825   :  { %v3990_v4 = vadd.f32 %v3989_v41, %v3988_v28  ;;  %v4005_v56 = vrot.slane %v4004_v12, 2  ;;  %v4291_v41 = vld [vmem:[%s5975_s26 + $0x8] sm:$0x3f] }
0x1827   :  { %v3991_v13 = vrot.slane %v3990_v4, 1  ;;  %v4006_v14 = vadd.f32 %v4005_v56, %v4004_v12  ;;  %v4284_v12 = vld [vmem:[%s5944_s15] ss:$0 sm:$0xff] }
0x1829   :  { %v3992_v33 = vadd.f32 %v3991_v13, %v3990_v4  ;;  %v4007_v34 = vrot.slane %v4006_v14, 1  ;;  %v4286_v13 = vld [vmem:[%s5945_s17] ss:$0 sm:$0xff] }
0x182b   :  { %v3993_v29 = vadd.f32 %v3992_v33, %v2110_v45  ;;  %v4008_v35 = vadd.f32 %v4007_v34, %v4006_v14  ;;  %v4285_v45 = vld [vmem:[%s5946_s16] ss:$0 sm:$0xff] }
0x182d   :  { %v4011_v36 = vmul.f32 0.125, %v3993_v29  ;;  %v4009_v1 = vadd.f32 %v4008_v35, %v2126_v46 }
0x182f   :  { %v4014_v49 = vsub.f32 %v2096_v48, %v4011_v36  ;;  %v4036_v50 = vsub.f32 %v3977_v23, %v4011_v36  ;;  %v5884_v60 = vmul.f32 0.1, %v4009_v1 }
0x1831   :  { %v4015_v51 = vmul.f32 %v4014_v49, %v4014_v49  ;;  %v4037_v5 = vmul.f32 %v4036_v50, %v4036_v50  ;;  %v4025_v52 = vsub.f32 %v4913_v58, %v5884_v60  ;;  %v4047_v7 = vsub.f32 %v5622_v6, %v5884_v60 }
0x1832   :  { %v4084_v44 = vsub.f32 %v4083_v30, %v5884_v60  ;;  %v4123_v4 = vsub.f32 %v4291_v41, %v5884_v60  ;;  %v4071_v56 = vmul.f32 %v4284_v12, %v4014_v49  ;;  %v4109_v57 = vmul.f32 %v4284_v12, %v4036_v50  ;;  %v4287_v49 = vld [vmem:[%s5947_s18] ss:$0 sm:$0xff] }
0x1833   :  { %v4016_v53 = vmul.f32 %v4015_v51, %v2101_v40  ;;  %v4038_v62 = vmul.f32 %v4037_v5, %v3983_v61  ;;  %v4026_v63 = vmul.f32 %v4025_v52, %v4025_v52  ;;  %v4048_v17 = vmul.f32 %v4047_v7, %v4047_v7 }
0x1834   :  { %v4091_v46 = vmul.f32 %v4286_v13, %v4084_v44  ;;  %v4130_v29 = vmul.f32 %v4286_v13, %v4123_v4 }
0x1835   :  { %v4017_v0 = vsel %vm2073_vm6, %v4016_v53, 0.0  ;;  %v4039_v2 = vsel %vm2073_vm6, %v4038_v62, 0.0  ;;  %v4027_v32 = vmul.f32 %v4026_v63, %v2116_v31  ;;  %v4049_v18 = vmul.f32 %v4048_v17, %v3999_v37 }
0x1836   :  { %v4018_v15 = vrot.slane %v4017_v0, 4  ;;  %v4040_v16 = vrot.slane %v4039_v2, 4 }
0x1837   :  { %v4028_v47 = vsel %vm2119_vm7, %v4027_v32, 0.0  ;;  %v4050_v48 = vsel %vm2119_vm7, %v4049_v18, 0.0 }
0x1838   :  { %v4019_v22 = vadd.f32 %v4018_v15, %v4017_v0  ;;  %v4041_v27 = vadd.f32 %v4040_v16, %v4039_v2  ;;  %v4029_v54 = vrot.slane %v4028_v47, 4  ;;  %v4051_v6 = vrot.slane %v4050_v48, 4 }
0x183a   :  { %v4020_v40 = vrot.slane %v4019_v22, 2  ;;  %v4042_v58 = vrot.slane %v4041_v27, 2  ;;  %v4030_v24 = vadd.f32 %v4029_v54, %v4028_v47  ;;  %v4052_v10 = vadd.f32 %v4051_v6, %v4050_v48 }
0x183c   :  { %v4021_v55 = vadd.f32 %v4020_v40, %v4019_v22  ;;  %v4043_v59 = vadd.f32 %v4042_v58, %v4041_v27  ;;  %v4031_v61 = vrot.slane %v4030_v24, 2  ;;  %v4053_v9 = vrot.slane %v4052_v10, 2 }
0x183e   :  { %v4022_v19 = vrot.slane %v4021_v55, 1  ;;  %v4044_v21 = vrot.slane %v4043_v59, 1  ;;  %v4032_v31 = vadd.f32 %v4031_v61, %v4030_v24  ;;  %v4054_v23 = vadd.f32 %v4053_v9, %v4052_v10 }
0x1840   :  { %v4023_v43 = vadd.f32 %v4022_v19, %v4021_v55  ;;  %v4045_v3 = vadd.f32 %v4044_v21, %v4043_v59  ;;  %v4033_v26 = vrot.slane %v4032_v31, 1  ;;  %v4055_v37 = vrot.slane %v4054_v23, 1 }
0x1842   :  { %v4046_v38 = vadd.f32 %v4045_v3, %v4023_v43  ;;  %v4034_v20 = vadd.f32 %v4033_v26, %v4032_v31  ;;  %v4056_v39 = vadd.f32 %v4055_v37, %v4054_v23 }
0x1844   :  { %v4058_v42 = vmul.f32 0.125, %v4046_v38  ;;  %v4057_v25 = vadd.f32 %v4056_v39, %v4034_v20 }
0x1846   :  { %v4059_v8 = vadd.f32 1e-05, %v4058_v42  ;;  %v4061_v28 = vmul.f32 0.1, %v4057_v25 }
0x1848   :  { %4908 = vrsqrt.f32 %v4059_v8  ;;  %v4062_v11 = vadd.f32 1e-05, %v4061_v28 }
0x184a   :  { %4910 = vrsqrt.f32 %v4062_v11 }
0x1855   :  { %v4909_v14 = vpop.eup %4908 }
0x1856   :  { %v4072_v33 = vmul.f32 %v4909_v14, %v4071_v56  ;;  %v4110_v34 = vmul.f32 %v4909_v14, %v4109_v57 }
0x1857   :  { %v4911_v35 = vpop.eup %4910 }
0x1858   :  { %v4080_v36 = vadd.f32 %v4285_v45, %v4072_v33  ;;  %v4118_v1 = vadd.f32 %v4285_v45, %v4110_v34  ;;  %v4092_v50 = vmul.f32 %v4911_v35, %v4091_v46  ;;  %v4131_v60 = vmul.f32 %v4911_v35, %v4130_v29 }
0x185a   :  { %4081 = vst.msk [vmem:[%s5948_s19] sm:$0x1f] %vm2073_vm6, %v4080_v36  ;;  %4290 = vst.msk [vmem:[%s5948_s19 + $0x8] sm:$0x1f] %vm2073_vm6, %v4118_v1  ;;  %v4100_v51 = vadd.f32 %v4287_v49, %v4092_v50  ;;  %v4139_v5 = vadd.f32 %v4287_v49, %v4131_v60 }
0x185c   :  { %4101 = vst.msk [vmem:[%s5949_s20] sm:$0x3f] %vm2119_vm7, %v4100_v51  ;;  %4294 = vst.msk [vmem:[%s5949_s20 + $0x8] sm:$0x3f] %vm2119_vm7, %v4139_v5 }

</bundles_post_ra>
